<compile_context>
chip_gen: v5e
topology: v5e:2x2
jax: 0.10.0
libtpu: 0.0.40
codegen_flags: <defaults>
</compile_context>

<pallas_src>
import math
import functools

import jax
import jax.numpy as jnp
from jax.experimental import pallas as pl
from jax.experimental.pallas import tpu as pltpu

# StarReLU constants (s * relu(x)^2 + b)
SR_SCALE = 0.8944271909999159
SR_BIAS = -0.4472135954999579


def _gw_attn_ff_kernel(x_ref, wf_ref, bg_ref, eg_ref, wo_ref, wff_ref, o_ref, *,
                       dim, dim_head, dim_ff, heads, w_tile, n):
    """One block of `w_tile` windows (m = w_tile * n token rows).

    x_ref  : (m, dim)          bf16  tokens, window-major rows
    wf_ref : (dim, Fpad)       bf16  cols = [q*scale | kv | ff_in | gate | 0pad]
    bg_ref : (1, heads)        f32   attn_gate bias
    eg_ref : (heads, dim)      bf16  0/1 gate-expansion matrix
    wo_ref : (dim, dim)        bf16  attn_out
    wff_ref: (dim_ff, dim)     bf16  ff_out linear
    o_ref  : (m, dim)          bf16
    """
    m = w_tile * n

    # One wide fused projection on the MXU (f32 accumulation).
    fused = jnp.dot(x_ref[...], wf_ref[...],
                    preferred_element_type=jnp.float32)                    # (m, Fpad)

    # ---- StarReLU feed-forward branch first: its (m, dim_ff) f32 temporaries
    # die before the attention block (dropout is an eval-time no-op). ---------
    x_ff = fused[:, 2 * dim:2 * dim + dim_ff]
    ff = SR_SCALE * jnp.square(jnp.maximum(x_ff, 0.0)) + SR_BIAS
    ff_proj = jnp.dot(ff.astype(jnp.bfloat16), wff_ref[...],
                      preferred_element_type=jnp.float32)                  # (m, dim)

    # ---- head gate: sigmoid, then broadcast head h's gate over its dim_head
    # lanes with a tiny 0/1 expansion matmul (lane-dense, no (b,n,1) tensor). -
    g_off = 2 * dim + dim_ff
    gate = jax.nn.sigmoid(fused[:, g_off:g_off + heads] + bg_ref[...])     # (m, heads) f32
    gate_full = jnp.dot(gate.astype(jnp.bfloat16), eg_ref[...],
                        preferred_element_type=jnp.float32).astype(jnp.bfloat16)

    # ---- multi-head attention, heads and windows batched together ----------
    # bf16 slabs BEFORE the per-head shuffle; q scale already folded into wf.
    q = fused[:, :dim].astype(jnp.bfloat16).reshape(w_tile, n, dim)
    kv = fused[:, dim:2 * dim].astype(jnp.bfloat16).reshape(w_tile, n, dim)
    qh = jnp.concatenate(
        [q[:, :, h * dim_head:(h + 1) * dim_head] for h in range(heads)], axis=0)
    kh = jnp.concatenate(
        [kv[:, :, h * dim_head:(h + 1) * dim_head] for h in range(heads)], axis=0)
    # qh/kh: (heads * w_tile, n, dim_head) bf16, batch index = h * w_tile + w

    s = jnp.einsum('bqd,bkd->bqk', qh, kh,
                   preferred_element_type=jnp.float32)                     # (hw, n, n) f32
    p = jnp.exp(s - jnp.max(s, axis=-1, keepdims=True))
    l = jnp.sum(p, axis=-1, keepdims=True)                                 # (hw, n, 1) f32
    o = jnp.einsum('bqk,bkd->bqd', p.astype(jnp.bfloat16), kh,
                   preferred_element_type=jnp.float32)                     # (hw, n, dh) f32
    # normalize the 32-lane o (not the 64-lane p); approx reciprocal -> EUP slot
    o = (o * pl.reciprocal(l, approx=True)).astype(jnp.bfloat16)

    # re-pack heads to token-major (m, dim) in bf16, gate, one full-K out proj.
    attn = jnp.concatenate(
        [o[h * w_tile:(h + 1) * w_tile] for h in range(heads)], axis=-1)   # (w, n, dim)
    attn = attn.reshape(m, dim) * gate_full
    attn_proj = jnp.dot(attn, wo_ref[...], preferred_element_type=jnp.float32)

    o_ref[...] = (attn_proj + ff_proj).astype(o_ref.dtype)


def _tpu_vmem_capacity_bytes():
    try:
        return int(pltpu.get_tpu_info().vmem_capacity_bytes)
    except Exception:
        return None


def fused_gw_attention_ff(x, params, *, dim_head=32, window_size=8, w_tile=8):
    """x: (B, C, H, W) NCHW (PyTorch convention). Returns (B, C, H, W) in x.dtype."""
    wf, wg, bg, wo, wff = (params[k] for k in ("wf", "wg", "bg", "wo", "wff"))
    B, C, H, W = x.shape
    dim = C
    heads = dim // dim_head
    dim_ff = wff.shape[0]
    ws = window_size
    n = ws * ws

    # pad spatial dims to a multiple of window_size (constant 0, like F.pad);
    # the window shuffle runs in bf16 to halve its HBM traffic.
    hpad = (-H) % ws
    wpad = (-W) % ws
    xb = x.astype(jnp.bfloat16)
    if hpad or wpad:
        xb = jnp.pad(xb, ((0, 0), (0, 0), (0, hpad), (0, wpad)))
    Hp, Wp = H + hpad, W + wpad
    nh, nw = Hp // ws, Wp // ws

    # 'b c (h p1) (w p2) -> (b h w) (p1 p2) c'
    # TODO(synk): this shuffle could be folded into the kernel with a
    # (1, dim, ws, Wp) BlockSpec + in-VMEM transpose to save one HBM round-trip.
    xw = xb.reshape(B, dim, nh, ws, nw, ws)
    xw = xw.transpose(0, 2, 4, 3, 5, 1).reshape(B * nh * nw, n, dim)
    num_windows = B * nh * nw

    # ---- block size / VMEM budget per TPU generation -------------------------
    cap = _tpu_vmem_capacity_bytes()
    if cap is not None and cap <= 80 * 2**20 and dim >= 512:
        w_tile = min(w_tile, 4)                 # v7x: 64 MiB VMEM per TensorCore
    vmem_limit = 64 * 2**20 if cap is None else min(100 * 2**20, cap * 3 // 4)

    w_tile = max(1, min(w_tile, num_windows))
    if num_windows >= 2:                        # keep grid >= 2 (both v7x cores busy)
        w_tile = min(w_tile, -(-num_windows // 2))
    nwin_pad = -(-num_windows // w_tile) * w_tile
    if nwin_pad != num_windows:
        xw = jnp.concatenate(
            [xw, jnp.zeros((nwin_pad - num_windows, n, dim), xw.dtype)], axis=0)
    x2d = xw.reshape(nwin_pad * n, dim)         # lane-dense 2-D slab

    # Fused weight [q * softmax_scale | kv | ff_in | gate], lane-padded to 128.
    scale = 1.0 / math.sqrt(dim_head)
    wf_full = jnp.concatenate([wf[:, :dim] * scale, wf[:, dim:], wg], axis=1)
    fcols = 2 * dim + dim_ff + heads
    fpad = -(-fcols // 128) * 128
    if fpad != fcols:
        wf_full = jnp.pad(wf_full, ((0, 0), (0, fpad - fcols)))
    wf_full = wf_full.astype(jnp.bfloat16)
    bg_f = bg.reshape(1, heads).astype(jnp.float32)
    # 0/1 expansion matrix: broadcasts head h's gate over its dim_head lanes.
    eg = jnp.repeat(jnp.eye(heads, dtype=jnp.bfloat16), dim_head, axis=1)
    wo_b = wo.astype(jnp.bfloat16)
    wff_b = wff.astype(jnp.bfloat16)

    rows = w_tile * n
    kernel = functools.partial(
        _gw_attn_ff_kernel, dim=dim, dim_head=dim_head, dim_ff=dim_ff,
        heads=heads, w_tile=w_tile, n=n)

    const = lambda i: (0, 0)
    single = pl.Buffered(1)                     # constant-index weights: 1 buffer
    out2d = pl.pallas_call(
        kernel,
        out_shape=jax.ShapeDtypeStruct((nwin_pad * n, dim), jnp.bfloat16),
        grid_spec=pltpu.PrefetchScalarGridSpec(
            num_scalar_prefetch=0,
            grid=(nwin_pad // w_tile,),
            in_specs=[
                pl.BlockSpec((rows, dim), lambda i: (i, 0)),               # tokens
                pl.BlockSpec((dim, fpad), const, pipeline_mode=single),    # fused W
                pl.BlockSpec((1, heads), const),                           # gate bias
                pl.BlockSpec((heads, dim), const),                         # gate expand
                pl.BlockSpec((dim, dim), const, pipeline_mode=single),     # attn_out
                pl.BlockSpec((dim_ff, dim), const, pipeline_mode=single),  # ff_out
            ],
            out_specs=pl.BlockSpec((rows, dim), lambda i: (i, 0)),
        ),
        compiler_params=pltpu.CompilerParams(
            dimension_semantics=("parallel",),
            vmem_limit_bytes=vmem_limit),
    )(x2d, wf_full, bg_f, eg, wo_b, wff_b)

    # '(b h w) (p1 p2) c -> b c (h p1) (w p2)' in bf16, strip padding, cast once.
    out = out2d[:num_windows * n].reshape(B, nh, nw, ws, ws, dim)
    y = out.transpose(0, 5, 1, 3, 2, 4).reshape(B, dim, Hp, Wp)
    return y[:, :, :H, :W].astype(x.dtype)


def _reference(x, params, *, dim_head=32, window_size=8):
    """Pure-JAX f32 reference mirroring the PyTorch forward."""
    wf, wg, bg, wo, wff = (params[k] for k in ("wf", "wg", "bg", "wo", "wff"))
    B, C, H, W = x.shape
    dim = C
    heads = dim // dim_head
    ws = window_size
    hpad = (-H) % ws
    wpad = (-W) % ws
    if hpad or wpad:
        x = jnp.pad(x, ((0, 0), (0, 0), (0, hpad), (0, wpad)))
    Hp, Wp = H + hpad, W + wpad
    nh, nw = Hp // ws, Wp // ws
    n = ws * ws
    xw = x.reshape(B, C, nh, ws, nw, ws).transpose(0, 2, 4, 3, 5, 1)
    xw = xw.reshape(B * nh * nw, n, C).astype(jnp.float32)

    fused = xw @ wf
    q, kv, x_ff = fused[..., :dim], fused[..., dim:2 * dim], fused[..., 2 * dim:]
    qh = q.reshape(-1, n, heads, dim_head).transpose(0, 2, 1, 3)
    kh = kv.reshape(-1, n, heads, dim_head).transpose(0, 2, 1, 3)
    s = jnp.einsum("bhqd,bhkd->bhqk", qh, kh) / math.sqrt(dim_head)
    p = jax.nn.softmax(s, axis=-1)
    attn = jnp.einsum("bhqk,bhkd->bhqd", p, kh)
    gate = jax.nn.sigmoid(xw @ wg + bg)                       # (bw, n, heads)
    attn = attn * gate.transpose(0, 2, 1)[..., None]
    attn = attn.transpose(0, 2, 1, 3).reshape(-1, n, dim)
    ff = SR_SCALE * jnp.square(jnp.maximum(x_ff, 0.0)) + SR_BIAS
    out = attn @ wo + ff @ wff
    y = out.reshape(B, nh, nw, ws, ws, C).transpose(0, 5, 1, 3, 2, 4)
    return y.reshape(B, C, Hp, Wp)[:, :, :H, :W]


def init_params(key, dim, dim_head=32, dim_ff=None):
    if dim_ff is None:
        dim_ff = dim * 4
    heads = dim // dim_head
    k1, k2, k3, k4 = jax.random.split(key, 4)
    std = 0.05
    return {
        # stored as (in, out) — equivalent to PyTorch's x @ W.T with W (out, in)
        "wf": std * jax.random.normal(k1, (dim, 2 * dim + dim_ff), jnp.float32),
        "wg": std * jax.random.normal(k2, (dim, heads), jnp.float32),
        "bg": jnp.full((1, heads), 0.5, jnp.float32),          # attn_gate.bias init 0.5
        "wo": std * jax.random.normal(k3, (dim, dim), jnp.float32),
        "wff": std * jax.random.normal(k4, (dim_ff, dim), jnp.float32),
    }


if __name__ == "__main__":
    key = jax.random.PRNGKey(0)
    kx, kp = jax.random.split(key)

    B, dim, H, W = 2, 64, 12, 12          # H, W not multiples of 8 -> exercises padding
    dim_head, window_size = 32, 8

    x = jax.random.normal(kx, (B, dim, H, W), jnp.float32)
    params = init_params(kp, dim, dim_head=dim_head)

    fwd = jax.jit(functools.partial(fused_gw_attention_ff,
                                    dim_head=dim_head, window_size=window_size))
    y = jax.block_until_ready(fwd(x, params))

    y_ref = _reference(x, params, dim_head=dim_head, window_size=window_size)
    assert y.shape == (B, dim, H, W), y.shape
    # bf16 matmul operands / bf16 output (f32 accumulation) + approx reciprocal
    # -> looser tolerance than the pure-f32 reference; structural bugs >> 0.06.
    err = float(jnp.max(jnp.abs(y - y_ref)))
    assert jnp.allclose(y, y_ref, atol=6e-2, rtol=6e-2), err

    print("KERNEL_OK")
</pallas_src>

<mosaic_0001>
module attributes {stable_mosaic.version = 11 : i64} {
  func.func @_gw_attn_ff_kernel(%arg0: i32, %arg1: memref<256x64xbf16, #tpu.memory_space<vmem>>, %arg2: memref<64x512xbf16, #tpu.memory_space<vmem>>, %arg3: memref<1x2xf32, #tpu.memory_space<vmem>>, %arg4: memref<2x64xbf16, #tpu.memory_space<vmem>>, %arg5: memref<64x64xbf16, #tpu.memory_space<vmem>>, %arg6: memref<256x64xbf16, #tpu.memory_space<vmem>>, %arg7: memref<256x64xbf16, #tpu.memory_space<vmem>>) attributes {dimension_semantics = [#tpu.dimension_semantics<parallel>], iteration_bounds = array<i64: 2>, scalar_prefetch = 0 : i64, scratch_operands = 0 : i64, tpu.core_type = #tpu.core_type<tc>, window_params = [{transform_indices = @transform_0, window_bounds = array<i64: 256, 64>}, {pipeline_mode = #tpu.pipeline_mode<synchronous>, transform_indices = @transform_1, window_bounds = array<i64: 64, 512>}, {pipeline_mode = #tpu.pipeline_mode<synchronous>, transform_indices = @transform_2, window_bounds = array<i64: 1, 2>}, {pipeline_mode = #tpu.pipeline_mode<synchronous>, transform_indices = @transform_3, window_bounds = array<i64: 2, 64>}, {pipeline_mode = #tpu.pipeline_mode<synchronous>, transform_indices = @transform_4, window_bounds = array<i64: 64, 64>}, {pipeline_mode = #tpu.pipeline_mode<synchronous>, transform_indices = @transform_5, window_bounds = array<i64: 256, 64>}, {transform_indices = @transform_6, window_bounds = array<i64: 256, 64>}]} {
    %c0 = arith.constant 0 : index
    %c0_0 = arith.constant 0 : index
    %0 = vector.load %arg1[%c0, %c0_0] : memref<256x64xbf16, #tpu.memory_space<vmem>>, vector<256x64xbf16>
    %c0_1 = arith.constant 0 : index
    %c0_2 = arith.constant 0 : index
    %1 = vector.load %arg2[%c0_1, %c0_2] : memref<64x512xbf16, #tpu.memory_space<vmem>>, vector<64x512xbf16>
    %cst = arith.constant dense<0.000000e+00> : vector<256x512xf32>
    %2 = tpu.matmul %0, %1, %cst {dimension_numbers = #tpu.dot_dimension_numbers<[1], [0], [0], [1], [0, 0, 1, 1], [], []>} : vector<256x64xbf16>, vector<64x512xbf16>, vector<256x512xf32> -> vector<256x512xf32>
    %3 = vector.extract_strided_slice %2 {offsets = [0, 128], sizes = [256, 256], strides = [1, 1]} : vector<256x512xf32> to vector<256x256xf32>
    %cst_3 = arith.constant 0.000000e+00 : f32
    %4 = vector.broadcast %cst_3 : f32 to vector<256x256xf32>
    %5 = arith.maximumf %3, %4 : vector<256x256xf32>
    %6 = arith.mulf %5, %5 : vector<256x256xf32>
    %cst_4 = arith.constant 0.89442718 : f32
    %7 = vector.broadcast %cst_4 : f32 to vector<256x256xf32>
    %8 = arith.mulf %7, %6 : vector<256x256xf32>
    %cst_5 = arith.constant -0.44721359 : f32
    %9 = vector.broadcast %cst_5 : f32 to vector<256x256xf32>
    %10 = arith.addf %8, %9 : vector<256x256xf32>
    %11 = arith.truncf %10 : vector<256x256xf32> to vector<256x256xbf16>
    %c0_6 = arith.constant 0 : index
    %c0_7 = arith.constant 0 : index
    %12 = vector.load %arg6[%c0_6, %c0_7] : memref<256x64xbf16, #tpu.memory_space<vmem>>, vector<256x64xbf16>
    %cst_8 = arith.constant dense<0.000000e+00> : vector<256x64xf32>
    %13 = tpu.matmul %11, %12, %cst_8 {dimension_numbers = #tpu.dot_dimension_numbers<[1], [0], [0], [1], [0, 0, 1, 1], [], []>} : vector<256x256xbf16>, vector<256x64xbf16>, vector<256x64xf32> -> vector<256x64xf32>
    %14 = vector.extract_strided_slice %2 {offsets = [0, 384], sizes = [256, 2], strides = [1, 1]} : vector<256x512xf32> to vector<256x2xf32>
    %c0_9 = arith.constant 0 : index
    %c0_10 = arith.constant 0 : index
    %15 = vector.load %arg3[%c0_9, %c0_10] : memref<1x2xf32, #tpu.memory_space<vmem>>, vector<1x2xf32>
    %16 = vector.broadcast %15 : vector<1x2xf32> to vector<256x2xf32>
    %17 = arith.addf %14, %16 : vector<256x2xf32>
    %18 = arith.negf %17 : vector<256x2xf32>
    %19 = math.exp %18 : vector<256x2xf32>
    %cst_11 = arith.constant 1.000000e+00 : f32
    %20 = vector.broadcast %cst_11 : f32 to vector<256x2xf32>
    %21 = arith.addf %20, %19 : vector<256x2xf32>
    %22 = arith.divf %20, %21 : vector<256x2xf32>
    %23 = arith.truncf %22 : vector<256x2xf32> to vector<256x2xbf16>
    %c0_12 = arith.constant 0 : index
    %c0_13 = arith.constant 0 : index
    %24 = vector.load %arg4[%c0_12, %c0_13] : memref<2x64xbf16, #tpu.memory_space<vmem>>, vector<2x64xbf16>
    %cst_14 = arith.constant dense<0.000000e+00> : vector<256x64xf32>
    %25 = tpu.matmul %23, %24, %cst_14 {dimension_numbers = #tpu.dot_dimension_numbers<[1], [0], [0], [1], [0, 0, 1, 1], [], []>} : vector<256x2xbf16>, vector<2x64xbf16>, vector<256x64xf32> -> vector<256x64xf32>
    %26 = arith.truncf %25 : vector<256x64xf32> to vector<256x64xbf16>
    %27 = vector.extract_strided_slice %2 {offsets = [0, 0], sizes = [256, 64], strides = [1, 1]} : vector<256x512xf32> to vector<256x64xf32>
    %28 = arith.truncf %27 : vector<256x64xf32> to vector<256x64xbf16>
    %29 = vector.shape_cast %28 : vector<256x64xbf16> to vector<4x64x64xbf16>
    %30 = vector.extract_strided_slice %2 {offsets = [0, 64], sizes = [256, 64], strides = [1, 1]} : vector<256x512xf32> to vector<256x64xf32>
    %31 = arith.truncf %30 : vector<256x64xf32> to vector<256x64xbf16>
    %32 = vector.shape_cast %31 : vector<256x64xbf16> to vector<4x64x64xbf16>
    %33 = vector.extract_strided_slice %29 {offsets = [0, 0, 0], sizes = [4, 64, 32], strides = [1, 1, 1]} : vector<4x64x64xbf16> to vector<4x64x32xbf16>
    %34 = vector.extract_strided_slice %29 {offsets = [0, 0, 32], sizes = [4, 64, 32], strides = [1, 1, 1]} : vector<4x64x64xbf16> to vector<4x64x32xbf16>
    %35 = tpu.concatenate %33, %34 in 0 : vector<4x64x32xbf16>, vector<4x64x32xbf16> -> vector<8x64x32xbf16>
    %36 = vector.extract_strided_slice %32 {offsets = [0, 0, 0], sizes = [4, 64, 32], strides = [1, 1, 1]} : vector<4x64x64xbf16> to vector<4x64x32xbf16>
    %37 = vector.extract_strided_slice %32 {offsets = [0, 0, 32], sizes = [4, 64, 32], strides = [1, 1, 1]} : vector<4x64x64xbf16> to vector<4x64x32xbf16>
    %38 = tpu.concatenate %36, %37 in 0 : vector<4x64x32xbf16>, vector<4x64x32xbf16> -> vector<8x64x32xbf16>
    "tpu.trace_start"() <{level = 10 : i32, message = "bqd,bkd->bqk"}> : () -> ()
    %cst_15 = arith.constant dense<0.000000e+00> : vector<8x64x64xf32>
    %39 = tpu.matmul %35, %38, %cst_15 {dimension_numbers = #tpu.dot_dimension_numbers<[2], [2], [1], [1], [0, 0, 0, 1, 1, 1], [0], [0]>} : vector<8x64x32xbf16>, vector<8x64x32xbf16>, vector<8x64x64xf32> -> vector<8x64x64xf32>
    "tpu.trace_stop"() : () -> ()
    %cst_16 = arith.constant dense<0xFF800000> : vector<8x64xf32>
    %40 = vector.multi_reduction <maximumf>, %39, %cst_16 [2] : vector<8x64x64xf32> to vector<8x64xf32>
    %41 = vector.shape_cast %40 : vector<8x64xf32> to vector<8x64x1xf32>
    %42 = vector.broadcast %41 : vector<8x64x1xf32> to vector<8x64x64xf32>
    %43 = arith.subf %39, %42 : vector<8x64x64xf32>
    %44 = math.exp %43 : vector<8x64x64xf32>
    %cst_17 = arith.constant dense<0.000000e+00> : vector<8x64xf32>
    %45 = vector.multi_reduction <add>, %44, %cst_17 [2] : vector<8x64x64xf32> to vector<8x64xf32>
    %46 = vector.shape_cast %45 : vector<8x64xf32> to vector<8x64x1xf32>
    %47 = arith.truncf %44 : vector<8x64x64xf32> to vector<8x64x64xbf16>
    "tpu.trace_start"() <{level = 10 : i32, message = "bqk,bkd->bqd"}> : () -> ()
    %cst_18 = arith.constant dense<0.000000e+00> : vector<8x64x32xf32>
    %48 = tpu.matmul %47, %38, %cst_18 {dimension_numbers = #tpu.dot_dimension_numbers<[2], [1], [1], [2], [0, 0, 0, 1, 1, 2], [0], [0]>} : vector<8x64x64xbf16>, vector<8x64x32xbf16>, vector<8x64x32xf32> -> vector<8x64x32xf32>
    "tpu.trace_stop"() : () -> ()
    %49 = tpu.reciprocal %46 {approx = true} : vector<8x64x1xf32> -> vector<8x64x1xf32>
    %50 = vector.broadcast %49 : vector<8x64x1xf32> to vector<8x64x32xf32>
    %51 = arith.mulf %48, %50 : vector<8x64x32xf32>
    %52 = arith.truncf %51 : vector<8x64x32xf32> to vector<8x64x32xbf16>
    %53 = vector.extract_strided_slice %52 {offsets = [0, 0, 0], sizes = [4, 64, 32], strides = [1, 1, 1]} : vector<8x64x32xbf16> to vector<4x64x32xbf16>
    %54 = vector.extract_strided_slice %52 {offsets = [4, 0, 0], sizes = [4, 64, 32], strides = [1, 1, 1]} : vector<8x64x32xbf16> to vector<4x64x32xbf16>
    %55 = tpu.concatenate %53, %54 in 2 : vector<4x64x32xbf16>, vector<4x64x32xbf16> -> vector<4x64x64xbf16>
    %56 = vector.shape_cast %55 : vector<4x64x64xbf16> to vector<256x64xbf16>
    %57 = arith.mulf %56, %26 : vector<256x64xbf16>
    %c0_19 = arith.constant 0 : index
    %c0_20 = arith.constant 0 : index
    %58 = vector.load %arg5[%c0_19, %c0_20] : memref<64x64xbf16, #tpu.memory_space<vmem>>, vector<64x64xbf16>
    %cst_21 = arith.constant dense<0.000000e+00> : vector<256x64xf32>
    %59 = tpu.matmul %57, %58, %cst_21 {dimension_numbers = #tpu.dot_dimension_numbers<[1], [0], [0], [1], [0, 0, 1, 1], [], []>} : vector<256x64xbf16>, vector<64x64xbf16>, vector<256x64xf32> -> vector<256x64xf32>
    %60 = arith.addf %59, %13 : vector<256x64xf32>
    %61 = arith.truncf %60 : vector<256x64xf32> to vector<256x64xbf16>
    %c0_22 = arith.constant 0 : index
    %c0_23 = arith.constant 0 : index
    %62 = vector.load %arg7[%c0_22, %c0_23] : memref<256x64xbf16, #tpu.memory_space<vmem>>, vector<256x64xbf16>
    tpu.vector_store %arg7[%c0_22, %c0_23], %61 {strides = array<i32>} : memref<256x64xbf16, #tpu.memory_space<vmem>>, vector<256x64xbf16>,
    return
  }
  func.func @transform_0(%arg0: i32) -> (i32, i32) {
    %c0_i32 = arith.constant 0 : i32
    %c0_i32_0 = arith.constant 0 : i32
    return %arg0, %c0_i32 : i32, i32
  }
  func.func @transform_1(%arg0: i32) -> (i32, i32) {
    %c0_i32 = arith.constant 0 : i32
    %c0_i32_0 = arith.constant 0 : i32
    %c0_i32_1 = arith.constant 0 : i32
    return %c0_i32, %c0_i32_0 : i32, i32
  }
  func.func @transform_2(%arg0: i32) -> (i32, i32) {
    %c0_i32 = arith.constant 0 : i32
    %c0_i32_0 = arith.constant 0 : i32
    %c0_i32_1 = arith.constant 0 : i32
    return %c0_i32, %c0_i32_0 : i32, i32
  }
  func.func @transform_3(%arg0: i32) -> (i32, i32) {
    %c0_i32 = arith.constant 0 : i32
    %c0_i32_0 = arith.constant 0 : i32
    %c0_i32_1 = arith.constant 0 : i32
    return %c0_i32, %c0_i32_0 : i32, i32
  }
  func.func @transform_4(%arg0: i32) -> (i32, i32) {
    %c0_i32 = arith.constant 0 : i32
    %c0_i32_0 = arith.constant 0 : i32
    %c0_i32_1 = arith.constant 0 : i32
    return %c0_i32, %c0_i32_0 : i32, i32
  }
  func.func @transform_5(%arg0: i32) -> (i32, i32) {
    %c0_i32 = arith.constant 0 : i32
    %c0_i32_0 = arith.constant 0 : i32
    %c0_i32_1 = arith.constant 0 : i32
    return %c0_i32, %c0_i32_0 : i32, i32
  }
  func.func @transform_6(%arg0: i32) -> (i32, i32) {
    %c0_i32 = arith.constant 0 : i32
    %c0_i32_0 = arith.constant 0 : i32
    return %arg0, %c0_i32 : i32, i32
  }
}

</mosaic_0001>

<bundles_post_ra>
// kernel: fused_gw_attention_ff.1
= control target key start
LH: loop header
LB: loop body
LE: loop exit
PB: predicated region body
PF: predicated region fallthrough
CT: control target
= control target key end

     0   :  { %s5942_s21 = smov 0   ;;  %s9108_s0 = inlined_call_operand.vmem [shape: bf16[512,64], index: 0, kind: input, shape index: {}]   ;;  %s9109_s1 = inlined_call_operand.vmem [shape: bf16[64,512], index: 1, kind: input, shape index: {}]   ;;  %s9110_s2 = inlined_call_operand.vmem [shape: f32[1,2], index: 2, kind: input, shape index: {}]   ;;  %s9111_s3 = inlined_call_operand.vmem [shape: bf16[2,64], index: 3, kind: input, shape index: {}]   ;;  %s9112_s4 = inlined_call_operand.vmem [shape: bf16[64,64], index: 4, kind: input, shape index: {}]   ;;  %s9113_s5 = inlined_call_operand.vmem [shape: bf16[256,64], index: 5, kind: input, shape index: {}]   ;;  %s9114_s6 = inlined_call_operand.vmem [shape: bf16[512,64], index: 6, kind: output, shape index: {}]  }
   0x1 LB: > { %s5021_s22 = sadd.s32 4294967295, %s5902_s21   ;;  %p5025_p0 = scmp.ge.s32.totalorder %s5902_s21, 1  ;;  %s5902_s21 = sphi %s5942_s21, %s16_s21  }
   0x2   : > { %p213_p1 = scmp.lt.s32.totalorder %s5902_s21, 3 }
   0x4   : > { %p214_p2 = pnand %p5025_p0, %p213_p1 }
   0x6   : > { %217 = sbr.rel (%p214_p2) target bundleno = 1759 (0x6df), region = 44 }
   0xb   : > { %v5144_v0 = vld [vmem:[%s9109_s1 + $0x60] sm:$0xf]  ;;  %v5462_v1 = vld [vmem:[%s9109_s1 + $0x6c] sm:$0xf0]  ;;  %s5026_s7 = sshll.u32 %s5021_s22, 5  ;;  %vm464_vm0 = vcmask 523264  }
   0xc   : > { %v5128_v2 = vld [vmem:[%s9109_s1 + $0x40] sm:$0xf]  ;;  %v5145_v3 = vor.u32 %v5462_v1, %v5144_v0  ;;  %v5458_v4 = vld [vmem:[%s9109_s1 + $0x4c] sm:$0xf0]  ;;  %p244_p3 = scmp.lt.s32.totalorder %s5026_s7, 63  ;;  %s5904_s29 = smov 64  }
   0xd   : > { %v5129_v5 = vor.u32 %v5458_v4, %v5128_v2  ;;  %v5112_v6 = vld [vmem:[%s9109_s1 + $0x20] sm:$0xf]  ;;  %v5454_v7 = vld [vmem:[%s9109_s1 + $0x2c] sm:$0xf0]  ;;  %v5460_v19 = vld [vmem:[%s9109_s1 + $0x64] sm:$0xf] }
   0xe   : > { %517 = vmatpush.bf16.msra.mxu0 %v5145_v3  ;;  %5484 = vmatpush.bf16.msra.mxu1 %v5145_v3  ;;  %s9536_s7 = smov (!%p244_p3, %s5026_s7), 63  ;;  %v5113_v8 = vor.u32 %v5454_v7, %v5112_v6  ;;  %v5096_v9 = vld [vmem:[%s9109_s1] sm:$0xf]  ;;  %v5450_v10 = vld [vmem:[%s9109_s1 + $0xc] sm:$0xf0]  ;;  %s5905_s30 = smov 96  }
   0xf   : > { %5486 = vmatpush.bf16.msra.mxu3 %v5145_v3  ;;  %5485 = vmatpush.bf16.msra.mxu2 %v5145_v3  ;;  %s5027_s16 = sshll.u32 %s9536_s7, 2  ;;  %v5097_v11 = vor.u32 %v5450_v10, %v5096_v9  ;;  %v5146_v20 = vld [vmem:[%s9109_s1 + $0x70] sm:$0xf0]  ;;  %v5456_v23 = vld [vmem:[%s9109_s1 + $0x44] sm:$0xf]  ;;  %vm2446_vm1 = vcmask 261120  }
  0x10   : > { %s5982_s19 = scalar_lea.vmem %s9108_s0, %s5027_s16  ;;  %v5149_v21 = vor.u32 %v5460_v19, %v5146_v20  ;;  %v5130_v24 = vld [vmem:[%s9109_s1 + $0x50] sm:$0xf0]  ;;  %v5452_v26 = vld [vmem:[%s9109_s1 + $0x24] sm:$0xf]  ;;  %v5461_v35 = vld [vmem:[%s9109_s1 + $0x6c] sm:$0xf]  ;;  %s8880_s23 = scalar_lea.vmem %s9114_s6, %s5027_s16 }
  0x11   : > { %v5985_v12 = vld [vmem:[%s5982_s19] sm:$0xff]  ;;  %v6005_v16 = vld [vmem:[%s5982_s19 + $0x8] sm:$0xff]  ;;  %v5133_v25 = vor.u32 %v5456_v23, %v5130_v24  ;;  %v5114_v27 = vld [vmem:[%s9109_s1 + $0x30] sm:$0xf0]  ;;  %vm2173_vm10 = vcmask 1040384   ;;  %vm2124_vm11 = vcmask 15360  }
  0x12   : > { %518 = vmatpush.bf16.msra.mxu0 %v5129_v5  ;;  %5487 = vmatpush.bf16.msra.mxu1 %v5129_v5  ;;  %v5988_v13 = vld [vmem:[%s5982_s19 + $0x20] sm:$0xff]  ;;  %v6008_v17 = vld [vmem:[%s5982_s19 + $0x28] sm:$0xff]  ;;  %v5117_v28 = vor.u32 %v5452_v26, %v5114_v27  ;;  %v5098_v30 = vld [vmem:[%s9109_s1 + $0x10] sm:$0xf0] }
  0x13   : > { %5489 = vmatpush.bf16.msra.mxu3 %v5129_v5  ;;  %5488 = vmatpush.bf16.msra.mxu2 %v5129_v5  ;;  %v5991_v14 = vld [vmem:[%s5982_s19 + $0x60] sm:$0xff]  ;;  %v6011_v18 = vld [vmem:[%s5982_s19 + $0x68] sm:$0xff]  ;;  %v6049_v32 = vld [vmem:[%s5982_s19 + $0x10] sm:$0xff] }
  0x14   : > { %v5998_v15 = vld [vmem:[%s5982_s19 + $0x40] sm:$0xff]  ;;  %v6024_v22 = vld [vmem:[%s5982_s19 + $0x48] sm:$0xff]  ;;  %v6052_v33 = vld [vmem:[%s5982_s19 + $0x30] sm:$0xff] }
  0x15   : > { %v5448_v29 = vld [vmem:[%s9109_s1 + $0x4] sm:$0xf]  ;;  %v6055_v34 = vld [vmem:[%s5982_s19 + $0x70] sm:$0xff]  ;;  %v5154_v36 = vld [vmem:[%s9109_s1 + $0x78] sm:$0xf0] }
  0x16   : > { %519 = vmatpush.bf16.msra.mxu0 %v5113_v8  ;;  %5490 = vmatpush.bf16.msra.mxu1 %v5113_v8  ;;  %v5101_v31 = vor.u32 %v5448_v29, %v5098_v30  ;;  %v5157_v37 = vor.u32 %v5461_v35, %v5154_v36  ;;  %v6068_v38 = vld [vmem:[%s5982_s19 + $0x50] sm:$0xff]  ;;  %v5457_v39 = vld [vmem:[%s9109_s1 + $0x4c] sm:$0xf]  ;;  %v5138_v40 = vld [vmem:[%s9109_s1 + $0x58] sm:$0xf0] }
  0x17   : > { %5492 = vmatpush.bf16.msra.mxu3 %v5113_v8  ;;  %5491 = vmatpush.bf16.msra.mxu2 %v5113_v8  ;;  %v5141_v41 = vor.u32 %v5457_v39, %v5138_v40  ;;  %v5453_v42 = vld [vmem:[%s9109_s1 + $0x2c] sm:$0xf]  ;;  %v5122_v43 = vld [vmem:[%s9109_s1 + $0x38] sm:$0xf0]  ;;  %v5152_v52 = vld [vmem:[%s9109_s1 + $0x68] sm:$0xf] }
  0x18   : > { %v5125_v44 = vor.u32 %v5453_v42, %v5122_v43  ;;  %v5449_v45 = vld [vmem:[%s9109_s1 + $0xc] sm:$0xf]  ;;  %v5106_v46 = vld [vmem:[%s9109_s1 + $0x18] sm:$0xf0]  ;;  %v5463_v53 = vld [vmem:[%s9109_s1 + $0x74] sm:$0xf0] }
  0x19   : > { %v5109_v47 = vor.u32 %v5449_v45, %v5106_v46  ;;  %v6093_v48 = vld [vmem:[%s5982_s19 + $0x18] sm:$0xff]  ;;  %v5153_v54 = vor.u32 %v5463_v53, %v5152_v52  ;;  %v5136_v55 = vld [vmem:[%s9109_s1 + $0x48] sm:$0xf] }
  0x1a   : > { %520 = vmatpush.bf16.msra.mxu0 %v5097_v11  ;;  %5493 = vmatpush.bf16.msra.mxu1 %v5097_v11  ;;  %v6096_v49 = vld [vmem:[%s5982_s19 + $0x38] sm:$0xff]  ;;  %v5120_v58 = vld [vmem:[%s9109_s1 + $0x28] sm:$0xf] }
  0x1b   : > { %5495 = vmatpush.bf16.msra.mxu3 %v5097_v11  ;;  %5494 = vmatpush.bf16.msra.mxu2 %v5097_v11  ;;  %v6099_v50 = vld [vmem:[%s5982_s19 + $0x78] sm:$0xff]  ;;  %v5104_v63 = vld [vmem:[%s9109_s1 + $0x8] sm:$0xf] }
  0x1c   : > { %v6106_v51 = vld [vmem:[%s5982_s19 + $0x58] sm:$0xff] }
  0x1d   : > { %5158 = vmatmul.msk.bf16.vlgmr.msra.gmra.mxu0 %vm464_vm0, %v5985_v12  ;;  %5162 = vmatmul.msk.bf16.vlgmr.msra.gmra.mxu1 %vm464_vm0, %v5988_v13  ;;  %v5459_v56 = vld [vmem:[%s9109_s1 + $0x54] sm:$0xf0] }
  0x1e   : > { %5170 = vmatmul.msk.bf16.vlgmr.msra.gmra.mxu3 %vm464_vm0, %v5991_v14  ;;  %5166 = vmatmul.msk.bf16.vlgmr.msra.gmra.mxu2 %vm464_vm0, %v5998_v15  ;;  %v5137_v57 = vor.u32 %v5459_v56, %v5136_v55  ;;  %v5455_v59 = vld [vmem:[%s9109_s1 + $0x34] sm:$0xf0] }
  0x1f   : > { %606 = vmatpush.bf16.msrb.mxu1 %v5149_v21  ;;  %784 = vmatpush.bf16.msrb.mxu3 %v5157_v37  ;;  %v5121_v60 = vor.u32 %v5455_v59, %v5120_v58  ;;  %v5451_v0 = vld [vmem:[%s9109_s1 + $0x14] sm:$0xf0] }
  0x20   : > { %695 = vmatpush.bf16.msrb.mxu2 %v5153_v54  ;;  %v5105_v1 = vor.u32 %v5451_v0, %v5104_v63 }
  0x23   : > { %607 = vmatpush.bf16.msrb.mxu1 %v5133_v25  ;;  %785 = vmatpush.bf16.msrb.mxu3 %v5141_v41 }
  0x24   : > { %696 = vmatpush.bf16.msrb.mxu2 %v5137_v57 }
  0x27   : > { %608 = vmatpush.bf16.msrb.mxu1 %v5117_v28  ;;  %786 = vmatpush.bf16.msrb.mxu3 %v5125_v44 }
  0x28   : > { %697 = vmatpush.bf16.msrb.mxu2 %v5121_v60 }
  0x2b   : > { %609 = vmatpush.bf16.msrb.mxu1 %v5101_v31  ;;  %787 = vmatpush.bf16.msrb.mxu3 %v5109_v47 }
  0x2c   : > { %698 = vmatpush.bf16.msrb.mxu2 %v5105_v1 }
  0x2d   : > { %5159 = vmatmul.msk.bf16.gmra.mxu0 %vm464_vm0, %v6005_v16  ;;  %5163 = vmatmul.msk.bf16.gmra.mxu1 %vm464_vm0, %v6008_v17 }
  0x2e   : > { %5171 = vmatmul.msk.bf16.gmra.mxu3 %vm464_vm0, %v6011_v18  ;;  %5167 = vmatmul.msk.bf16.gmra.mxu2 %vm464_vm0, %v6024_v22 }
  0x3d   : > { %5160 = vmatmul.msk.bf16.gmra.mxu0 %vm464_vm0, %v6049_v32  ;;  %5164 = vmatmul.msk.bf16.gmra.mxu1 %vm464_vm0, %v6052_v33 }
  0x3e   : > { %5172 = vmatmul.msk.bf16.gmra.mxu3 %vm464_vm0, %v6055_v34  ;;  %5168 = vmatmul.msk.bf16.gmra.mxu2 %vm464_vm0, %v6068_v38 }
  0x4d   : > { %5161 = vmatmul.msk.bf16.gmra.mxu0 %vm464_vm0, %v6093_v48  ;;  %5165 = vmatmul.msk.bf16.gmra.mxu1 %vm464_vm0, %v6096_v49 }
  0x4e   : > { %5173 = vmatmul.msk.bf16.gmra.mxu3 %vm464_vm0, %v6099_v50  ;;  %5169 = vmatmul.msk.bf16.gmra.mxu2 %vm464_vm0, %v6106_v51 }
  0x5d   : > { %5174 = vmatmul.msk.bf16.vlgmr.msrb.gmra.mxu1 %vm464_vm0, %v5985_v12 }
  0x5e   : > { %5206 = vmatmul.msk.bf16.vlgmr.msrb.gmra.mxu3 %vm464_vm0, %v5985_v12  ;;  %5190 = vmatmul.msk.bf16.vlgmr.msrb.gmra.mxu2 %vm464_vm0, %v5985_v12 }
  0x6d   : > { %5175 = vmatmul.msk.bf16.gmra.mxu1 %vm464_vm0, %v6005_v16 }
  0x6e   : > { %5207 = vmatmul.msk.bf16.gmra.mxu3 %vm464_vm0, %v6005_v16  ;;  %5191 = vmatmul.msk.bf16.gmra.mxu2 %vm464_vm0, %v6005_v16 }
  0x7d   : > { %5176 = vmatmul.msk.bf16.gmra.mxu1 %vm464_vm0, %v6049_v32 }
  0x7e   : > { %5208 = vmatmul.msk.bf16.gmra.mxu3 %vm464_vm0, %v6049_v32  ;;  %5192 = vmatmul.msk.bf16.gmra.mxu2 %vm464_vm0, %v6049_v32 }
  0x8d   : > { %5177 = vmatmul.msk.bf16.gmra.mxu1 %vm464_vm0, %v6093_v48 }
  0x8e   : > { %5209 = vmatmul.msk.bf16.gmra.mxu3 %vm464_vm0, %v6093_v48  ;;  %5193 = vmatmul.msk.bf16.gmra.mxu2 %vm464_vm0, %v6093_v48 }
  0x9a   : > { %v522_v61 = vpop.f32.mrf.mxu0  ;;  %v6146_v62 = vpop.f32.mrf.mxu1 }
  0x9b   : > { %v2298_v16 = vpack.c.bf16 %v522_v61, %v522_v61 }
  0x9d   : > { %5178 = vmatmul.msk.bf16.gmra.mxu1 %vm464_vm0, %v5988_v13  ;;  %v2426_v30 = vunpack.c.l.b16 %v2298_v16 }
  0x9e   : > { %5210 = vmatmul.msk.bf16.gmra.mxu3 %vm464_vm0, %v5988_v13  ;;  %5194 = vmatmul.msk.bf16.gmra.mxu2 %vm464_vm0, %v5988_v13 }
  0xa1   : > { %v6160_v2 = vpop.f32.mrf.mxu3  ;;  %v6168_v8 = vpop.f32.mrf.mxu2 }
  0xa2   : > { %v524_v3 = vpop.f32.mrf.mxu0  ;;  %v6162_v4 = vpop.f32.mrf.mxu1 }
  0xa3   : > { %v6188_v24 = vpack.c.bf16 %v524_v3, %v524_v3  ;;  %v6269_v13 = vpack.c.bf16 %v6162_v4, %v6162_v4 }
  0xa5   : > { %v2427_v29 = vunpack.c.l.b16 %v6188_v24 }
  0xa7   : > { %v6201_v31 = vpack.c.b16 %v2427_v29, %v2426_v30  ;;  %v2501_v30 = vunpack.c.l.b16 %v6269_v13 }
  0xa9   : > { %v6164_v5 = vpop.f32.mrf.mxu3  ;;  %v6186_v23 = vpop.f32.mrf.mxu2 }
  0xaa   : > { %v527_v6 = vpop.f32.mrf.mxu0  ;;  %v6166_v7 = vpop.f32.mrf.mxu1 }
  0xab   : > { %v6176_v9 = vpack.c.bf16 %v527_v6, %v527_v6 }
  0xad   : > { %5179 = vmatmul.msk.bf16.gmra.mxu1 %vm464_vm0, %v6008_v17  ;;  %v2428_v20 = vunpack.c.l.b16 %v6176_v9 }
  0xae   : > { %5211 = vmatmul.msk.bf16.gmra.mxu3 %vm464_vm0, %v6008_v17  ;;  %5195 = vmatmul.msk.bf16.gmra.mxu2 %vm464_vm0, %v6008_v17 }
  0xb1   : > { %v6178_v10 = vpop.f32.mrf.mxu3  ;;  %v6203_v35 = vpop.f32.mrf.mxu2 }
  0xb2   : > { %v529_v11 = vpop.f32.mrf.mxu0  ;;  %v6180_v12 = vpop.f32.mrf.mxu1 }
  0xb3   : > { %v6182_v19 = vpack.c.bf16 %v529_v11, %v529_v11 }
  0xb5   : > { %v2429_v21 = vunpack.c.l.b16 %v6182_v19 }
  0xb7   : > { %v6190_v25 = vpack.c.b16 %v2429_v21, %v2428_v20 }
  0xb9   : > { %2440 = vrot.lane.b32.xlu1 %v6190_v25, %s5904_s29  ;;  %v6194_v26 = vpop.f32.mrf.mxu3  ;;  %v569_v42 = vpop.f32.mrf.mxu2 }
  0xba   : > { %v532_v27 = vpop.f32.mrf.mxu0  ;;  %v552_v28 = vpop.f32.mrf.mxu1 }
  0xbb   : > { %v2310_v46 = vpack.c.bf16 %v552_v28, %v552_v28  ;;  %v2302_v48 = vpack.c.bf16 %v532_v27, %v532_v27  ;;  %v6265_v27 = vpack.c.bf16 %v6146_v62, %v6146_v62  ;;  %v5470_v28 = vld [vmem:[%s9113_s5 + $0x30] sm:$0xff] }
  0xbd   : > { %5180 = vmatmul.msk.bf16.gmra.mxu1 %vm464_vm0, %v6052_v33  ;;  %v2504_v32 = vunpack.c.l.b16 %v2310_v46  ;;  %v2430_v3 = vunpack.c.l.b16 %v2302_v48  ;;  %v2500_v29 = vunpack.c.l.b16 %v6265_v27 }
  0xbe   : > { %5212 = vmatmul.msk.bf16.gmra.mxu3 %vm464_vm0, %v6052_v33  ;;  %5196 = vmatmul.msk.bf16.gmra.mxu2 %vm464_vm0, %v6052_v33 }
  0xc1   : > { %2438 = vrot.lane.b32.xlu1 %v6201_v31, %s5904_s29  ;;  %v6209_v36 = vpop.f32.mrf.mxu3  ;;  %v6227_v57 = vpop.f32.mrf.mxu2 }
  0xc2   : > { %v534_v37 = vpop.f32.mrf.mxu0  ;;  %v554_v39 = vpop.f32.mrf.mxu1 }
  0xc3   : > { %v2303_v40 = vpack.c.bf16 %v534_v37, %v534_v37  ;;  %v6214_v47 = vpack.c.bf16 %v554_v39, %v554_v39  ;;  %v6287_v39 = vpack.c.b16 %v2501_v30, %v2500_v29 }
  0xc5   : > { %v2505_v52 = vunpack.c.l.b16 %v6214_v47  ;;  %v2431_v1 = vunpack.c.l.b16 %v2303_v40 }
  0xc7   : > { %v6230_v59 = vpack.c.b16 %v2505_v52, %v2504_v32  ;;  %v6250_v20 = vpack.c.b16 %v2431_v1, %v2430_v3  ;;  %v5466_v3 = vld [vmem:[%s9113_s5 + $0x10] sm:$0xff] }
  0xc9   : > { %2372 = vrot.lane.b32.xlu1 %v2303_v40, %s5905_s30  ;;  %v6212_v41 = vpop.f32.mrf.mxu3  ;;  %9158 = vst [vmem:[#allocation2_spill] sm:$0xff] %v6230_v59  ;;  %v6246_v11 = vpop.f32.mrf.mxu2  ;;  %v6291_v40 = vpack.c.bf16 %v6203_v35, %v6203_v35  ;;  %v6306_v35 = vpack.c.bf16 %v6166_v7, %v6166_v7 }
  0xca   : > { %v537_v43 = vpop.f32.mrf.mxu0  ;;  %v557_v44 = vpop.f32.mrf.mxu1 }
  0xcb   : > { %v2304_v45 = vpack.c.bf16 %v537_v43, %v537_v43  ;;  %v6240_v6 = vpack.c.bf16 %v557_v44, %v557_v44  ;;  %v6293_v43 = vpack.c.bf16 %v569_v42, %v569_v42  ;;  %v5468_v44 = vld [vmem:[%s9113_s5 + $0x20] sm:$0xff]  ;;  %v2309_v42 = vpack.c.bf16 %v6180_v12, %v6180_v12 }
  0xcd   : > { %5181 = vmatmul.msk.bf16.gmra.mxu1 %vm464_vm0, %v6096_v49  ;;  %2374 = vrot.lane.b32.xlu2 %v2304_v45, %s5905_s30  ;;  %v2432_v58 = vunpack.c.l.b16 %v2304_v45  ;;  %v2575_v45 = vunpack.c.l.b16 %v6291_v40 }
  0xce   : > { %5213 = vmatmul.msk.bf16.gmra.mxu3 %vm464_vm0, %v6096_v49  ;;  %5197 = vmatmul.msk.bf16.gmra.mxu2 %vm464_vm0, %v6096_v49 }
  0xd1   : > { %2362 = vrot.lane.b32.xlu1 %v2298_v16, %s5905_s30  ;;  %v6225_v53 = vpop.f32.mrf.mxu3  ;;  %v577_v37 = vpop.f32.mrf.mxu2 }
  0xd2   : > { %v539_v54 = vpop.f32.mrf.mxu0  ;;  %v559_v55 = vpop.f32.mrf.mxu1  ;;  %v6325_v1 = vpack.c.bf16 %v577_v37, %v577_v37 }
  0xd3   : > { %v2305_v56 = vpack.c.bf16 %v539_v54, %v539_v54  ;;  %v2313_v32 = vpack.c.bf16 %v559_v55, %v559_v55 }
  0xd4   : > { %v2579_v29 = vunpack.c.l.b16 %v6325_v1 }
  0xd5   : > { %2376 = vrot.lane.b32.xlu2 %v2305_v56, %s5905_s30  ;;  %v2433_v60 = vunpack.c.l.b16 %v2305_v56 }
  0xd7   : > { %v6232_v61 = vpack.c.b16 %v2433_v60, %v2432_v58  ;;  %v5467_v58 = vld [vmem:[%s9113_s5 + $0x18] sm:$0xff]  ;;  %v2502_v60 = vunpack.c.l.b16 %v6306_v35 }
  0xd9   : > { %2516 = vrot.lane.b32.xlu1 %v6230_v59, %s5904_s29  ;;  %2444 = vrot.lane.b32.xlu0 %v6232_v61, %s5904_s29  ;;  %v6238_v63 = vpop.f32.mrf.mxu3  ;;  %v579_v12 = vpop.f32.mrf.mxu2 }
  0xda   : > { %v611_v0 = vpop.f32.mrf.mxu1 }
  0xdb   : > { %v869_v52 = vmax.f32 %v611_v0, 0.0 }
  0xdd   : > { %5182 = vmatmul.msk.bf16.gmra.mxu1 %vm464_vm0, %v5998_v15  ;;  %2366 = vrot.lane.b32.xlu2 %v6176_v9, %s5905_s30  ;;  %v5471_v9 = vld [vmem:[%s9113_s5 + $0x38] sm:$0xff]  ;;  %v933_v55 = vmul.f32 %v869_v52, %v869_v52 }
  0xde   : > { %5214 = vmatmul.msk.bf16.gmra.mxu3 %vm464_vm0, %v5998_v15  ;;  %1285 = vmatpush.bf16.msrb.mxu0 %v5471_v9 }
  0xdf   : > { %v997_v9 = vmul.f32 0.8944272, %v933_v55  ;;  %5198 = vmatmul.msk.bf16.gmra.mxu2 %vm464_vm0, %v5998_v15  ;;  %v2328_v15 = vpack.c.bf16 %v6225_v53, %v6225_v53 }
  0xe1   : > { %2390 = vrot.lane.b32.xlu1 %v6240_v6, %s5905_s30  ;;  %2442 = vrot.lane.b32.xlu0 %v6250_v20, %s5904_s29  ;;  %v6258_v21 = vpop.f32.mrf.mxu3 }
  0xe2   : > { %v613_v16 = vpop.f32.mrf.mxu1  ;;  %1286 = vmatpush.bf16.msrb.mxu0 %v5470_v28 }
  0xe3   : > { %v871_v54 = vmax.f32 %v613_v16, 0.0 }
  0xe5   : > { %2364 = vrot.lane.b32.xlu2 %v6188_v24, %s5905_s30  ;;  %v5469_v24 = vld [vmem:[%s9113_s5 + $0x28] sm:$0xff]  ;;  %v935_v0 = vmul.f32 %v871_v54, %v871_v54 }
  0xe6   : > { %1287 = vmatpush.bf16.msrb.mxu0 %v5469_v24 }
  0xe7   : > { %v999_v28 = vmul.f32 0.8944272, %v935_v0  ;;  %v2318_v0 = vpack.c.bf16 %v6227_v57, %v6227_v57 }
  0xe9   : > { %2386 = vrot.lane.b32.xlu1 %v2310_v46, %s5905_s30  ;;  %2370 = vrot.lane.b32.xlu0 %v2302_v48, %s5905_s30  ;;  %v6280_v62 = vpop.f32.mrf.mxu3  ;;  %v2576_v46 = vunpack.c.l.b16 %v6293_v43  ;;  %v2503_v48 = vunpack.c.l.b16 %v2309_v42  ;;  %v1063_v52 = vadd.f32 -0.4472136, %v999_v28  ;;  %v2577_v33 = vunpack.c.l.b16 %v2318_v0 }
  0xea   : > { %v6282_v4 = vpop.f32.mrf.mxu1  ;;  %1288 = vmatpush.bf16.msrb.mxu0 %v5468_v44  ;;  %v5465_v44 = vld [vmem:[%s9113_s5 + $0x8] sm:$0xff] }
  0xeb   : > { %v6323_v17 = vpack.c.b16 %v2576_v46, %v2575_v45  ;;  %v6331_v16 = vpack.c.b16 %v2503_v48, %v2502_v60  ;;  %v2507_v45 = vunpack.c.l.b16 %v2313_v32  ;;  %v1061_v46 = vadd.f32 -0.4472136, %v997_v9 }
  0xed   : > { %5183 = vmatmul.msk.bf16.gmra.mxu1 %vm464_vm0, %v6024_v22  ;;  %2512 = vrot.lane.b32.xlu2 %v6287_v39, %s5904_s29  ;;  %9159 = vst [vmem:[#allocation3_spill] sm:$0xff] %v6323_v17  ;;  %v1125_v48 = vpack.c.bf16 %v1063_v52, %v1061_v46 }
  0xee   : > { %5215 = vmatmul.msk.bf16.gmra.mxu3 %vm464_vm0, %v6024_v22  ;;  %1289 = vmatpush.bf16.msrb.mxu0 %v5467_v58  ;;  %9160 = vst [vmem:[#allocation4_spill] sm:$0xff] %v6331_v16 }
  0xef   : > { %5199 = vmatmul.msk.bf16.gmra.mxu2 %vm464_vm0, %v6024_v22 }
  0xf1   : > { %2384 = vrot.lane.b32.xlu1 %v2309_v42, %s5905_s30  ;;  %2368 = vrot.lane.b32.xlu0 %v6182_v19, %s5905_s30  ;;  %v6317_v7 = vpop.f32.mrf.mxu3  ;;  %v2321_v19 = vpack.c.bf16 %v579_v12, %v579_v12  ;;  %v2506_v42 = vunpack.c.l.b16 %v6240_v6  ;;  %v5464_v12 = vld [vmem:[%s9113_s5] sm:$0xff] }
  0xf2   : > { %v618_v56 = vpop.f32.mrf.mxu1  ;;  %1290 = vmatpush.bf16.msrb.mxu0 %v5466_v3 }
  0xf3   : > { %v2580_v30 = vunpack.c.l.b16 %v2321_v19  ;;  %v6355_v6 = vpack.c.b16 %v2507_v45, %v2506_v42  ;;  %v875_v58 = vmax.f32 %v618_v56, 0.0  ;;  %v2315_v56 = vpack.c.bf16 %v6186_v23, %v6186_v23 }
  0xf5   : > { %2392 = vrot.lane.b32.xlu2 %v2313_v32, %s5905_s30  ;;  %v6348_v54 = vpack.c.b16 %v2580_v30, %v2579_v29  ;;  %9162 = vst [vmem:[#allocation6_spill] sm:$0xff] %v6355_v6  ;;  %v2319_v32 = vpack.c.bf16 %v6246_v11, %v6246_v11  ;;  %v939_v9 = vmul.f32 %v875_v58, %v875_v58  ;;  %v2574_v42 = vunpack.c.l.b16 %v2315_v56 }
  0xf6   : > { %1291 = vmatpush.bf16.msrb.mxu0 %v5465_v44 }
  0xf7   : > { %9161 = vst [vmem:[#allocation5_spill] sm:$0xff] %v6348_v54  ;;  %v2578_v3 = vunpack.c.l.b16 %v2319_v32  ;;  %v1003_v29 = vmul.f32 0.8944272, %v939_v9 }
  0xf9   : > { %2587 = vrot.lane.b32.xlu1 %v6323_v17, %s5904_s29  ;;  %2514 = vrot.lane.b32.xlu0 %v6331_v16, %s5904_s29  ;;  %v6338_v37 = vpop.f32.mrf.mxu3  ;;  %v6383_v30 = vpack.c.b16 %v2578_v3, %v2577_v33  ;;  %v1067_v45 = vadd.f32 -0.4472136, %v1003_v29 }
  0xfa   : > { %v621_v24 = vpop.f32.mrf.mxu1  ;;  %1292 = vmatpush.bf16.msrb.mxu0 %v5464_v12 }
  0xfb   : > { %9163 = vst [vmem:[#allocation7_spill] sm:$0xff] %v6383_v30  ;;  %v877_v23 = vmax.f32 %v621_v24, 0.0 }
  0xfd   : > { %5184 = vmatmul.msk.bf16.gmra.mxu1 %vm464_vm0, %v6068_v38  ;;  %2388 = vrot.lane.b32.xlu2 %v6214_v47, %s5905_s30  ;;  %v873_v47 = vmax.f32 %v6282_v4, 0.0  ;;  %v6374_v4 = vpack.c.bf16 %v6168_v8, %v6168_v8 }
  0xfe   : > { %5216 = vmatmul.msk.bf16.gmra.mxu3 %vm464_vm0, %v6068_v38  ;;  %1293 = vmatmul.bf16.vlgmr.msrb.gmra.mxu0 %v1125_v48 }
  0xff   : > { %v937_v11 = vmul.f32 %v873_v47, %v873_v47  ;;  %v941_v47 = vmul.f32 %v877_v23, %v877_v23  ;;  %5200 = vmatmul.msk.bf16.gmra.mxu2 %vm464_vm0, %v6068_v38 }
 0x101   : > { %2591 = vrot.lane.b32.xlu1 %v6348_v54, %s5904_s29  ;;  %2518 = vrot.lane.b32.xlu0 %v6355_v6, %s5904_s29  ;;  %v6366_v60 = vpop.f32.mrf.mxu3  ;;  %v1001_v28 = vmul.f32 0.8944272, %v937_v11  ;;  %v1005_v49 = vmul.f32 0.8944272, %v941_v47 }
 0x102   : > { %v623_v55 = vpop.f32.mrf.mxu1 }
 0x103   : > { %v1065_v8 = vadd.f32 -0.4472136, %v1001_v28 }
 0x105   : > { %2378 = vrot.lane.b32.xlu2 %v6265_v27, %s5905_s30  ;;  %v2573_v27 = vunpack.c.l.b16 %v6374_v4  ;;  %v1127_v52 = vpack.c.bf16 %v1067_v45, %v1065_v8  ;;  %v5476_v45 = vld [vmem:[%s9113_s5 + $0x60] sm:$0xff] }
 0x107   : > { %v6399_v46 = vpack.c.b16 %v2574_v42, %v2573_v27  ;;  %v5477_v27 = vld [vmem:[%s9113_s5 + $0x68] sm:$0xff] }
 0x109   : > { %2408 = vrot.lane.b32.xlu1 %v2321_v19, %s5905_s30  ;;  %2382 = vrot.lane.b32.xlu0 %v6306_v35, %s5905_s30  ;;  %v6381_v57 = vpop.f32.mrf.mxu3  ;;  %v879_v35 = vmax.f32 %v623_v55, 0.0  ;;  %9164 = vst [vmem:[#allocation8_spill] sm:$0xff] %v6399_v46  ;;  %v5479_v55 = vld [vmem:[%s9113_s5 + $0x78] sm:$0xff] }
 0x10a   : > { %v626_v44 = vpop.f32.mrf.mxu1  ;;  %1374 = vmatpush.bf16.msra.mxu1 %v5479_v55 }
 0x10b   : > { %v943_v58 = vmul.f32 %v879_v35, %v879_v35  ;;  %v881_v3 = vmax.f32 %v626_v44, 0.0 }
 0x10d   : > { %5185 = vmatmul.msk.bf16.gmra.mxu1 %vm464_vm0, %v6106_v51  ;;  %2589 = vrot.lane.b32.xlu2 %v6383_v30, %s5904_s29  ;;  %v1007_v24 = vmul.f32 0.8944272, %v943_v58  ;;  %v945_v42 = vmul.f32 %v881_v3, %v881_v3  ;;  %v5475_v58 = vld [vmem:[%s9113_s5 + $0x58] sm:$0xff] }
 0x10e   : > { %5217 = vmatmul.msk.bf16.gmra.mxu3 %vm464_vm0, %v6106_v51  ;;  %1298 = vmatmul.bf16.gmra.mxu0 %v1127_v52 }
 0x10f   : > { %v1071_v33 = vadd.f32 -0.4472136, %v1007_v24  ;;  %v1009_v23 = vmul.f32 0.8944272, %v945_v42  ;;  %5201 = vmatmul.msk.bf16.gmra.mxu2 %vm464_vm0, %v6106_v51 }
 0x111   : > { %2402 = vrot.lane.b32.xlu1 %v2318_v0, %s5905_s30  ;;  %2380 = vrot.lane.b32.xlu0 %v6269_v13, %s5905_s30  ;;  %v6397_v19 = vpop.f32.mrf.mxu3  ;;  %v1069_v0 = vadd.f32 -0.4472136, %v1005_v49  ;;  %v1073_v49 = vadd.f32 -0.4472136, %v1009_v23 }
 0x112   : > { %v628_v12 = vpop.f32.mrf.mxu1 }
 0x113   : > { %v883_v11 = vmax.f32 %v628_v12, 0.0  ;;  %v1129_v28 = vpack.c.bf16 %v1071_v33, %v1069_v0  ;;  %v2652_v12 = vunpack.c.l.b16 %v2328_v15  ;;  %v5474_v33 = vld [vmem:[%s9113_s5 + $0x50] sm:$0xff] }
 0x115   : > { %2585 = vrot.lane.b32.xlu2 %v6399_v46, %s5904_s29  ;;  %v947_v8 = vmul.f32 %v883_v11, %v883_v11 }
 0x117   : > { %v1011_v35 = vmul.f32 0.8944272, %v947_v8 }
 0x119   : > { %2398 = vrot.lane.b32.xlu1 %v6291_v40, %s5905_s30  ;;  %v6405_v48 = vpop.f32.mrf.mxu3  ;;  %v5478_v40 = vld [vmem:[%s9113_s5 + $0x70] sm:$0xff]  ;;  %v1075_v24 = vadd.f32 -0.4472136, %v1011_v35 }
 0x11a   : > { %v631_v13 = vpop.f32.mrf.mxu1  ;;  %1375 = vmatpush.bf16.msra.mxu1 %v5478_v40 }
 0x11b   : > { %v885_v40 = vmax.f32 %v631_v13, 0.0  ;;  %v5472_v13 = vld [vmem:[%s9113_s5 + $0x40] sm:$0xff] }
 0x11d   : > { %5186 = vmatmul.msk.bf16.gmra.mxu1 %vm464_vm0, %v5991_v14  ;;  %2404 = vrot.lane.b32.xlu2 %v2319_v32, %s5905_s30  ;;  %v6423_v32 = vpop.f32.mrf.mxu2  ;;  %v949_v23 = vmul.f32 %v885_v40, %v885_v40 }
 0x11e   : > { %5218 = vmatmul.msk.bf16.gmra.mxu3 %vm464_vm0, %v5991_v14  ;;  %1303 = vmatmul.bf16.gmra.mxu0 %v1129_v28  ;;  %v1131_v28 = vpack.c.bf16 %v1075_v24, %v1073_v49  ;;  %v870_v38 = vmax.f32 %v6423_v32, 0.0 }
 0x11f   : > { %1376 = vmatpush.bf16.msra.mxu1 %v5477_v27 }
 0x121   : > { %v6420_v9 = vpop.f32.mrf.mxu3  ;;  %2396 = vrot.lane.b32.xlu1 %v2315_v56, %s5905_s30  ;;  %v6434_v56 = vpack.c.bf16 %v6238_v63, %v6238_v63 }
 0x122   : > { %v633_v29 = vpop.f32.mrf.mxu1 }
 0x123   : > { %1377 = vmatpush.bf16.msra.mxu1 %v5476_v45  ;;  %v887_v3 = vmax.f32 %v633_v29, 0.0  ;;  %v5473_v45 = vld [vmem:[%s9113_s5 + $0x48] sm:$0xff]  ;;  %v1013_v29 = vmul.f32 0.8944272, %v949_v23 }
 0x125   : > { %2400 = vrot.lane.b32.xlu2 %v6293_v43, %s5905_s30  ;;  %v2653_v43 = vunpack.c.l.b16 %v6434_v56  ;;  %v6446_v63 = vpop.f32.mrf.mxu2  ;;  %v951_v35 = vmul.f32 %v887_v3, %v887_v3  ;;  %5202 = vmatmul.msk.bf16.gmra.mxu2 %vm464_vm0, %v5991_v14 }
 0x127   : > { %v6436_v44 = vpop.permute.xlu2 %2374  ;;  %1378 = vmatpush.bf16.msra.mxu1 %v5475_v58  ;;  %v6455_v55 = vpack.c.b16 %v2653_v43, %v2652_v12  ;;  %v1015_v12 = vmul.f32 0.8944272, %v951_v35 }
 0x129   : > { %v6441_v52 = vpop.f32.mrf.mxu3  ;;  %9166 = vst [vmem:[#allocation10_spill] sm:$0xff] %v6455_v55  ;;  %v1079_v40 = vadd.f32 -0.4472136, %v1015_v12 }
 0x12a   : > { %v636_v47 = vpop.f32.mrf.mxu1 }
 0x12b   : > { %v6444_v53 = vpop.permute.xlu1 %2440  ;;  %1379 = vmatpush.bf16.msra.mxu1 %v5474_v33  ;;  %v1077_v33 = vadd.f32 -0.4472136, %v1013_v29  ;;  %v889_v3 = vmax.f32 %v636_v47, 0.0  ;;  %v872_v47 = vmax.f32 %v6446_v63, 0.0 }
 0x12c   : > { %9165 = vst [vmem:[#allocation9_spill] sm:$0xff] %v6444_v53 }
 0x12d   : > { %5187 = vmatmul.msk.bf16.gmra.mxu1 %vm464_vm0, %v6011_v18  ;;  %2664 = vrot.lane.b32.xlu2 %v6455_v55, %s5904_s29  ;;  %v6470_v8 = vpop.f32.mrf.mxu2  ;;  %v1133_v23 = vpack.c.bf16 %v1079_v40, %v1077_v33  ;;  %v953_v54 = vmul.f32 %v889_v3, %v889_v3 }
 0x12e   : > { %5219 = vmatmul.msk.bf16.gmra.mxu3 %vm464_vm0, %v6011_v18  ;;  %1308 = vmatmul.bf16.gmra.mxu0 %v1131_v28 }
 0x12f   : > { %v6457_v0 = vpop.permute.xlu2 %2376  ;;  %1380 = vmatpush.bf16.msra.mxu1 %v5473_v45 }
 0x131   : > { %v6466_v11 = vpop.f32.mrf.mxu3 }
 0x132   : > { %v638_v27 = vpop.f32.mrf.mxu1 }
 0x133   : > { %v6468_v42 = vpop.permute.xlu1 %2438  ;;  %1381 = vmatpush.bf16.msra.mxu1 %v5472_v13  ;;  %v891_v28 = vmax.f32 %v638_v27, 0.0  ;;  %v1017_v27 = vmul.f32 0.8944272, %v953_v54 }
 0x134   : > { %9167 = vst [vmem:[#allocation11_spill] sm:$0xff] %v6468_v42 }
 0x135   : > { %2422 = vrot.lane.b32.xlu2 %v2328_v15, %s5905_s30  ;;  %v6485_v24 = vpop.f32.mrf.mxu2  ;;  %v955_v30 = vmul.f32 %v891_v28, %v891_v28  ;;  %v1081_v32 = vadd.f32 -0.4472136, %v1017_v27  ;;  %5203 = vmatmul.msk.bf16.gmra.mxu2 %vm464_vm0, %v6011_v18 }
 0x137   : > { %v6475_v22 = vpop.permute.xlu2 %2366  ;;  %v1019_v33 = vmul.f32 0.8944272, %v955_v30 }
 0x139   : > { %v6481_v43 = vpop.f32.mrf.mxu3  ;;  %v1083_v63 = vadd.f32 -0.4472136, %v1019_v33  ;;  %v6529_v33 = vpack.c.bf16 %v6160_v2, %v6160_v2 }
 0x13a   : > { %9168 = vst [vmem:[#allocation12_spill] sm:$0xff] %v6481_v43  ;;  %v641_v58 = vpop.f32.mrf.mxu1 }
 0x13b   : > { %v6483_v49 = vpop.permute.xlu1 %2372  ;;  %v1135_v27 = vpack.c.bf16 %v1083_v63, %v1081_v32  ;;  %v2646_v63 = vunpack.c.l.b16 %v6529_v33 }
 0x13d   : > { %5188 = vmatmul.msk.bf16.gmra.mxu1 %vm464_vm0, %v6055_v34  ;;  %v6495_v29 = vpop.f32.mrf.mxu2 }
 0x13e   : > { %5220 = vmatmul.msk.bf16.gmra.mxu3 %vm464_vm0, %v6055_v34  ;;  %1313 = vmatmul.bf16.gmra.mxu0 %v1133_v23 }
 0x13f   : > { %v2365_v15 = vpop.permute.xlu2 %2364 }
 0x140   : > { %v2720_v12 = vunpack.c.l.b16 %v2365_v15 }
 0x141   : > { %v6493_v45 = vpop.f32.mrf.mxu3 }
 0x142   : > { %9169 = vst [vmem:[#allocation13_spill] sm:$0xff] %v6493_v45  ;;  %v643_v35 = vpop.f32.mrf.mxu1 }
 0x143   : > { %v2363_v13 = vpop.permute.xlu1 %2362 }
 0x144   : > { %v2719_v55 = vunpack.c.l.b16 %v2363_v13  ;;  %v936_v13 = vmul.f32 %v872_v47, %v872_v47  ;;  %v895_v47 = vmax.f32 %v643_v35, 0.0 }
 0x146   : > { %v6497_v17 = vpack.c.b16 %v2720_v12, %v2719_v55  ;;  %v934_v55 = vmul.f32 %v870_v38, %v870_v38  ;;  %v6515_v12 = vpop.f32.mrf.mxu2  ;;  %v893_v38 = vmax.f32 %v641_v58, 0.0  ;;  %v959_v2 = vmul.f32 %v895_v47, %v895_v47 }
 0x147   : > { %v6499_v34 = vpop.permute.xlu2 %2512 }
 0x148   : > { %9170 = vst [vmem:[#allocation14_spill] sm:$0xff] %v6497_v17  ;;  %2731 = vrot.lane.b32.xlu0 %v6497_v17, %s5904_s29  ;;  %v998_v30 = vmul.f32 0.8944272, %v934_v55  ;;  %v1000_v17 = vmul.f32 0.8944272, %v936_v13  ;;  %v957_v32 = vmul.f32 %v893_v38, %v893_v38 }
 0x149   : > { %v6505_v40 = vpop.f32.mrf.mxu3  ;;  %v1023_v45 = vmul.f32 0.8944272, %v959_v2 }
 0x14a   : > { %9171 = vst [vmem:[#allocation15_spill] sm:$0xff] %v6505_v40  ;;  %v6507_v23 = vpop.f32.mrf.mxu1  ;;  %v1062_v51 = vadd.f32 -0.4472136, %v998_v30  ;;  %v1064_v58 = vadd.f32 -0.4472136, %v1000_v17  ;;  %v876_v17 = vmax.f32 %v6485_v24, 0.0 }
 0x14b   : > { %v6509_v15 = vpop.permute.xlu1 %2516  ;;  %v6511_v3 = vpop.permute.xlu0 %2444  ;;  %v1021_v40 = vmul.f32 0.8944272, %v957_v32 }
 0x14c   : > { %9172 = vst [vmem:[#allocation16_spill] sm:$0xff] %v6509_v15  ;;  %v2469_v28 = vsel %vm2446_vm1, %v6511_v3, 0  ;;  %v1126_v6 = vpack.c.bf16 %v1064_v58, %v1062_v51  ;;  %v2463_v51 = vsel %vm2446_vm1, %v6444_v53, 0  ;;  %v940_v24 = vmul.f32 %v876_v17, %v876_v17 }
 0x14d   : > { %9173 = vst [vmem:[#allocation17_spill] sm:$0xff] %v6511_v3  ;;  %5189 = vmatmul.msk.bf16.gmra.mxu1 %vm464_vm0, %v6099_v50  ;;  %2475 = vmatpush.bf16.xpose.msra.mxu3 %v2469_v28  ;;  %v6533_v28 = vpack.c.bf16 %v6164_v5, %v6164_v5  ;;  %v1085_v32 = vadd.f32 -0.4472136, %v1021_v40 }
 0x14e   : > { %5221 = vmatmul.msk.bf16.gmra.mxu3 %vm464_vm0, %v6099_v50  ;;  %1318 = vmatmul.bf16.gmra.mxu0 %v1135_v27  ;;  %v6541_v13 = vpop.f32.mrf.mxu2  ;;  %v874_v27 = vmax.f32 %v6470_v8, 0.0  ;;  %v1087_v8 = vadd.f32 -0.4472136, %v1023_v45  ;;  %v1004_v45 = vmul.f32 0.8944272, %v940_v24 }
 0x14f   : > { %v6521_v54 = vpop.permute.xlu2 %2392  ;;  %v2647_v5 = vunpack.c.l.b16 %v6533_v28 }
 0x150   : > { %v938_v2 = vmul.f32 %v874_v27, %v874_v27 }
 0x151   : > { %v6525_v3 = vpop.f32.mrf.mxu3  ;;  %v6551_v59 = vpack.c.b16 %v2647_v5, %v2646_v63  ;;  %v6561_v63 = vpack.c.bf16 %v6209_v36, %v6209_v36  ;;  %v6565_v5 = vpack.c.bf16 %v6212_v41, %v6212_v41  ;;  %v1137_v36 = vpack.c.bf16 %v1087_v8, %v1085_v32 }
 0x152   : > { %9174 = vst [vmem:[#allocation18_spill] sm:$0xff] %v6525_v3  ;;  %v648_v50 = vpop.f32.mrf.mxu1  ;;  %v1068_v8 = vadd.f32 -0.4472136, %v1004_v45 }
 0x153   : > { %v6535_v46 = vpop.permute.xlu1 %2390  ;;  %v6537_v55 = vpop.permute.xlu0 %2442  ;;  %9177 = vst [vmem:[#allocation21_spill] sm:$0xff] %v6561_v63  ;;  %v2650_v27 = vunpack.c.l.b16 %v6561_v63  ;;  %v2651_v41 = vunpack.c.l.b16 %v6565_v5  ;;  %v899_v17 = vmax.f32 %v648_v50, 0.0 }
 0x154   : > { %9175 = vst [vmem:[#allocation19_spill] sm:$0xff] %v6537_v55  ;;  %v2466_v35 = vsel %vm2446_vm1, %v6537_v55, 0 }
 0x155   : > { %2476 = vmatpush.bf16.xpose.msra.mxu3 %v2466_v35  ;;  %9178 = vst [vmem:[#allocation22_spill] sm:$0xff] %v6565_v5  ;;  %v963_v63 = vmul.f32 %v899_v17, %v899_v17  ;;  %v6589_v50 = vpack.c.b16 %v2651_v41, %v2650_v27 }
 0x156   : > { %v6557_v58 = vpop.f32.mrf.mxu2 }
 0x157   : > { %v2389_v3 = vpop.permute.xlu2 %2388  ;;  %9182 = vst [vmem:[#allocation26_spill] sm:$0xff] %v6589_v50  ;;  %2662 = vrot.lane.b32.xlu1 %v6589_v50, %s5904_s29  ;;  %v1027_v41 = vmul.f32 0.8944272, %v963_v63 }
 0x158   : > { %v2797_v35 = vunpack.c.l.b16 %v2389_v3 }
 0x159   : > { %v6547_v30 = vpop.f32.mrf.mxu3 }
 0x15a   : > { %9176 = vst [vmem:[#allocation20_spill] sm:$0xff] %v6547_v30  ;;  %v6549_v55 = vpop.f32.mrf.mxu1 }
 0x15b   : > { %v2387_v38 = vpop.permute.xlu1 %2386  ;;  %v6553_v47 = vpop.permute.xlu0 %2370 }
 0x15c   : > { %v2796_v43 = vunpack.c.l.b16 %v2387_v38 }
 0x15d   : > { %1382 = vmatmul.bf16.vlgmr.msra.gmra.mxu1 %v1126_v6  ;;  %2477 = vmatpush.bf16.xpose.msra.mxu3 %v2463_v51  ;;  %v1002_v6 = vmul.f32 0.8944272, %v938_v2  ;;  %v2460_v2 = vsel %vm2446_vm1, %v6468_v42, 0 }
 0x15e   : > { %v6567_v3 = vpack.c.b16 %v2797_v35, %v2796_v43  ;;  %v897_v43 = vmax.f32 %v6507_v23, 0.0  ;;  %1323 = vmatmul.bf16.gmra.mxu0 %v1137_v36  ;;  %v6585_v24 = vpop.f32.mrf.mxu2  ;;  %v6594_v36 = vld [vmem:[%s9110_s2] ss:$0 sm:$0xff] }
 0x15f   : > { %v6569_v38 = vpop.permute.xlu2 %2378  ;;  %v1066_v32 = vadd.f32 -0.4472136, %v1002_v6  ;;  %v1467_v17 = vadd.f32 %v6594_v36, %v6258_v21  ;;  %v1468_v50 = vadd.f32 %v6594_v36, %v6280_v62 }
 0x160   : > { %9179 = vst [vmem:[#allocation23_spill] sm:$0xff] %v6567_v3  ;;  %2808 = vrot.lane.b32.xlu2 %v6567_v3, %s5904_s29  ;;  %v2721_v3 = vunpack.c.l.b16 %v6475_v22  ;;  %v961_v5 = vmul.f32 %v897_v43, %v897_v43  ;;  %v878_v22 = vmax.f32 %v6495_v29, 0.0 }
 0x161   : > { %v6575_v40 = vpop.f32.mrf.mxu3  ;;  %v1128_v6 = vpack.c.bf16 %v1068_v8, %v1066_v32  ;;  %v1091_v32 = vadd.f32 -0.4472136, %v1027_v41  ;;  %v5286_v8 = vmul.f32 -1.442695, %v1467_v17 }
 0x162   : > { %9180 = vst [vmem:[#allocation24_spill] sm:$0xff] %v6575_v40  ;;  %v653_v35 = vpop.f32.mrf.mxu1  ;;  %v1025_v27 = vmul.f32 0.8944272, %v961_v5 }
 0x163   : > { %v6580_v51 = vpop.permute.xlu1 %2384  ;;  %v2369_v53 = vpop.permute.xlu0 %2368  ;;  %5508 = vpow2.f32 %v5286_v8 }
 0x164   : > { %v2722_v14 = vunpack.c.l.b16 %v2369_v53  ;;  %v1089_v5 = vadd.f32 -0.4472136, %v1025_v27 }
 0x165   : > { %2478 = vmatpush.bf16.xpose.msra.mxu3 %v2460_v2 }
 0x166   : > { %v6587_v23 = vpack.c.b16 %v2722_v14, %v2721_v3  ;;  %v880_v3 = vmax.f32 %v6515_v12, 0.0  ;;  %v6618_v29 = vpop.f32.mrf.mxu2  ;;  %v942_v12 = vmul.f32 %v878_v22, %v878_v22 }
 0x167   : > { %v6598_v53 = vpop.permute.xlu2 %2589 }
 0x168   : > { %9181 = vst [vmem:[#allocation25_spill] sm:$0xff] %v6587_v23  ;;  %2733 = vrot.lane.b32.xlu0 %v6587_v23, %s5904_s29  ;;  %v944_v63 = vmul.f32 %v880_v3, %v880_v3  ;;  %v5287_v23 = vmul.f32 -1.442695, %v1468_v50  ;;  %v1006_v21 = vmul.f32 0.8944272, %v942_v12  ;;  %v1139_v3 = vpack.c.bf16 %v1091_v32, %v1089_v5 }
 0x169   : > { %9183 = vst [vmem:[#allocation27_spill] sm:$0xff] %v6598_v53  ;;  %v6604_v45 = vpop.f32.mrf.mxu3  ;;  %v5509_v12 = vpop.eup %5508  ;;  %v884_v32 = vmax.f32 %v6557_v58, 0.0 }
 0x16a   : > { %9184 = vst [vmem:[#allocation28_spill] sm:$0xff] %v6604_v45  ;;  %v6606_v43 = vpop.f32.mrf.mxu1  ;;  %v1008_v62 = vmul.f32 0.8944272, %v944_v63  ;;  %v903_v45 = vmax.f32 %v653_v35, 0.0  ;;  %5510 = vpow2.f32 %v5287_v23  ;;  %v1070_v41 = vadd.f32 -0.4472136, %v1006_v21 }
 0x16b   : > { %v6610_v14 = vpop.permute.xlu1 %2587  ;;  %v6612_v2 = vpop.permute.xlu0 %2514  ;;  %v882_v63 = vmax.f32 %v6541_v13, 0.0  ;;  %v2539_v13 = vsel %vm2446_vm1, %v6509_v15, 0 }
 0x16c   : > { %9185 = vst [vmem:[#allocation29_spill] sm:$0xff] %v6610_v14  ;;  %5334 = vmatmul.msk.bf16.vlgmr.msra.gmra.mxu3 %vm2446_vm1, %v6201_v31  ;;  %v901_v31 = vmax.f32 %v6549_v55, 0.0  ;;  %v1072_v55 = vadd.f32 -0.4472136, %v1008_v62  ;;  %v967_v17 = vmul.f32 %v903_v45, %v903_v45  ;;  %v6649_v62 = vadd.f32 1.0, %v5509_v12 }
 0x16d   : > { %1387 = vmatmul.bf16.gmra.mxu1 %v1128_v6 }
 0x16e   : > { %1328 = vmatmul.bf16.gmra.mxu0 %v1139_v3  ;;  %v965_v35 = vmul.f32 %v901_v31, %v901_v31  ;;  %v1130_v5 = vpack.c.bf16 %v1072_v55, %v1070_v41  ;;  %v1031_v40 = vmul.f32 0.8944272, %v967_v17  ;;  %v946_v31 = vmul.f32 %v882_v63, %v882_v63  ;;  %v5892_v17 = vld [vmem:[%s5982_s19 + $0x70] sm:$0xff] }
 0x16f   : > { %v6629_v6 = vpop.permute.xlu2 %2585  ;;  %5512 = vrcp.f32 %v6649_v62  ;;  %5204 = vmatmul.msk.bf16.gmra.mxu2 %vm464_vm0, %v5892_v17  ;;  %v905_v63 = vmax.f32 %v6606_v43, 0.0  ;;  %v1470_v17 = vadd.f32 %v6594_v36, %v6338_v37  ;;  %v2536_v43 = vsel %vm2446_vm1, %v6612_v2, 0 }
 0x170   : > { %2406 = vrot.lane.b32.xlu0 %v6325_v1, %s5905_s30  ;;  %9187 = vst [vmem:[#allocation31_spill] sm:$0xff] %v6629_v6  ;;  %v6637_v1 = vpop.f32.mrf.mxu2  ;;  %v5511_v23 = vpop.eup %5510  ;;  %v1010_v12 = vmul.f32 0.8944272, %v946_v31  ;;  %vm1632_vm2 = vweird.f32 %v6649_v62 }
 0x171   : > { %v6624_v42 = vpop.f32.mrf.mxu3  ;;  %v6657_v45 = vadd.f32 1.0, %v5511_v23 }
 0x172   : > { %9186 = vst [vmem:[#allocation30_spill] sm:$0xff] %v6624_v42  ;;  %v6627_v22 = vpop.f32.mrf.mxu1  ;;  %v1029_v42 = vmul.f32 0.8944272, %v965_v35  ;;  %v1095_v35 = vadd.f32 -0.4472136, %v1031_v40 }
 0x173   : > { %v6631_v50 = vpop.permute.xlu1 %2591  ;;  %v6633_v27 = vpop.permute.xlu0 %2518  ;;  %5514 = vrcp.f32 %v6657_v45  ;;  %vm1647_vm4 = vweird.f32 %v6657_v45 }
 0x174   : > { %9188 = vst [vmem:[#allocation32_spill] sm:$0xff] %v6631_v50  ;;  %v2542_v18 = vsel %vm2446_vm1, %v6633_v27, 0  ;;  %v1093_v55 = vadd.f32 -0.4472136, %v1029_v42 }
 0x175   : > { %9189 = vst [vmem:[#allocation33_spill] sm:$0xff] %v6633_v27  ;;  %2548 = vmatpush.bf16.xpose.msrb.mxu3 %v2542_v18  ;;  %v948_v18 = vmul.f32 %v884_v32, %v884_v32 }
 0x177   : > { %v2405_v41 = vpop.permute.xlu2 %2404  ;;  %v1012_v23 = vmul.f32 0.8944272, %v948_v18 }
 0x178   : > { %v6655_v58 = vpop.f32.mrf.mxu2  ;;  %v2870_v40 = vunpack.c.l.b16 %v2405_v41  ;;  %v1074_v41 = vadd.f32 -0.4472136, %v1010_v12  ;;  %v886_v12 = vmax.f32 %v6585_v24, 0.0 }
 0x179   : > { %v6641_v8 = vpop.f32.mrf.mxu3  ;;  %v1076_v30 = vadd.f32 -0.4472136, %v1012_v23 }
 0x17a   : > { %9190 = vst [vmem:[#allocation34_spill] sm:$0xff] %v6641_v8  ;;  %v6643_v27 = vpop.f32.mrf.mxu1 }
 0x17b   : > { %v6645_v3 = vpop.permute.xlu1 %2408  ;;  %v6647_v21 = vpop.permute.xlu0 %2382  ;;  %v1132_v23 = vpack.c.bf16 %v1076_v30, %v1074_v41  ;;  %v2615_v30 = vsel %vm2446_vm1, %v6631_v50, 0  ;;  %v950_v41 = vmul.f32 %v886_v12, %v886_v12 }
 0x17c   : > { %9191 = vst [vmem:[#allocation35_spill] sm:$0xff] %v6645_v3  ;;  %5335 = vmatmul.msk.bf16.gmra.mxu3 %vm2446_vm1, %v6190_v25  ;;  %v1469_v25 = vadd.f32 %v6594_v36, %v6317_v7  ;;  %v6671_v32 = vpop.f32.mrf.mxu0  ;;  %v2792_v7 = vunpack.c.l.b16 %v6569_v38  ;;  %v5289_v38 = vmul.f32 -1.442695, %v1470_v17 }
 0x17d   : > { %1392 = vmatmul.bf16.gmra.mxu1 %v1130_v5  ;;  %2549 = vmatpush.bf16.xpose.msrb.mxu3 %v2539_v13  ;;  %v907_v5 = vmax.f32 %v6627_v22, 0.0  ;;  %9193 = vst [vmem:[#allocation37_spill] sm:$0xff] %v6671_v32  ;;  %v1141_v13 = vpack.c.bf16 %v1095_v35, %v1093_v55  ;;  %v6680_v55 = vpop.eup %5512  ;;  %v969_v35 = vmul.f32 %v905_v63, %v905_v63  ;;  %v888_v63 = vmax.f32 %v6618_v29, 0.0 }
 0x17e   : > { %v2725_v29 = vunpack.c.l.b16 %v6436_v44  ;;  %vm1633_vm3 = vweird.f32 %v6680_v55 }
 0x17f   : > { %1333 = vmatmul.bf16.gmra.mxu0 %v1141_v13  ;;  %v971_v37 = vmul.f32 %v907_v5, %v907_v5  ;;  %v6690_v13 = vpack.c.bf16 %v6178_v10, %v6178_v10  ;;  %v2726_v10 = vunpack.c.l.b16 %v6457_v0  ;;  %v2533_v0 = vsel %vm2446_vm1, %v6499_v34, 0  ;;  %vm6773_vm6 = vmor %vm1632_vm2, %vm1633_vm3 }
 0x180   : > { %v6678_v22 = vpop.f32.mrf.mxu2 }
 0x181   : > { %v6665_v3 = vpop.f32.mrf.mxu3  ;;  %v1035_v17 = vmul.f32 0.8944272, %v971_v37 }
 0x182   : > { %9192 = vst [vmem:[#allocation36_spill] sm:$0xff] %v6665_v3  ;;  %v6669_v42 = vpop.f32.mrf.mxu1  ;;  %v5288_v3 = vmul.f32 -1.442695, %v1469_v25  ;;  %v6694_v25 = vpack.c.bf16 %v6194_v26, %v6194_v26 }
 0x183   : > { %v2403_v15 = vpop.permute.xlu1 %2402  ;;  %v2381_v8 = vpop.permute.xlu0 %2380 }
 0x184   : > { %v2869_v31 = vunpack.c.l.b16 %v2403_v15  ;;  %v2793_v18 = vunpack.c.l.b16 %v2381_v8  ;;  %v6686_v15 = vpop.eup %5514  ;;  %v2401_v8 = vpop.permute.xlu2 %2400  ;;  %5516 = vpow2.f32 %v5288_v3  ;;  %v2649_v50 = vunpack.c.l.b16 %v6694_v25 }
 0x185   : > { %2550 = vmatpush.bf16.xpose.msrb.mxu3 %v2536_v43  ;;  %v1643_v3 = vmul.f32 %v6686_v15, %v6657_v45  ;;  %5518 = vpow2.f32 %v5289_v38  ;;  %v6720_v37 = vpop.f32.mrf.mxu0  ;;  %v6722_v38 = vpack.c.b16 %v2726_v10, %v2725_v29  ;;  %v909_v29 = vmax.f32 %v6643_v27, 0.0 }
 0x186   : > { %v6682_v32 = vpack.c.b16 %v2870_v40, %v2869_v31  ;;  %v6684_v16 = vpack.c.b16 %v2793_v18, %v2792_v7  ;;  %v1033_v40 = vmul.f32 0.8944272, %v969_v35  ;;  %v2868_v7 = vunpack.c.l.b16 %v2401_v8  ;;  %9196 = vst [vmem:[#allocation40_spill] sm:$0xff] %v6720_v37 }
 0x187   : > { %v1628_v31 = vmul.f32 %v6680_v55, %v6649_v62  ;;  %v952_v35 = vmul.f32 %v888_v63, %v888_v63  ;;  %9197 = vst [vmem:[#allocation41_spill] sm:$0xff] %v6722_v38  ;;  %v1644_v12 = vsub.f32 1.0, %v1643_v3  ;;  %v1638_v63 = vand.u32 2147483648, %v6649_v62  ;;  %v5893_v3 = vld [vmem:[%s5982_s19 + $0x78] sm:$0xff] }
 0x188   : > { %9194 = vst [vmem:[#allocation38_spill] sm:$0xff] %v6682_v32  ;;  %2881 = vrot.lane.b32.xlu2 %v6682_v32, %s5904_s29  ;;  %2804 = vrot.lane.b32.xlu0 %v6684_v16, %s5904_s29  ;;  %v6718_v43 = vpop.f32.mrf.mxu2  ;;  %v1097_v8 = vadd.f32 -0.4472136, %v1033_v40  ;;  %v1099_v32 = vadd.f32 -0.4472136, %v1035_v17  ;;  %v1471_v40 = vadd.f32 %v6594_v36, %v6366_v60  ;;  %vm1648_vm5 = vweird.f32 %v6686_v15 }
 0x189   : > { %9195 = vst [vmem:[#allocation39_spill] sm:$0xff] %v6684_v16  ;;  %v6702_v5 = vpop.f32.mrf.mxu3  ;;  %v1629_v16 = vsub.f32 1.0, %v1628_v31  ;;  %v1014_v17 = vmul.f32 0.8944272, %v950_v41  ;;  %5205 = vmatmul.msk.bf16.gmra.mxu2 %vm464_vm0, %v5893_v3  ;;  %v1645_v41 = vmul.f32 %v6686_v15, %v1644_v12  ;;  %v2724_v27 = vunpack.c.l.b16 %v6483_v49  ;;  %vm6791_vm8 = vmor %vm1647_vm4, %vm1648_vm5 }
 0x18a   : > { %v6705_v26 = vpop.f32.mrf.mxu1  ;;  %v1143_v37 = vpack.c.bf16 %v1099_v32, %v1097_v8  ;;  %v5290_v32 = vmul.f32 -1.442695, %v1471_v40  ;;  %v1653_v12 = vand.u32 2147483648, %v6657_v45  ;;  %v1473_v49 = vadd.f32 %v6594_v36, %v6397_v19 }
 0x18b   : > { %v2399_v24 = vpop.permute.xlu1 %2398  ;;  %v1630_v60 = vmul.f32 %v6680_v55, %v1629_v16  ;;  %v1472_v16 = vadd.f32 %v6594_v36, %v6381_v57  ;;  %v1078_v8 = vadd.f32 -0.4472136, %v1014_v17  ;;  %v1646_v57 = vadd.f32 %v6686_v15, %v1645_v41 }
 0x18c   : > { %v2867_v18 = vunpack.c.l.b16 %v2399_v24  ;;  %5336 = vmatmul.msk.bf16.gmra.mxu3 %vm2446_vm1, %v6250_v20  ;;  %v5517_v24 = vpop.eup %5516  ;;  %v2648_v20 = vunpack.c.l.b16 %v6690_v13 }
 0x18d   : > { %1397 = vmatmul.bf16.gmra.mxu1 %v1132_v23  ;;  %2551 = vmatpush.bf16.xpose.msrb.mxu3 %v2533_v0  ;;  %v1636_v23 = vand.u32 2147483647, %v6649_v62  ;;  %v5519_v10 = vpop.eup %5518  ;;  %v6781_v40 = vpop.f32.mrf.mxu0 }
 0x18e   : > { %v6724_v44 = vpack.c.b16 %v2868_v7, %v2867_v18  ;;  %v1016_v7 = vmul.f32 0.8944272, %v952_v35  ;;  %v911_v18 = vmax.f32 %v6669_v42, 0.0  ;;  %v2612_v35 = vsel %vm2446_vm1, %v6598_v53, 0  ;;  %9201 = vst [vmem:[#allocation43_spill] sm:$0xff] %v6781_v40 }
 0x18f   : > { %v6758_v3 = vadd.f32 1.0, %v5519_v10  ;;  %1338 = vmatmul.bf16.gmra.mxu0 %v1143_v37  ;;  %v973_v53 = vmul.f32 %v909_v29, %v909_v29  ;;  %v1631_v10 = vadd.f32 %v6680_v55, %v1630_v60  ;;  %v6779_v37 = vpack.c.b16 %v2649_v50, %v2648_v20 }
 0x190   : > { %9198 = vst [vmem:[#allocation42_spill] sm:$0xff] %v6724_v44  ;;  %2737 = vrot.lane.b32.xlu2 %v6722_v38, %s5904_s29  ;;  %2879 = vrot.lane.b32.xlu1 %v6724_v44, %s5904_s29  ;;  %v6761_v42 = vpop.f32.mrf.mxu2  ;;  %v975_v38 = vmul.f32 %v911_v18, %v911_v18  ;;  %vm6783_vm7 = vcmp.eq.f32.partialorder %v1636_v23, 8.507059e+37  ;;  %v890_v50 = vmax.f32 %v6637_v1, 0.0  ;;  %v892_v20 = vmax.f32 %v6655_v58, 0.0 }
 0x191   : > { %2394 = vrot.lane.b32.xlu0 %v6374_v4, %s5905_s30  ;;  %v6741_v31 = vpop.f32.mrf.mxu3  ;;  %v6752_v4 = vadd.f32 1.0, %v5517_v24  ;;  %v1080_v24 = vadd.f32 -0.4472136, %v1016_v7  ;;  %v1639_v23 = vor.u32 1.1754944e-38, %v1638_v63  ;;  %v5291_v7 = vmul.f32 -1.442695, %v1472_v16 }
 0x192   : > { %v6748_v0 = vpop.f32.mrf.mxu1  ;;  %v1654_v18 = vor.u32 1.1754944e-38, %v1653_v12  ;;  %v1037_v60 = vmul.f32 0.8944272, %v973_v53  ;;  %v1039_v41 = vmul.f32 0.8944272, %v975_v38  ;;  %v1635_v1 = vsel %vm6773_vm6, %v6680_v55, %v1631_v10 }
 0x193   : > { %5520 = vrcp.f32 %v6752_v4  ;;  %v1650_v58 = vsel %vm6791_vm8, %v6686_v15, %v1646_v57  ;;  %v2794_v63 = vunpack.c.l.b16 %v6647_v21  ;;  %v956_v53 = vmul.f32 %v892_v20, %v892_v20  ;;  %v2123_v55 = vld [vmem:[%s9111_s3] sm:$0x1] }
 0x194   : > { %5522 = vrcp.f32 %v6758_v3  ;;  %v2795_v21 = vunpack.c.l.b16 %v6580_v51  ;;  %vm1662_vm12 = vweird.f32 %v6752_v4  ;;  %vm1677_vm2 = vweird.f32 %v6758_v3 }
 0x195   : > { %2621 = vmatpush.bf16.xpose.msra.mxu3 %v2615_v30  ;;  %v2723_v30 = vunpack.c.l.b16 %v6553_v47  ;;  %v1651_v47 = vand.u32 2147483647, %v6657_v45  ;;  %5524 = vpow2.f32 %v5290_v32  ;;  %v1134_v45 = vpack.c.bf16 %v1080_v24, %v1078_v8  ;;  %v6848_v19 = vpop.f32.mrf.mxu0 }
 0x196   : > { %5526 = vpow2.f32 %v5291_v7  ;;  %v2175_v32 = vsel %vm2173_vm10, %v2123_v55, 0  ;;  %v1101_v8 = vadd.f32 -0.4472136, %v1037_v60  ;;  %v1103_v24 = vadd.f32 -0.4472136, %v1039_v41  ;;  %9208 = vst [vmem:[#allocation44_spill] sm:$0xff] %v6848_v19 }
 0x197   : > { %v6766_v44 = vpack.c.b16 %v2724_v27, %v2723_v30  ;;  %vm6804_vm9 = vcmp.eq.f32.partialorder %v1651_v47, 8.507059e+37  ;;  %v2609_v47 = vsel %vm2446_vm1, %v6610_v14, 0  ;;  %v954_v27 = vmul.f32 %v890_v50, %v890_v50  ;;  %2184 = vmatpush.bf16.msra.mxu2 %v2175_v32 }
 0x198   : > { %v6821_v38 = vpop.f32.mrf.mxu2  ;;  %v1655_v12 = vsel %vm6804_vm9, %v1654_v18, %v1650_v58  ;;  %v6837_v57 = vpack.c.b16 %v2795_v21, %v2794_v63  ;;  %v1020_v20 = vmul.f32 0.8944272, %v956_v53  ;;  %v1145_v18 = vpack.c.bf16 %v1103_v24, %v1101_v8 }
 0x199   : > { %2735 = vrot.lane.b32.xlu1 %v6766_v44, %s5904_s29  ;;  %2660 = vrot.lane.b32.xlu0 %v6779_v37, %s5904_s29  ;;  %v6802_v30 = vpop.f32.mrf.mxu3  ;;  %v6826_v15 = vpop.eup %5520  ;;  %v1018_v50 = vmul.f32 0.8944272, %v954_v27  ;;  %v5292_v41 = vmul.f32 -1.442695, %v1473_v49  ;;  %v2799_v55 = vunpack.c.l.b16 %v6521_v54  ;;  %v2606_v32 = vsel %vm2446_vm1, %v6629_v6, 0 }
 0x19a   : > { %v6829_v16 = vpop.eup %5522  ;;  %v1658_v62 = vmul.f32 %v6826_v15, %v6752_v4  ;;  %v894_v54 = vmax.f32 %v6678_v22, 0.0  ;;  %vm1663_vm13 = vweird.f32 %v6826_v15 }
 0x19b   : > { %v5525_v10 = vpop.eup %5524  ;;  %v1673_v17 = vmul.f32 %v6829_v16, %v6758_v3  ;;  %v1082_v63 = vadd.f32 -0.4472136, %v1018_v50  ;;  %v1668_v50 = vand.u32 2147483648, %v6752_v4  ;;  %vm6894_vm14 = vmor %vm1662_vm12, %vm1663_vm13  ;;  %vm1678_vm3 = vweird.f32 %v6829_v16 }
 0x19c   : > { %5337 = vmatmul.msk.bf16.gmra.mxu3 %vm2446_vm1, %v6232_v61  ;;  %v1640_v61 = vsel %vm6783_vm7, %v1639_v23, %v1635_v1  ;;  %v913_v23 = vmax.f32 %v6705_v26, 0.0  ;;  %v6851_v7 = vadd.f32 1.0, %v5525_v10  ;;  %v5527_v60 = vpop.eup %5526  ;;  %v1474_v1 = vadd.f32 %v6594_v36, %v6405_v48  ;;  %vm1679_vm4 = vmor %vm1677_vm2, %vm1678_vm3 }
 0x19d   : > { %2622 = vmatpush.bf16.xpose.msra.mxu3 %v2612_v35  ;;  %v6815_v35 = vpop.f32.mrf.mxu1  ;;  %1402 = vmatmul.bf16.gmra.mxu1 %v1134_v45  ;;  %v2107_v51 = vpack.c.bf16 %v1655_v12, %v1640_v61  ;;  %v915_v45 = vmax.f32 %v6748_v0, 0.0  ;;  %v2798_v26 = vunpack.c.l.b16 %v6535_v46  ;;  %v1659_v58 = vsub.f32 1.0, %v1658_v62 }
 0x19e   : > { %v1674_v53 = vsub.f32 1.0, %v1673_v17  ;;  %v977_v0 = vmul.f32 %v913_v23, %v913_v23  ;;  %5528 = vrcp.f32 %v6851_v7  ;;  %v6867_v48 = vadd.f32 1.0, %v5527_v60 }
 0x19f   : > { %5318 = vmatmul.msk.bf16.vlgmr.msra.gmra.mxu2 %vm2124_vm11, %v2107_v51  ;;  %1343 = vmatmul.bf16.gmra.mxu0 %v1145_v18  ;;  %v979_v46 = vmul.f32 %v915_v45, %v915_v45  ;;  %5530 = vpow2.f32 %v5292_v41  ;;  %v5293_v8 = vmul.f32 -1.442695, %v1474_v1  ;;  %v6869_v24 = vpack.c.b16 %v2799_v55, %v2798_v26 }
 0x1a0   : > { %v6859_v27 = vpop.f32.mrf.mxu2  ;;  %v1041_v12 = vmul.f32 0.8944272, %v977_v0  ;;  %v896_v10 = vmax.f32 %v6718_v43, 0.0  ;;  %v1660_v49 = vmul.f32 %v6826_v15, %v1659_v58  ;;  %v1675_v51 = vmul.f32 %v6829_v16, %v1674_v53 }
 0x1a1   : > { %2658 = vrot.lane.b32.xlu1 %v6551_v59, %s5904_s29  ;;  %2806 = vrot.lane.b32.xlu0 %v6837_v57, %s5904_s29  ;;  %v6854_v29 = vpop.f32.mrf.mxu3  ;;  %5532 = vrcp.f32 %v6867_v48  ;;  %v1043_v62 = vmul.f32 0.8944272, %v979_v46  ;;  %v1475_v43 = vadd.f32 %v6594_v36, %v6420_v9  ;;  %v958_v17 = vmul.f32 %v894_v54, %v894_v54 }
 0x1a2   : > { %5534 = vpow2.f32 %v5293_v8  ;;  %v1661_v22 = vadd.f32 %v6826_v15, %v1660_v49  ;;  %v1666_v18 = vand.u32 2147483647, %v6752_v4  ;;  %v1683_v60 = vand.u32 2147483648, %v6758_v3 }
 0x1a3   : > { %v1105_v1 = vadd.f32 -0.4472136, %v1041_v12  ;;  %v960_v26 = vmul.f32 %v896_v10, %v896_v10  ;;  %v1669_v9 = vor.u32 1.1754944e-38, %v1668_v50  ;;  %v1681_v46 = vand.u32 2147483647, %v6758_v3 }
 0x1a4   : > { %vm1667_vm15 = vcmp.eq.f32.partialorder %v1666_v18, 8.507059e+37  ;;  %v1684_v8 = vor.u32 1.1754944e-38, %v1683_v60  ;;  %v917_v54 = vmax.f32 %v6815_v35, 0.0  ;;  %v5294_v49 = vmul.f32 -1.442695, %v1475_v43 }
 0x1a5   : > { %2623 = vmatpush.bf16.xpose.msra.mxu3 %v2609_v47  ;;  %v1084_v47 = vadd.f32 -0.4472136, %v1020_v20  ;;  %v6862_v21 = vpop.f32.mrf.mxu1  ;;  %v6886_v20 = vpop.eup %5528  ;;  %vm1682_vm5 = vcmp.eq.f32.partialorder %v1681_v46, 8.507059e+37  ;;  %vm1692_vm6 = vweird.f32 %v6851_v7  ;;  %vm1707_vm10 = vweird.f32 %v6867_v48 }
 0x1a6   : > { %v5531_v41 = vpop.eup %5530  ;;  %v1688_v4 = vmul.f32 %v6886_v20, %v6851_v7  ;;  %vm1693_vm7 = vweird.f32 %v6886_v20 }
 0x1a7   : > { %v1136_v61 = vpack.c.bf16 %v1084_v47, %v1082_v63  ;;  %v1676_v63 = vadd.f32 %v6829_v16, %v1675_v51  ;;  %v1665_v47 = vsel %vm6894_vm14, %v6826_v15, %v1661_v22  ;;  %v6912_v55 = vpop.eup %5532  ;;  %v6914_v0 = vadd.f32 1.0, %v5531_v41  ;;  %vm6955_vm8 = vmor %vm1692_vm6, %vm1693_vm7 }
 0x1a8   : > { %v6900_v58 = vpop.f32.mrf.mxu2  ;;  %v5535_v15 = vpop.eup %5534  ;;  %v1670_v12 = vsel %vm1667_vm15, %v1669_v9, %v1665_v47  ;;  %v919_v51 = vmax.f32 %v6862_v21, 0.0  ;;  %v1703_v50 = vmul.f32 %v6912_v55, %v6867_v48  ;;  %v1476_v22 = vadd.f32 %v6594_v36, %v6441_v52 }
 0x1a9   : > { %2410 = vrot.lane.b32.xlu1 %v6529_v33, %s5905_s30  ;;  %2810 = vrot.lane.b32.xlu0 %v6869_v24, %s5904_s29  ;;  %v6881_v33 = vpop.f32.mrf.mxu0  ;;  %v6892_v23 = vpop.f32.mrf.mxu3  ;;  %v1680_v10 = vsel %vm1679_vm4, %v6829_v16, %v1676_v63  ;;  %5536 = vrcp.f32 %v6914_v0  ;;  %v1689_v43 = vsub.f32 1.0, %v1688_v4  ;;  %v6929_v21 = vadd.f32 1.0, %v5535_v15 }
 0x1aa   : > { %9209 = vst [vmem:[#allocation45_spill] sm:$0xff] %v6881_v33  ;;  %v1685_v3 = vsel %vm1682_vm5, %v1684_v8, %v1680_v10  ;;  %5538 = vpow2.f32 %v5294_v49  ;;  %v983_v18 = vmul.f32 %v919_v51, %v919_v51  ;;  %v1704_v41 = vsub.f32 1.0, %v1703_v50 }
 0x1ab   : > { %v2108_v35 = vpack.c.bf16 %v1685_v3, %v1670_v12  ;;  %v900_v47 = vmax.f32 %v6821_v38, 0.0  ;;  %5540 = vrcp.f32 %v6929_v21  ;;  %v1698_v8 = vand.u32 2147483648, %v6851_v7 }
 0x1ac   : > { %5338 = vmatmul.msk.bf16.vlgmr.msrb.gmra.mxu3 %vm2446_vm1, %v6287_v39  ;;  %v1107_v39 = vadd.f32 -0.4472136, %v1043_v62  ;;  %v1047_v4 = vmul.f32 0.8944272, %v983_v18  ;;  %v1713_v50 = vand.u32 2147483648, %v6867_v48  ;;  %vm1708_vm12 = vweird.f32 %v6912_v55 }
 0x1ad   : > { %2624 = vmatpush.bf16.xpose.msra.mxu3 %v2606_v32  ;;  %1407 = vmatmul.bf16.gmra.mxu1 %v1136_v61  ;;  %v6909_v53 = vpop.f32.mrf.mxu1  ;;  %v1022_v32 = vmul.f32 0.8944272, %v958_v17  ;;  %v1024_v61 = vmul.f32 0.8944272, %v960_v26  ;;  %v898_v26 = vmax.f32 %v6761_v42, 0.0  ;;  %v1705_v42 = vmul.f32 %v6912_v55, %v1704_v41  ;;  %vm1709_vm13 = vmor %vm1707_vm10, %vm1708_vm12 }
 0x1ae   : > { %v1147_v62 = vpack.c.bf16 %v1107_v39, %v1105_v1  ;;  %v5295_v1 = vmul.f32 -1.442695, %v1476_v22  ;;  %v964_v10 = vmul.f32 %v900_v47, %v900_v47  ;;  %v1111_v49 = vadd.f32 -0.4472136, %v1047_v4 }
 0x1af   : > { %v1086_v17 = vadd.f32 -0.4472136, %v1022_v32  ;;  %v1088_v45 = vadd.f32 -0.4472136, %v1024_v61  ;;  %5319 = vmatmul.msk.bf16.gmra.mxu2 %vm2124_vm11, %v2108_v35  ;;  %v1690_v32 = vmul.f32 %v6886_v20, %v1689_v43  ;;  %v6944_v46 = vpop.eup %5536  ;;  %v9213_v61 = vld [vmem:[#allocation4_spill] sm:$0xff]  ;;  %v921_v41 = vmax.f32 %v6909_v53, 0.0 }
 0x1b0   : > { %1348 = vmatmul.bf16.gmra.mxu0 %v1147_v62  ;;  %v6934_v52 = vpop.f32.mrf.mxu2  ;;  %v5539_v15 = vpop.eup %5538  ;;  %5542 = vpow2.f32 %v5295_v1  ;;  %v1699_v62 = vor.u32 1.1754944e-38, %v1698_v8  ;;  %v1718_v3 = vmul.f32 %v6944_v46, %v6914_v0  ;;  %v1028_v1 = vmul.f32 0.8944272, %v964_v10 }
 0x1b1   : > { %2424 = vrot.lane.b32.xlu0 %v6434_v56, %s5905_s30  ;;  %v981_v56 = vmul.f32 %v917_v54, %v917_v54  ;;  %v6927_v16 = vpop.f32.mrf.mxu0  ;;  %v6931_v60 = vpop.f32.mrf.mxu3  ;;  %v1138_v39 = vpack.c.bf16 %v1088_v45, %v1086_v17  ;;  %v1477_v54 = vadd.f32 %v6594_v36, %v6466_v11  ;;  %v1691_v38 = vadd.f32 %v6886_v20, %v1690_v32 }
 0x1b2   : > { %9212 = vst [vmem:[#allocation46_spill] sm:$0xff] %v6927_v16  ;;  %v1696_v11 = vand.u32 2147483647, %v6851_v7  ;;  %v6963_v22 = vadd.f32 1.0, %v5539_v15  ;;  %v1706_v17 = vadd.f32 %v6912_v55, %v1705_v42  ;;  %v6971_v45 = vpop.eup %5540  ;;  %v1714_v32 = vor.u32 1.1754944e-38, %v1713_v50  ;;  %v9217_v42 = vld [vmem:[#allocation12_spill] sm:$0xff] }
 0x1b3   : > { %v1045_v9 = vmul.f32 0.8944272, %v981_v56  ;;  %v1695_v56 = vsel %vm6955_vm8, %v6886_v20, %v1691_v38  ;;  %v5296_v43 = vmul.f32 -1.442695, %v1477_v54  ;;  %v1711_v20 = vand.u32 2147483647, %v6867_v48 }
 0x1b4   : > { %vm1697_vm9 = vcmp.eq.f32.partialorder %v1696_v11, 8.507059e+37  ;;  %v1733_v8 = vmul.f32 %v6971_v45, %v6929_v21  ;;  %v1478_v53 = vadd.f32 %v6594_v36, %v9217_v42  ;;  %v1710_v54 = vsel %vm1709_vm13, %v6912_v55, %v1706_v17 }
 0x1b5   : > { %v6937_v63 = vpop.f32.mrf.mxu1  ;;  %v1109_v12 = vadd.f32 -0.4472136, %v1045_v9  ;;  %v1700_v4 = vsel %vm1697_vm9, %v1699_v62, %v1695_v56  ;;  %vm1712_vm14 = vcmp.eq.f32.partialorder %v1711_v20, 8.507059e+37  ;;  %5544 = vrcp.f32 %v6963_v22 }
 0x1b6   : > { %v5543_v9 = vpop.eup %5542  ;;  %v1715_v48 = vsel %vm1712_vm14, %v1714_v32, %v1710_v54  ;;  %5546 = vpow2.f32 %v5296_v43  ;;  %v985_v10 = vmul.f32 %v921_v41, %v921_v41  ;;  %v1734_v11 = vsub.f32 1.0, %v1733_v8 }
 0x1b7   : > { %v1149_v47 = vpack.c.bf16 %v1111_v49, %v1109_v12  ;;  %v2109_v38 = vpack.c.bf16 %v1715_v48, %v1700_v4  ;;  %v1719_v12 = vsub.f32 1.0, %v1718_v3  ;;  %v6992_v49 = vpop.permute.xlu2 %2664  ;;  %v5297_v62 = vmul.f32 -1.442695, %v1478_v53 }
 0x1b8   : > { %9218 = vst [vmem:[#allocation12_spill] sm:$0xff] %v6992_v49  ;;  %v902_v55 = vmax.f32 %v6859_v27, 0.0  ;;  %v904_v50 = vmax.f32 %v6900_v58, 0.0  ;;  %v1049_v3 = vmul.f32 0.8944272, %v985_v10  ;;  %vm1722_vm15 = vweird.f32 %v6914_v0 }
 0x1b9   : > { %2412 = vrot.lane.b32.xlu0 %v6533_v28, %s5905_s30  ;;  %v962_v28 = vmul.f32 %v898_v26, %v898_v26  ;;  %v6965_v35 = vpop.f32.mrf.mxu0  ;;  %v6973_v18 = vpop.f32.mrf.mxu3  ;;  %v1728_v32 = vand.u32 2147483648, %v6914_v0  ;;  %vm1723_vm2 = vweird.f32 %v6944_v46  ;;  %v1726_v42 = vand.u32 2147483647, %v6914_v0 }
 0x1ba   : > { %9216 = vst [vmem:[#allocation4_spill] sm:$0xff] %v6965_v35  ;;  %v6977_v26 = vpop.f32.mrf.mxu2  ;;  %v966_v20 = vmul.f32 %v902_v55, %v902_v55  ;;  %v1113_v53 = vadd.f32 -0.4472136, %v1049_v3  ;;  %vm7015_vm3 = vmor %vm1722_vm15, %vm1723_vm2  ;;  %v1743_v10 = vand.u32 2147483648, %v6929_v21  ;;  %vm1737_vm5 = vweird.f32 %v6929_v21  ;;  %v9240_v35 = vld [vmem:[#allocation20_spill] sm:$0xff] }
 0x1bb   : > { %v1026_v7 = vmul.f32 0.8944272, %v962_v28  ;;  %v1729_v55 = vor.u32 1.1754944e-38, %v1728_v32  ;;  %vm7032_vm4 = vcmp.eq.f32.partialorder %v1726_v42, 8.507059e+37  ;;  %vm1738_vm6 = vweird.f32 %v6971_v45 }
 0x1bc   : > { %5339 = vmatmul.msk.bf16.gmra.mxu3 %vm2446_vm1, %v9213_v61  ;;  %v1092_v61 = vadd.f32 -0.4472136, %v1028_v1  ;;  %v1720_v1 = vmul.f32 %v6944_v46, %v1719_v12  ;;  %v1030_v0 = vmul.f32 0.8944272, %v966_v20  ;;  %v1741_v3 = vand.u32 2147483647, %v6929_v21  ;;  %vm7042_vm7 = vmor %vm1737_vm5, %vm1738_vm6 }
 0x1bd   : > { %1412 = vmatmul.bf16.gmra.mxu1 %v1138_v39  ;;  %v923_v39 = vmax.f32 %v6937_v63, 0.0  ;;  %v6986_v15 = vpop.f32.mrf.mxu1  ;;  %v6990_v63 = vadd.f32 1.0, %v5543_v9  ;;  %v1090_v28 = vadd.f32 -0.4472136, %v1026_v7  ;;  %v7000_v7 = vpop.eup %5544  ;;  %v1735_v9 = vmul.f32 %v6971_v45, %v1734_v11 }
 0x1be   : > { %v5547_v58 = vpop.eup %5546  ;;  %v1721_v4 = vadd.f32 %v6944_v46, %v1720_v1  ;;  %v925_v1 = vmax.f32 %v6986_v15, 0.0  ;;  %vm1742_vm8 = vcmp.eq.f32.partialorder %v1741_v3, 8.507059e+37  ;;  %v9229_v15 = vld [vmem:[#allocation15_spill] sm:$0xff]  ;;  %vm1752_vm9 = vweird.f32 %v6963_v22 }
 0x1bf   : > { %v987_v51 = vmul.f32 %v923_v39, %v923_v39  ;;  %5320 = vmatmul.msk.bf16.gmra.mxu2 %vm2124_vm11, %v2109_v38  ;;  %5548 = vrcp.f32 %v6990_v63  ;;  %v1140_v56 = vpack.c.bf16 %v1092_v61, %v1090_v28  ;;  %v9220_v39 = vld [vmem:[#allocation2_spill] sm:$0xff]  ;;  %v1748_v61 = vmul.f32 %v7000_v7, %v6963_v22 }
 0x1c0   : > { %1353 = vmatmul.bf16.gmra.mxu0 %v1149_v47  ;;  %5550 = vpow2.f32 %v5297_v62  ;;  %v968_v47 = vmul.f32 %v904_v50, %v904_v50  ;;  %v7023_v38 = vadd.f32 1.0, %v5547_v58  ;;  %v1736_v12 = vadd.f32 %v6971_v45, %v1735_v9  ;;  %v9227_v58 = vld [vmem:[#allocation13_spill] sm:$0xff] }
 0x1c1   : > { %v6998_v17 = vpop.f32.mrf.mxu0  ;;  %v1051_v43 = vmul.f32 0.8944272, %v987_v51  ;;  %v7002_v41 = vpop.f32.mrf.mxu3  ;;  %v1725_v62 = vsel %vm7015_vm3, %v6944_v46, %v1721_v4  ;;  %v1744_v4 = vor.u32 1.1754944e-38, %v1743_v10  ;;  %v989_v10 = vmul.f32 %v925_v1, %v925_v1 }
 0x1c2   : > { %9219 = vst [vmem:[#allocation47_spill] sm:$0xff] %v6998_v17  ;;  %v7005_v27 = vpop.f32.mrf.mxu2  ;;  %v7027_v51 = vpop.permute.xlu2 %2422  ;;  %v1032_v11 = vmul.f32 0.8944272, %v968_v47  ;;  %v1740_v21 = vsel %vm7042_vm7, %v6971_v45, %v1736_v12  ;;  %5552 = vrcp.f32 %v7023_v38  ;;  %v1749_v12 = vsub.f32 1.0, %v1748_v61 }
 0x1c3   : > { %v1115_v54 = vadd.f32 -0.4472136, %v1051_v43  ;;  %v1745_v45 = vsel %vm1742_vm8, %v1744_v4, %v1740_v21  ;;  %v2688_v4 = vsel %vm2446_vm1, %v6992_v49, 0  ;;  %vm1753_vm10 = vweird.f32 %v7000_v7 }
 0x1c4   : > { %v1096_v48 = vadd.f32 -0.4472136, %v1032_v11  ;;  %v1053_v11 = vmul.f32 0.8944272, %v989_v10  ;;  %2694 = vmatpush.bf16.xpose.msrb.mxu3 %v2688_v4  ;;  %vm7096_vm12 = vmor %vm1752_vm9, %vm1753_vm10  ;;  %vm1767_vm14 = vweird.f32 %v6990_v63  ;;  %v7127_v4 = vld [vmem:[%s9110_s2] ss:$0 sm:$0xff] }
 0x1c5   : > { %v683_v8 = vpop.f32.mrf.mxu1  ;;  %v7019_v28 = vpop.eup %5548  ;;  %v1151_v9 = vpack.c.bf16 %v1115_v54, %v1113_v53  ;;  %v1730_v53 = vsel %vm7032_vm4, %v1729_v55, %v1725_v62  ;;  %v1094_v54 = vadd.f32 -0.4472136, %v1030_v0  ;;  %v908_v0 = vmax.f32 %v6977_v26, 0.0  ;;  %v9230_v26 = vld [vmem:[#allocation6_spill] sm:$0xff] }
 0x1c6   : > { %v5551_v50 = vpop.eup %5550  ;;  %v1763_v43 = vmul.f32 %v7019_v28, %v6990_v63  ;;  %v927_v20 = vmax.f32 %v683_v8, 0.0  ;;  %v1480_v8 = vadd.f32 %v6594_v36, %v9229_v15  ;;  %vm1768_vm15 = vweird.f32 %v7019_v28 }
 0x1c7   : > { %v7053_v32 = vadd.f32 1.0, %v5551_v50  ;;  %v1142_v55 = vpack.c.bf16 %v1096_v48, %v1094_v54  ;;  %vm7118_vm2 = vmor %vm1767_vm14, %vm1768_vm15  ;;  %vm1782_vm4 = vweird.f32 %v7023_v38 }
 0x1c8   : > { %v991_v50 = vmul.f32 %v927_v20, %v927_v20  ;;  %v1764_v3 = vsub.f32 1.0, %v1763_v43  ;;  %v5299_v62 = vmul.f32 -1.442695, %v1480_v8  ;;  %v1750_v43 = vmul.f32 %v7000_v7, %v1749_v12  ;;  %v7073_v1 = vpop.eup %5552  ;;  %v7075_v20 = vpop.permute.xlu1 %2396 }
 0x1c9   : > { %v7048_v47 = vpop.f32.mrf.mxu0  ;;  %v7057_v42 = vpop.f32.mrf.mxu3  ;;  %5554 = vrcp.f32 %v7053_v32  ;;  %v972_v8 = vmul.f32 %v908_v0, %v908_v0  ;;  %v7092_v48 = vmul.f32 %v7073_v1, %v7023_v38  ;;  %vm1783_vm5 = vweird.f32 %v7073_v1 }
 0x1ca   : > { %9228 = vst [vmem:[#allocation2_spill] sm:$0xff] %v7048_v47  ;;  %v1055_v61 = vmul.f32 0.8944272, %v991_v50  ;;  %v1765_v21 = vmul.f32 %v7019_v28, %v1764_v3  ;;  %v1751_v15 = vadd.f32 %v7000_v7, %v1750_v43  ;;  %v1756_v3 = vand.u32 2147483647, %v6963_v22  ;;  %v7105_v0 = vpop.permute.xlu0 %2731  ;;  %vm7179_vm6 = vmor %vm1782_vm4, %vm1783_vm5 }
 0x1cb   : > { %vm1797_vm7 = vweird.f32 %v7053_v32 }
 0x1cc   : > { %5340 = vmatmul.msk.bf16.gmra.mxu3 %vm2446_vm1, %v9220_v39  ;;  %v1479_v39 = vadd.f32 %v6594_v36, %v9227_v58  ;;  %v7062_v58 = vpop.f32.mrf.mxu2  ;;  %v906_v36 = vmax.f32 %v6934_v52, 0.0  ;;  %v1119_v12 = vadd.f32 -0.4472136, %v1055_v61  ;;  %vm7110_vm13 = vcmp.eq.f32.partialorder %v1756_v3, 8.507059e+37 }
 0x1cd   : > { %1417 = vmatmul.bf16.gmra.mxu1 %v1140_v56  ;;  %v7064_v47 = vpop.f32.mrf.mxu1  ;;  %v7070_v56 = vpop.permute.xlu2 %2808 }
 0x1ce   : > { %v5298_v46 = vmul.f32 -1.442695, %v1479_v39  ;;  %v970_v52 = vmul.f32 %v906_v36, %v906_v36  ;;  %v1758_v39 = vand.u32 2147483648, %v6963_v22 }
 0x1cf   : > { %v7088_v54 = vpop.eup %5554 }
 0x1d0   : > { %1358 = vmatmul.bf16.gmra.mxu0 %v1151_v9  ;;  %v2110_v9 = vpack.c.bf16 %v1745_v45, %v1730_v53  ;;  %5556 = vpow2.f32 %v5298_v46  ;;  %v1117_v45 = vadd.f32 -0.4472136, %v1053_v11  ;;  %v929_v46 = vmax.f32 %v7064_v47, 0.0  ;;  %v7138_v16 = vpop.permute.xlu1 %2662 }
 0x1d1   : > { %5558 = vpow2.f32 %v5299_v62  ;;  %v7084_v53 = vpop.f32.mrf.mxu0  ;;  %v7094_v10 = vpop.f32.mrf.mxu3  ;;  %v1034_v36 = vmul.f32 0.8944272, %v970_v52  ;;  %v1759_v62 = vor.u32 1.1754944e-38, %v1758_v39  ;;  %v1755_v11 = vsel %vm7096_vm12, %v7000_v7, %v1751_v15  ;;  %v9238_v15 = vld [vmem:[#allocation18_spill] sm:$0xff]  ;;  %9241 = vst [vmem:[#allocation6_spill] sm:$0xff] %v7138_v16 }
 0x1d2   : > { %5321 = vmatmul.msk.bf16.gmra.mxu2 %vm2124_vm11, %v2110_v9  ;;  %9231 = vst [vmem:[#allocation13_spill] sm:$0xff] %v7084_v53  ;;  %v1793_v47 = vmul.f32 %v7088_v54, %v7053_v32  ;;  %v1036_v52 = vmul.f32 0.8944272, %v972_v8  ;;  %v1771_v7 = vand.u32 2147483647, %v6990_v63  ;;  %v1481_v50 = vadd.f32 %v7127_v4, %v9238_v15 }
 0x1d3   : > { %v1153_v8 = vpack.c.bf16 %v1119_v12, %v1117_v45  ;;  %v1760_v33 = vsel %vm7110_vm13, %v1759_v62, %v1755_v11  ;;  %v1779_v15 = vsub.f32 1.0, %v7092_v48  ;;  %v993_v40 = vmul.f32 %v929_v46, %v929_v46 }
 0x1d4   : > { %v7102_v9 = vpop.f32.mrf.mxu2  ;;  %vm1772_vm3 = vcmp.eq.f32.partialorder %v1771_v7, 8.507059e+37  ;;  %v2685_v45 = vsel %vm2446_vm1, %v7138_v16, 0  ;;  %v1098_v12 = vadd.f32 -0.4472136, %v1034_v36  ;;  %v1794_v39 = vsub.f32 1.0, %v1793_v47 }
 0x1d5   : > { %v688_v43 = vpop.f32.mrf.mxu1  ;;  %2695 = vmatpush.bf16.xpose.msrb.mxu3 %v2685_v45  ;;  %v5300_v61 = vmul.f32 -1.442695, %v1481_v50  ;;  %v1057_v48 = vmul.f32 0.8944272, %v993_v40  ;;  %v1780_v40 = vmul.f32 %v7073_v1, %v1779_v15  ;;  %v1788_v50 = vand.u32 2147483648, %v7023_v38 }
 0x1d6   : > { %v5557_v22 = vpop.eup %5556  ;;  %v931_v3 = vmax.f32 %v688_v43, 0.0  ;;  %vm1798_vm8 = vweird.f32 %v7088_v54 }
 0x1d7   : > { %v7143_v43 = vadd.f32 1.0, %v5557_v22  ;;  %v1781_v45 = vadd.f32 %v7073_v1, %v1780_v40  ;;  %vm7194_vm10 = vmor %vm1797_vm7, %vm1798_vm8 }
 0x1d8   : > { %v995_v62 = vmul.f32 %v931_v3, %v931_v3  ;;  %v1121_v3 = vadd.f32 -0.4472136, %v1057_v48 }
 0x1d9   : > { %5560 = vrcp.f32 %v7143_v43  ;;  %v7154_v22 = vpop.f32.mrf.mxu3  ;;  %vm1812_vm13 = vweird.f32 %v7143_v43 }
 0x1da   : > { %v7152_v46 = vpop.permute.xlu0 %2733 }
 0x1dc   : > { %5341 = vmatmul.msk.bf16.gmra.mxu3 %vm2446_vm1, %v9230_v26  ;;  %v5559_v26 = vpop.eup %5558 }
 0x1dd   : > { %1422 = vmatmul.bf16.gmra.mxu1 %v1142_v55  ;;  %v1766_v55 = vadd.f32 %v7019_v28, %v1765_v21  ;;  %v1773_v21 = vand.u32 2147483648, %v6990_v63  ;;  %v1482_v63 = vadd.f32 %v7127_v4, %v9240_v35  ;;  %v1100_v35 = vadd.f32 -0.4472136, %v1036_v52 }
 0x1de   : > { %v1795_v52 = vmul.f32 %v7088_v54, %v1794_v39 }
 0x1df   : > { %v1770_v17 = vsel %vm7118_vm2, %v7019_v28, %v1766_v55  ;;  %v1774_v19 = vor.u32 1.1754944e-38, %v1773_v21  ;;  %v7147_v28 = vadd.f32 1.0, %v5559_v26  ;;  %v5301_v7 = vmul.f32 -1.442695, %v1482_v63  ;;  %v7149_v21 = vpop.f32.mrf.mxu0  ;;  %v9243_v63 = vld [vmem:[#allocation8_spill] sm:$0xff] }
 0x1e0   : > { %1363 = vmatmul.bf16.gmra.mxu0 %v1153_v8  ;;  %9242 = vst [vmem:[#allocation18_spill] sm:$0xff] %v7149_v21  ;;  %v910_v26 = vmax.f32 %v7005_v27, 0.0  ;;  %v1144_v36 = vpack.c.bf16 %v1100_v35, %v1098_v12  ;;  %v1786_v12 = vand.u32 2147483647, %v7023_v38  ;;  %v1796_v35 = vadd.f32 %v7088_v54, %v1795_v52 }
 0x1e1   : > { %v1775_v55 = vsel %vm1772_vm3, %v1774_v19, %v1770_v17  ;;  %5562 = vrcp.f32 %v7147_v28  ;;  %v912_v19 = vmax.f32 %v7062_v58, 0.0  ;;  %v7159_v17 = vpop.f32.mrf.mxu2  ;;  %v1803_v58 = vand.u32 2147483648, %v7053_v32 }
 0x1e2   : > { %v7131_v53 = vpop.permute.xlu2 %2881  ;;  %v2111_v11 = vpack.c.bf16 %v1775_v55, %v1760_v33  ;;  %5564 = vpow2.f32 %v5300_v61  ;;  %v1059_v33 = vmul.f32 0.8944272, %v995_v62  ;;  %v974_v8 = vmul.f32 %v910_v26, %v910_v26  ;;  %v7177_v55 = vpop.eup %5560 }
 0x1e3   : > { %9239 = vst [vmem:[#allocation15_spill] sm:$0xff] %v7131_v53  ;;  %5566 = vpow2.f32 %v5301_v7  ;;  %v976_v15 = vmul.f32 %v912_v19, %v912_v19  ;;  %v1789_v62 = vor.u32 1.1754944e-38, %v1788_v50  ;;  %v1785_v38 = vsel %vm7179_vm6, %v7073_v1, %v1781_v45 }
 0x1e4   : > { %5322 = vmatmul.msk.bf16.gmra.mxu2 %vm2124_vm11, %v2111_v11  ;;  %v1123_v39 = vadd.f32 -0.4472136, %v1059_v33  ;;  %vm7190_vm9 = vcmp.eq.f32.partialorder %v1786_v12, 8.507059e+37  ;;  %v1801_v26 = vand.u32 2147483647, %v7053_v32  ;;  %v9250_v33 = vld [vmem:[#allocation24_spill] sm:$0xff]  ;;  %v1800_v52 = vsel %vm7194_vm10, %v7088_v54, %v1796_v35 }
 0x1e5   : > { %v1483_v40 = vadd.f32 %v7127_v4, %v9250_v33  ;;  %v1038_v50 = vmul.f32 0.8944272, %v974_v8  ;;  %v1790_v54 = vsel %vm7190_vm9, %v1789_v62, %v1785_v38  ;;  %v9252_v33 = vld [vmem:[#allocation28_spill] sm:$0xff]  ;;  %v7225_v62 = vpop.f32.mrf.mxu1  ;;  %v914_v38 = vmax.f32 %v7102_v9, 0.0 }
 0x1e6   : > { %vm1802_vm12 = vcmp.eq.f32.partialorder %v1801_v26, 8.507059e+37  ;;  %v1155_v61 = vpack.c.bf16 %v1123_v39, %v1121_v3  ;;  %v1484_v8 = vadd.f32 %v7127_v4, %v9252_v33  ;;  %9253 = vst [vmem:[#allocation8_spill] sm:$0xff] %v7225_v62  ;;  %v1833_v9 = vand.u32 2147483648, %v7147_v28 }
 0x1e7   : > { %v7185_v11 = vpop.eup %5562  ;;  %v7206_v45 = vpop.f32.mrf.mxu0  ;;  %v5302_v26 = vmul.f32 -1.442695, %v1483_v40  ;;  %v1102_v21 = vadd.f32 -0.4472136, %v1038_v50  ;;  %vm1813_vm14 = vweird.f32 %v7177_v55  ;;  %vm1827_vm2 = vweird.f32 %v7147_v28 }
 0x1e8   : > { %v5565_v19 = vpop.eup %5564  ;;  %9251 = vst [vmem:[#allocation20_spill] sm:$0xff] %v7206_v45  ;;  %v1823_v32 = vmul.f32 %v7185_v11, %v7147_v28  ;;  %v5303_v39 = vmul.f32 -1.442695, %v1484_v8  ;;  %vm7252_vm15 = vmor %vm1812_vm13, %vm1813_vm14  ;;  %vm1828_vm3 = vweird.f32 %v7185_v11  ;;  %v1831_v8 = vand.u32 2147483647, %v7147_v28 }
 0x1e9   : > { %v5567_v1 = vpop.eup %5566  ;;  %v7216_v48 = vadd.f32 1.0, %v5565_v19  ;;  %vm1829_vm5 = vmor %vm1827_vm2, %vm1828_vm3 }
 0x1ea   : > { %v7162_v47 = vpop.permute.xlu2 %2737  ;;  %v7222_v45 = vadd.f32 1.0, %v5567_v1  ;;  %v1824_v3 = vsub.f32 1.0, %v1823_v32  ;;  %v1816_v32 = vand.u32 2147483647, %v7143_v43  ;;  %vm1832_vm6 = vcmp.eq.f32.partialorder %v1831_v8, 8.507059e+37 }
 0x1eb   : > { %v2761_v27 = vsel %vm2446_vm1, %v7162_v47, 0  ;;  %5568 = vrcp.f32 %v7216_v48  ;;  %vm1842_vm7 = vweird.f32 %v7216_v48 }
 0x1ec   : > { %5342 = vmatmul.msk.bf16.vlgmr.msra.gmra.mxu3 %vm2446_vm1, %v9243_v63  ;;  %2767 = vmatpush.bf16.xpose.msra.mxu0 %v2761_v27  ;;  %v1808_v27 = vmul.f32 %v7177_v55, %v7143_v43  ;;  %v1040_v63 = vmul.f32 0.8944272, %v976_v15  ;;  %v7220_v15 = vpop.f32.mrf.mxu2  ;;  %5570 = vpow2.f32 %v5302_v26  ;;  %vm1817_vm4 = vcmp.eq.f32.partialorder %v1816_v32, 8.507059e+37 }
 0x1ed   : > { %1427 = vmatmul.bf16.gmra.mxu1 %v1144_v36  ;;  %v1804_v36 = vor.u32 1.1754944e-38, %v1803_v58  ;;  %v7210_v58 = vpop.permute.xlu0 %2406  ;;  %5572 = vrcp.f32 %v7222_v45  ;;  %vm1857_vm10 = vweird.f32 %v7222_v45 }
 0x1ee   : > { %v1104_v6 = vadd.f32 -0.4472136, %v1040_v63  ;;  %v1809_v53 = vsub.f32 1.0, %v1808_v27  ;;  %5574 = vpow2.f32 %v5303_v39  ;;  %v1818_v27 = vand.u32 2147483648, %v7143_v43 }
 0x1ef   : > { %v7212_v12 = vpop.f32.mrf.mxu3  ;;  %v1805_v35 = vsel %vm1802_vm12, %v1804_v36, %v1800_v52  ;;  %v916_v36 = vmax.f32 %v7159_v17, 0.0  ;;  %v1825_v52 = vmul.f32 %v7185_v11, %v1824_v3  ;;  %v7235_v1 = vpop.f32.mrf.mxu0  ;;  %v9258_v3 = vld [vmem:[#allocation30_spill] sm:$0xff] }
 0x1f0   : > { %1368 = vmatmul.bf16.gmra.mxu0 %v1155_v61  ;;  %v2112_v14 = vpack.c.bf16 %v1805_v35, %v1790_v54  ;;  %v1146_v7 = vpack.c.bf16 %v1104_v6, %v1102_v21  ;;  %v1810_v40 = vmul.f32 %v7177_v55, %v1809_v53  ;;  %9254 = vst [vmem:[#allocation24_spill] sm:$0xff] %v7235_v1  ;;  %v9255_v21 = vld [vmem:[#allocation3_spill] sm:$0xff]  ;;  %v1819_v33 = vor.u32 1.1754944e-38, %v1818_v27 }
 0x1f1   : > { %v978_v6 = vmul.f32 %v914_v38, %v914_v38  ;;  %v7245_v53 = vpop.eup %5568  ;;  %v980_v17 = vmul.f32 %v916_v36, %v916_v36  ;;  %v1826_v61 = vadd.f32 %v7185_v11, %v1825_v52  ;;  %v1485_v39 = vadd.f32 %v7127_v4, %v9258_v3  ;;  %v7273_v3 = vpop.f32.mrf.mxu1 }
 0x1f2   : > { %v5571_v54 = vpop.eup %5570  ;;  %v1834_v38 = vor.u32 1.1754944e-38, %v1833_v9  ;;  %9259 = vst [vmem:[#allocation28_spill] sm:$0xff] %v7273_v3  ;;  %vm1843_vm8 = vweird.f32 %v7245_v53 }
 0x1f3   : > { %v7259_v26 = vpop.eup %5572  ;;  %v1042_v28 = vmul.f32 0.8944272, %v978_v6  ;;  %v1044_v52 = vmul.f32 0.8944272, %v980_v17  ;;  %v5304_v32 = vmul.f32 -1.442695, %v1485_v39  ;;  %v2866_v6 = vunpack.c.l.b16 %v7075_v20  ;;  %vm7320_vm9 = vmor %vm1842_vm7, %vm1843_vm8 }
 0x1f4   : > { %5323 = vmatmul.msk.bf16.gmra.mxu2 %vm2124_vm11, %v2112_v14  ;;  %v1811_v14 = vadd.f32 %v7177_v55, %v1810_v40  ;;  %v7247_v63 = vpop.f32.mrf.mxu2  ;;  %v5575_v36 = vpop.eup %5574  ;;  %v1838_v40 = vmul.f32 %v7245_v53, %v7216_v48  ;;  %v1853_v27 = vmul.f32 %v7259_v26, %v7222_v45  ;;  %v918_v20 = vmax.f32 %v7220_v15, 0.0 }
 0x1f5   : > { %v7279_v8 = vadd.f32 1.0, %v5575_v36  ;;  %v1106_v1 = vadd.f32 -0.4472136, %v1042_v28  ;;  %v1108_v62 = vadd.f32 -0.4472136, %v1044_v52  ;;  %v920_v36 = vmax.f32 %v7247_v63, 0.0 }
 0x1f6   : > { %v1815_v43 = vsel %vm7252_vm15, %v7177_v55, %v1811_v14  ;;  %v1839_v3 = vsub.f32 1.0, %v1838_v40  ;;  %v1854_v49 = vsub.f32 1.0, %v1853_v27  ;;  %vm1858_vm12 = vweird.f32 %v7259_v26 }
 0x1f7   : > { %v7239_v50 = vpop.f32.mrf.mxu3  ;;  %v1820_v14 = vsel %vm1817_vm4, %v1819_v33, %v1815_v43  ;;  %vm7337_vm14 = vmor %vm1857_vm10, %vm1858_vm12 }
 0x1f8   : > { %v1840_v28 = vmul.f32 %v7245_v53, %v1839_v3  ;;  %v1855_v52 = vmul.f32 %v7259_v26, %v1854_v49 }
 0x1fa   : > { %v7231_v19 = vpop.permute.xlu0 %2804  ;;  %v1841_v63 = vadd.f32 %v7245_v53, %v1840_v28  ;;  %v1863_v28 = vand.u32 2147483648, %v7222_v45 }
 0x1fc   : > { %5343 = vmatmul.msk.bf16.gmra.mxu3 %vm2446_vm1, %v9255_v21  ;;  %v7271_v21 = vadd.f32 1.0, %v5571_v54  ;;  %v7282_v54 = vpop.f32.mrf.mxu0 }
 0x1fd   : > { %1432 = vmatmul.bf16.gmra.mxu1 %v1146_v7  ;;  %v1830_v7 = vsel %vm1829_vm5, %v7185_v11, %v1826_v61  ;;  %v9261_v11 = vld [vmem:[#allocation34_spill] sm:$0xff]  ;;  %9262 = vst [vmem:[#allocation30_spill] sm:$0xff] %v7282_v54  ;;  %vm1887_vm5 = vweird.f32 %v7279_v8 }
 0x1fe   : > { %v1835_v9 = vsel %vm1832_vm6, %v1834_v38, %v1830_v7  ;;  %v1486_v61 = vadd.f32 %v7127_v4, %v9261_v11  ;;  %5576 = vrcp.f32 %v7271_v21  ;;  %v7289_v38 = vpop.f32.mrf.mxu2  ;;  %v1148_v7 = vpack.c.bf16 %v1108_v62, %v1106_v1  ;;  %v7308_v62 = vpop.f32.mrf.mxu1 }
 0x1ff   : > { %v2113_v16 = vpack.c.bf16 %v1835_v9, %v1820_v14  ;;  %v7285_v33 = vpop.f32.mrf.mxu3  ;;  %5578 = vpow2.f32 %v5304_v32  ;;  %v1848_v9 = vand.u32 2147483648, %v7216_v48  ;;  %9264 = vst [vmem:[#allocation48_spill] sm:$0xff] %v7308_v62  ;;  %v982_v1 = vmul.f32 %v918_v20, %v918_v20 }
 0x200   : > { %v5305_v43 = vmul.f32 -1.442695, %v1486_v61  ;;  %5580 = vrcp.f32 %v7279_v8  ;;  %v984_v32 = vmul.f32 %v920_v36, %v920_v36  ;;  %v1846_v11 = vand.u32 2147483647, %v7216_v48 }
 0x201   : > { %v1849_v61 = vor.u32 1.1754944e-38, %v1848_v9  ;;  %v1845_v48 = vsel %vm7320_vm9, %v7245_v53, %v1841_v63  ;;  %v9273_v9 = vld [vmem:[#allocation21_spill] sm:$0xff]  ;;  %v1046_v54 = vmul.f32 0.8944272, %v982_v1  ;;  %vm1872_vm2 = vweird.f32 %v7271_v21 }
 0x202   : > { %v7275_v55 = vpop.permute.xlu1 %2879  ;;  %5582 = vpow2.f32 %v5305_v43  ;;  %v1861_v43 = vand.u32 2147483647, %v7222_v45  ;;  %vm7333_vm13 = vcmp.eq.f32.partialorder %v1846_v11, 8.507059e+37  ;;  %v1864_v45 = vor.u32 1.1754944e-38, %v1863_v28 }
 0x203   : > { %9260 = vst [vmem:[#allocation3_spill] sm:$0xff] %v7275_v55  ;;  %v2395_v35 = vpop.permute.xlu0 %2394  ;;  %v1048_v62 = vmul.f32 0.8944272, %v984_v32  ;;  %v1850_v36 = vsel %vm7333_vm13, %v1849_v61, %v1845_v48 }
 0x204   : > { %v2865_v17 = vunpack.c.l.b16 %v2395_v35  ;;  %5324 = vmatmul.msk.bf16.gmra.mxu2 %vm2124_vm11, %v2113_v16  ;;  %v7306_v15 = vpop.eup %5576  ;;  %v9265_v16 = vld [vmem:[#allocation7_spill] sm:$0xff]  ;;  %v7328_v20 = vpop.f32.mrf.mxu0  ;;  %vm1862_vm15 = vcmp.eq.f32.partialorder %v1861_v43, 8.507059e+37 }
 0x205   : > { %v5579_v3 = vpop.eup %5578  ;;  %9268 = vst [vmem:[#allocation7_spill] sm:$0xff] %v7328_v20  ;;  %vm1873_vm3 = vweird.f32 %v7306_v15 }
 0x206   : > { %v7287_v39 = vpack.c.b16 %v2866_v6, %v2865_v17  ;;  %v7318_v35 = vpop.eup %5580  ;;  %v1856_v17 = vadd.f32 %v7259_v26, %v1855_v52  ;;  %v1868_v52 = vmul.f32 %v7306_v15, %v7271_v21  ;;  %v7353_v63 = vadd.f32 1.0, %v5579_v3  ;;  %v767_v11 = vpop.f32.mrf.mxu2  ;;  %v9274_v6 = vld [vmem:[#allocation36_spill] sm:$0xff]  ;;  %vm7406_vm4 = vmor %vm1872_vm2, %vm1873_vm3 }
 0x207   : > { %v1487_v20 = vadd.f32 %v7127_v4, %v9274_v6  ;;  %v2755_v3 = vsel %vm2446_vm1, %v7152_v46, 0  ;;  %v7371_v48 = vpop.f32.mrf.mxu1  ;;  %v1112_v6 = vadd.f32 -0.4472136, %v1048_v62  ;;  %vm1888_vm6 = vweird.f32 %v7318_v35 }
 0x208   : > { %9263 = vst [vmem:[#allocation34_spill] sm:$0xff] %v7287_v39  ;;  %2877 = vrot.lane.b32.xlu2 %v7287_v39, %s5904_s29  ;;  %v1860_v53 = vsel %vm7337_vm14, %v7259_v26, %v1856_v17  ;;  %v1488_v26 = vadd.f32 %v7127_v4, %v6702_v5  ;;  %v1869_v1 = vsub.f32 1.0, %v1868_v52  ;;  %v1110_v5 = vadd.f32 -0.4472136, %v1046_v54  ;;  %vm7420_vm8 = vmor %vm1887_vm5, %vm1888_vm6 }
 0x209   : > { %v1865_v28 = vsel %vm1862_vm15, %v1864_v45, %v1860_v53  ;;  %v5306_v61 = vmul.f32 -1.442695, %v1487_v20  ;;  %9276 = vst [vmem:[#allocation36_spill] sm:$0xff] %v7371_v48  ;;  %5584 = vrcp.f32 %v7353_v63  ;;  %v922_v53 = vmax.f32 %v7289_v38, 0.0 }
 0x20a   : > { %v5307_v55 = vmul.f32 -1.442695, %v1488_v26  ;;  %v924_v52 = vmax.f32 %v767_v11, 0.0  ;;  %v1150_v54 = vpack.c.bf16 %v1112_v6, %v1110_v5  ;;  %v1870_v62 = vmul.f32 %v7306_v15, %v1869_v1  ;;  %v9280_v1 = vld [vmem:[#allocation17_spill] sm:$0xff] }
 0x20b   : > { %v7297_v40 = vpop.permute.xlu1 %2735  ;;  %v7301_v27 = vpop.permute.xlu0 %2660  ;;  %v1878_v11 = vand.u32 2147483648, %v7271_v21  ;;  %v986_v26 = vmul.f32 %v922_v53, %v922_v53  ;;  %vm1902_vm10 = vweird.f32 %v7353_v63 }
 0x20c   : > { %v2758_v14 = vsel %vm2446_vm1, %v7297_v40, 0  ;;  %5344 = vmatmul.msk.bf16.gmra.mxu3 %vm2446_vm1, %v9265_v16  ;;  %v2682_v49 = vsel %vm2446_vm1, %v7301_v27, 0  ;;  %v5583_v16 = vpop.eup %5582 }
 0x20d   : > { %2768 = vmatpush.bf16.xpose.msra.mxu0 %v2758_v14  ;;  %1437 = vmatmul.bf16.gmra.mxu1 %v1148_v7  ;;  %v7344_v14 = vpop.f32.mrf.mxu3  ;;  %v2114_v7 = vpack.c.bf16 %v1865_v28, %v1850_v36  ;;  %v1893_v36 = vand.u32 2147483648, %v7279_v8  ;;  %v1879_v6 = vor.u32 1.1754944e-38, %v1878_v11 }
 0x20e   : > { %2696 = vmatpush.bf16.xpose.msrb.mxu3 %v2682_v49  ;;  %v1883_v49 = vmul.f32 %v7318_v35, %v7279_v8  ;;  %v7389_v38 = vpop.f32.mrf.mxu2 }
 0x20f   : > { %v7398_v28 = vpop.eup %5584  ;;  %v7425_v11 = vpop.f32.mrf.mxu1 }
 0x210   : > { %2418 = vrot.lane.b32.xlu2 %v9273_v9, %s5905_s30  ;;  %v7369_v9 = vadd.f32 1.0, %v5583_v16  ;;  %v1884_v32 = vsub.f32 1.0, %v1883_v49  ;;  %v7378_v16 = vpop.f32.mrf.mxu0  ;;  %vm1903_vm12 = vweird.f32 %v7398_v28 }
 0x211   : > { %vm7494_vm13 = vmor %vm1902_vm10, %vm1903_vm12 }
 0x212   : > { %5586 = vrcp.f32 %v7369_v9  ;;  %v1885_v49 = vmul.f32 %v7318_v35, %v1884_v32  ;;  %v988_v32 = vmul.f32 %v924_v52, %v924_v52  ;;  %vm1917_vm14 = vweird.f32 %v7369_v9 }
 0x213   : > { %v7357_v39 = vpop.permute.xlu1 %2658  ;;  %v7363_v17 = vpop.permute.xlu0 %2806  ;;  %5588 = vpow2.f32 %v5306_v61 }
 0x214   : > { %9275 = vst [vmem:[#allocation21_spill] sm:$0xff] %v7357_v39  ;;  %v2679_v43 = vsel %vm2446_vm1, %v7357_v39, 0  ;;  %v9277_v39 = vld [vmem:[#allocation22_spill] sm:$0xff]  ;;  %5325 = vmatmul.msk.bf16.gmra.mxu2 %vm2124_vm11, %v2114_v7  ;;  %5590 = vpow2.f32 %v5307_v55  ;;  %v1871_v55 = vadd.f32 %v7306_v15, %v1870_v62  ;;  %v1876_v7 = vand.u32 2147483647, %v7271_v21 }
 0x215   : > { %2769 = vmatpush.bf16.xpose.msra.mxu0 %v2755_v3  ;;  %9278 = vst [vmem:[#allocation22_spill] sm:$0xff] %v7378_v16  ;;  %v7381_v20 = vpop.f32.mrf.mxu3  ;;  %v1886_v53 = vadd.f32 %v7318_v35, %v1885_v49  ;;  %v1891_v62 = vand.u32 2147483647, %v7279_v8  ;;  %v1489_v8 = vadd.f32 %v7127_v4, %v6741_v31 }
 0x216   : > { %2697 = vmatpush.bf16.xpose.msrb.mxu3 %v2679_v43  ;;  %v9279_v43 = vld [vmem:[#allocation5_spill] sm:$0xff]  ;;  %v1875_v52 = vsel %vm7406_vm4, %v7306_v15, %v1871_v55  ;;  %vm7416_vm7 = vcmp.eq.f32.partialorder %v1876_v7, 8.507059e+37  ;;  %v1052_v7 = vmul.f32 0.8944272, %v988_v32  ;;  %v2831_v32 = vsel %vm2446_vm1, %v7070_v56, 0  ;;  %v772_v21 = vpop.f32.mrf.mxu2 }
 0x217   : > { %9287 = vst [vmem:[#allocation5_spill] sm:$0xff] %v7425_v11  ;;  %v1890_v15 = vsel %vm7420_vm8, %v7318_v35, %v1886_v53  ;;  %vm1892_vm9 = vcmp.eq.f32.partialorder %v1891_v62, 8.507059e+37  ;;  %v1490_v53 = vadd.f32 %v7127_v4, %v6802_v30  ;;  %v9290_v11 = vld [vmem:[#allocation14_spill] sm:$0xff] }
 0x218   : > { %2420 = vrot.lane.b32.xlu2 %v9277_v39, %s5905_s30  ;;  %v2752_v39 = vsel %vm2446_vm1, %v7105_v0, 0  ;;  %v7404_v61 = vpop.eup %5586 }
 0x219   : > { %v5589_v49 = vpop.eup %5588  ;;  %v1913_v55 = vmul.f32 %v7404_v61, %v7369_v9  ;;  %vm1918_vm2 = vweird.f32 %v7404_v61 }
 0x21a   : > { %v7441_v35 = vadd.f32 1.0, %v5589_v49  ;;  %vm1919_vm3 = vmor %vm1917_vm14, %vm1918_vm2 }
 0x21b   : > { %v7385_v45 = vpop.permute.xlu0 %2810 }
 0x21c   : > { %v2834_v3 = vsel %vm2446_vm1, %v7385_v45, 0  ;;  %5345 = vmatmul.msk.bf16.gmra.mxu3 %vm2446_vm1, %v9279_v43  ;;  %v1898_v43 = vmul.f32 %v7398_v28, %v7353_v63  ;;  %5592 = vrcp.f32 %v7441_v35  ;;  %vm1932_vm5 = vweird.f32 %v7441_v35 }
 0x21d   : > { %2770 = vmatpush.bf16.xpose.msra.mxu0 %v2752_v39  ;;  %2840 = vmatpush.bf16.xpose.msrb.mxu1 %v2834_v3  ;;  %v1894_v39 = vor.u32 1.1754944e-38, %v1893_v36  ;;  %v5591_v3 = vpop.eup %5590  ;;  %v9288_v36 = vld [vmem:[#allocation19_spill] sm:$0xff] }
 0x21e   : > { %1442 = vmatmul.bf16.gmra.mxu1 %v1150_v54  ;;  %v7445_v54 = vpop.f32.mrf.mxu0  ;;  %v7451_v31 = vadd.f32 1.0, %v5591_v3  ;;  %v1899_v62 = vsub.f32 1.0, %v1898_v43  ;;  %v2411_v3 = vpop.permute.xlu1 %2410 }
 0x21f   : > { %v1895_v5 = vsel %vm1892_vm9, %v1894_v39, %v1890_v15  ;;  %9289 = vst [vmem:[#allocation17_spill] sm:$0xff] %v7445_v54  ;;  %v1914_v39 = vsub.f32 1.0, %v1913_v55  ;;  %v1116_v15 = vadd.f32 -0.4472136, %v1052_v7  ;;  %v7465_v43 = vpop.f32.mrf.mxu1 }
 0x220   : > { %2414 = vrot.lane.b32.xlu2 %v6690_v13, %s5905_s30  ;;  %v1880_v13 = vsel %vm7416_vm7, %v1879_v6, %v1875_v52  ;;  %v5308_v6 = vmul.f32 -1.442695, %v1489_v8  ;;  %v9291_v52 = vld [vmem:[#allocation9_spill] sm:$0xff]  ;;  %5594 = vrcp.f32 %v7451_v31  ;;  %v9292_v8 = vld [vmem:[#allocation11_spill] sm:$0xff]  ;;  %9293 = vst [vmem:[#allocation19_spill] sm:$0xff] %v7465_v43  ;;  %v1900_v7 = vmul.f32 %v7398_v28, %v1899_v62 }
 0x221   : > { %v2115_v30 = vpack.c.bf16 %v1895_v5, %v1880_v13  ;;  %v1915_v13 = vmul.f32 %v7404_v61, %v1914_v39  ;;  %v2938_v5 = vunpack.c.l.b16 %v2411_v3  ;;  %v1906_v62 = vand.u32 2147483647, %v7353_v63 }
 0x222   : > { %5596 = vpow2.f32 %v5308_v6  ;;  %v1923_v6 = vand.u32 2147483648, %v7369_v9  ;;  %vm1947_vm8 = vweird.f32 %v7451_v31 }
 0x223   : > { %v7447_v16 = vpop.permute.xlu0 %2424  ;;  %v1916_v39 = vadd.f32 %v7404_v61, %v1915_v13  ;;  %vm1907_vm15 = vcmp.eq.f32.partialorder %v1906_v62, 8.507059e+37  ;;  %v9297_v62 = vld [vmem:[#allocation25_spill] sm:$0xff] }
 0x224   : > { %5350 = vmatmul.msk.bf16.vlgmr.msra.gmra.mxu0 %vm2446_vm1, %v9290_v11  ;;  %v5309_v11 = vmul.f32 -1.442695, %v1490_v53  ;;  %5326 = vmatmul.msk.bf16.gmra.mxu2 %vm2124_vm11, %v2115_v30  ;;  %v2828_v53 = vsel %vm2446_vm1, %v7363_v17, 0 }
 0x225   : > { %3691 = vmatpush.bf16.msrb.mxu0 %v9280_v1  ;;  %v1050_v1 = vmul.f32 0.8944272, %v986_v26  ;;  %v7453_v26 = vpop.f32.mrf.mxu3  ;;  %2841 = vmatpush.bf16.xpose.msrb.mxu1 %v2831_v32 }
 0x226   : > { %5598 = vpow2.f32 %v5309_v11 }
 0x227   : > { %v1114_v49 = vadd.f32 -0.4472136, %v1050_v1  ;;  %v928_v1 = vmax.f32 %v772_v21, 0.0  ;;  %v7480_v21 = vpop.f32.mrf.mxu0 }
 0x228   : > { %2416 = vrot.lane.b32.xlu2 %v6694_v25, %s5905_s30  ;;  %9294 = vst [vmem:[#allocation14_spill] sm:$0xff] %v7480_v21 }
 0x229   : > { %3692 = vmatpush.bf16.msrb.mxu0 %v9288_v36  ;;  %v926_v36 = vmax.f32 %v7389_v38, 0.0  ;;  %v1152_v55 = vpack.c.bf16 %v1116_v15, %v1114_v49  ;;  %v1908_v38 = vand.u32 2147483648, %v7353_v63  ;;  %v992_v11 = vmul.f32 %v928_v1, %v928_v1 }
 0x22b   : > { %v2413_v25 = vpop.permute.xlu0 %2412  ;;  %v990_v30 = vmul.f32 %v926_v36, %v926_v36 }
 0x22c   : > { %v2939_v32 = vunpack.c.l.b16 %v2413_v25  ;;  %5346 = vmatmul.msk.bf16.vlgmr.msrb.gmra.mxu3 %vm2446_vm1, %v6551_v59  ;;  %v1920_v25 = vsel %vm1919_vm3, %v7404_v61, %v1916_v39  ;;  %v2825_v61 = vsel %vm2446_vm1, %v7231_v19, 0 }
 0x22d   : > { %3693 = vmatpush.bf16.msrb.mxu0 %v9291_v52  ;;  %v7478_v52 = vpop.eup %5592  ;;  %2842 = vmatpush.bf16.xpose.msrb.mxu1 %v2828_v53  ;;  %v7487_v59 = vpop.f32.mrf.mxu3  ;;  %v1054_v53 = vmul.f32 0.8944272, %v990_v30 }
 0x22e   : > { %v7485_v49 = vpop.eup %5594  ;;  %v7489_v15 = vpack.c.b16 %v2939_v32, %v2938_v5  ;;  %1447 = vmatmul.bf16.gmra.mxu1 %v1152_v55  ;;  %v1928_v63 = vmul.f32 %v7478_v52, %v7441_v35  ;;  %v1924_v55 = vor.u32 1.1754944e-38, %v1923_v6  ;;  %v1492_v6 = vadd.f32 %v7127_v4, %v6892_v23 }
 0x22f   : > { %v5597_v36 = vpop.eup %5596  ;;  %v1943_v5 = vmul.f32 %v7485_v49, %v7451_v31  ;;  %vm1933_vm6 = vweird.f32 %v7478_v52  ;;  %vm1948_vm9 = vweird.f32 %v7485_v49 }
 0x230   : > { %2950 = vrot.lane.b32.xlu1 %v7489_v15, %s5904_s29  ;;  %v5599_v1 = vpop.eup %5598  ;;  %v1929_v39 = vsub.f32 1.0, %v1928_v63  ;;  %v5311_v23 = vmul.f32 -1.442695, %v1492_v6  ;;  %vm7551_vm7 = vmor %vm1932_vm5, %vm1933_vm6 }
 0x231   : > { %3694 = vmatpush.bf16.msrb.mxu0 %v9292_v8  ;;  %v1909_v8 = vor.u32 1.1754944e-38, %v1908_v38  ;;  %v7522_v3 = vadd.f32 1.0, %v5599_v1  ;;  %vm7562_vm10 = vmor %vm1947_vm8, %vm1948_vm9 }
 0x233   : > { %vm1977_vm3 = vweird.f32 %v7522_v3 }
 0x234   : > { %5351 = vmatmul.msk.bf16.gmra.mxu0 %vm2446_vm1, %v9297_v62 }
 0x235   : > { %3951 = vmatpush.bf16.msra.mxu0 %v7162_v47  ;;  %v1901_v47 = vadd.f32 %v7398_v28, %v1900_v7  ;;  %v7499_v7 = vpop.f32.mrf.mxu2  ;;  %2843 = vmatpush.bf16.xpose.msrb.mxu1 %v2825_v61 }
 0x236   : > { %v930_v1 = vmax.f32 %v7499_v7, 0.0 }
 0x237   : > { %v1905_v13 = vsel %vm7494_vm13, %v7398_v28, %v1901_v47  ;;  %v1491_v28 = vadd.f32 %v7127_v4, %v6854_v29  ;;  %v7516_v47 = vadd.f32 1.0, %v5597_v36  ;;  %v7524_v29 = vpop.f32.mrf.mxu1 }
 0x238   : > { %v1910_v38 = vsel %vm1907_vm15, %v1909_v8, %v1905_v13  ;;  %9298 = vst [vmem:[#allocation9_spill] sm:$0xff] %v7524_v29  ;;  %v1118_v8 = vadd.f32 -0.4472136, %v1054_v53  ;;  %v9299_v13 = vld [vmem:[#allocation33_spill] sm:$0xff] }
 0x239   : > { %3952 = vmatpush.bf16.msra.mxu0 %v7297_v40  ;;  %v1921_v40 = vand.u32 2147483647, %v7369_v9  ;;  %v1056_v9 = vmul.f32 0.8944272, %v992_v11  ;;  %v5310_v30 = vmul.f32 -1.442695, %v1491_v28  ;;  %5600 = vrcp.f32 %v7516_v47 }
 0x23a   : > { %v1944_v11 = vsub.f32 1.0, %v1943_v5  ;;  %5602 = vrcp.f32 %v7522_v3  ;;  %v9301_v5 = vld [vmem:[#allocation16_spill] sm:$0xff]  ;;  %vm1962_vm14 = vweird.f32 %v7516_v47 }
 0x23b   : > { %vm1922_vm4 = vcmp.eq.f32.partialorder %v1921_v40, 8.507059e+37  ;;  %v1120_v36 = vadd.f32 -0.4472136, %v1056_v9  ;;  %v7531_v40 = vpop.f32.mrf.mxu0  ;;  %5604 = vpow2.f32 %v5310_v30  ;;  %v1938_v9 = vand.u32 2147483648, %v7441_v35 }
 0x23c   : > { %v1925_v32 = vsel %vm1922_vm4, %v1924_v55, %v1920_v25  ;;  %9300 = vst [vmem:[#allocation11_spill] sm:$0xff] %v7531_v40  ;;  %v7534_v55 = vpop.f32.mrf.mxu3  ;;  %v1945_v53 = vmul.f32 %v7485_v49, %v1944_v11  ;;  %5606 = vpow2.f32 %v5311_v23  ;;  %5347 = vmatmul.msk.bf16.gmra.mxu3 %vm2446_vm1, %v6779_v37 }
 0x23d   : > { %3953 = vmatpush.bf16.msra.mxu0 %v7152_v46  ;;  %v2116_v46 = vpack.c.bf16 %v1925_v32, %v1910_v38  ;;  %3756 = vmatpush.bf16.msra.mxu1 %v9299_v13  ;;  %v777_v63 = vpop.f32.mrf.mxu2  ;;  %v1154_v28 = vpack.c.bf16 %v1120_v36, %v1118_v8  ;;  %v1953_v38 = vand.u32 2147483648, %v7451_v31  ;;  %v1936_v32 = vand.u32 2147483647, %v7441_v35 }
 0x23e   : > { %v932_v25 = vmax.f32 %v777_v63, 0.0  ;;  %v1946_v61 = vadd.f32 %v7485_v49, %v1945_v53  ;;  %v1939_v35 = vor.u32 1.1754944e-38, %v1938_v9  ;;  %v1951_v8 = vand.u32 2147483647, %v7451_v31 }
 0x23f   : > { %5327 = vmatmul.msk.bf16.gmra.mxu2 %vm2124_vm11, %v2116_v46  ;;  %v7549_v6 = vpop.eup %5600  ;;  %v7560_v30 = vpop.f32.mrf.mxu1  ;;  %v994_v46 = vmul.f32 %v930_v1, %v930_v1  ;;  %1452 = vmatmul.bf16.gmra.mxu1 %v1154_v28  ;;  %vm1937_vm12 = vcmp.eq.f32.partialorder %v1936_v32, 8.507059e+37  ;;  %v1954_v1 = vor.u32 1.1754944e-38, %v1953_v38  ;;  %v1494_v9 = vadd.f32 %v7127_v4, %v6973_v18 }
 0x240   : > { %v7558_v37 = vpop.eup %5602  ;;  %9304 = vst [vmem:[#allocation25_spill] sm:$0xff] %v7560_v30  ;;  %v1950_v23 = vsel %vm7562_vm10, %v7485_v49, %v1946_v61  ;;  %vm1952_vm13 = vcmp.eq.f32.partialorder %v1951_v8, 8.507059e+37  ;;  %vm1963_vm15 = vweird.f32 %v7549_v6 }
 0x241   : > { %3954 = vmatpush.bf16.msra.mxu0 %v7105_v0  ;;  %3757 = vmatpush.bf16.msra.mxu1 %v9301_v5  ;;  %v1930_v0 = vmul.f32 %v7478_v52, %v1929_v39  ;;  %v996_v39 = vmul.f32 %v932_v25, %v932_v25  ;;  %v5605_v36 = vpop.eup %5604  ;;  %v1958_v5 = vmul.f32 %v7549_v6, %v7516_v47  ;;  %v1058_v25 = vmul.f32 0.8944272, %v994_v46  ;;  %vm7612_vm2 = vmor %vm1962_vm14, %vm1963_vm15 }
 0x242   : > { %v5607_v63 = vpop.eup %5606  ;;  %v1973_v31 = vmul.f32 %v7558_v37, %v7522_v3  ;;  %v1955_v49 = vsel %vm1952_vm13, %v1954_v1, %v1950_v23  ;;  %v7589_v38 = vadd.f32 1.0, %v5605_v36  ;;  %v1968_v36 = vand.u32 2147483648, %v7516_v47  ;;  %v9310_v1 = vld [vmem:[#allocation26_spill] sm:$0xff] }
 0x243   : > { %v1931_v7 = vadd.f32 %v7478_v52, %v1930_v0  ;;  %v7580_v28 = vpop.f32.mrf.mxu0  ;;  %v1060_v0 = vmul.f32 0.8944272, %v996_v39  ;;  %v7591_v32 = vadd.f32 1.0, %v5607_v63  ;;  %v1122_v46 = vadd.f32 -0.4472136, %v1058_v25 }
 0x244   : > { %9307 = vst [vmem:[#allocation33_spill] sm:$0xff] %v7580_v28  ;;  %5352 = vmatmul.msk.bf16.gmra.mxu0 %vm2446_vm1, %v6766_v44  ;;  %5608 = vrcp.f32 %v7589_v38  ;;  %vm1978_vm4 = vweird.f32 %v7558_v37  ;;  %vm1992_vm8 = vweird.f32 %v7589_v38 }
 0x245   : > { %3758 = vmatpush.bf16.msra.mxu1 %v6612_v2  ;;  %v1935_v13 = vsel %vm7551_vm7, %v7478_v52, %v1931_v7  ;;  %v1493_v2 = vadd.f32 %v7127_v4, %v6931_v60  ;;  %v7582_v52 = vpop.f32.mrf.mxu3  ;;  %v1959_v7 = vsub.f32 1.0, %v1958_v5  ;;  %v1974_v60 = vsub.f32 1.0, %v1973_v31  ;;  %vm7621_vm5 = vmor %vm1977_vm3, %vm1978_vm4 }
 0x246   : > { %v1940_v53 = vsel %vm1937_vm12, %v1939_v35, %v1935_v13  ;;  %v1124_v39 = vadd.f32 -0.4472136, %v1060_v0  ;;  %v5313_v35 = vmul.f32 -1.442695, %v1494_v9  ;;  %5610 = vrcp.f32 %v7591_v32 }
 0x247   : > { %v2117_v62 = vpack.c.bf16 %v1955_v49, %v1940_v53  ;;  %v5312_v61 = vmul.f32 -1.442695, %v1493_v2  ;;  %v7594_v11 = vpop.f32.mrf.mxu1  ;;  %v1960_v44 = vmul.f32 %v7549_v6, %v1959_v7  ;;  %v1975_v18 = vmul.f32 %v7558_v37, %v1974_v60 }
 0x248   : > { %9308 = vst [vmem:[#allocation16_spill] sm:$0xff] %v7594_v11  ;;  %v1983_v13 = vand.u32 2147483648, %v7522_v3  ;;  %v1966_v5 = vand.u32 2147483647, %v7516_v47  ;;  %v1969_v0 = vor.u32 1.1754944e-38, %v1968_v36  ;;  %vm2007_vm12 = vweird.f32 %v7591_v32  ;;  %v9369_v11 = vld [vmem:[#allocation12_spill] sm:$0xff] }
 0x249   : > { %3759 = vmatpush.bf16.msra.mxu1 %v6499_v34  ;;  %5612 = vpow2.f32 %v5312_v61  ;;  %v1156_v34 = vpack.c.bf16 %v1124_v39, %v1122_v46  ;;  %v1961_v63 = vadd.f32 %v7549_v6, %v1960_v44  ;;  %v1976_v2 = vadd.f32 %v7558_v37, %v1975_v18  ;;  %v9316_v44 = vld [vmem:[#allocation41_spill] sm:$0xff]  ;;  %v7646_v18 = vpop.f32.mrf.mxu2 }
 0x24a   : > { %5614 = vpow2.f32 %v5313_v35  ;;  %v7619_v25 = vpop.eup %5608  ;;  %v1981_v47 = vand.u32 2147483647, %v7522_v3  ;;  %vm1967_vm6 = vcmp.eq.f32.partialorder %v1966_v5, 8.507059e+37  ;;  %v1984_v60 = vor.u32 1.1754944e-38, %v1983_v13 }
 0x24b   : > { %v7600_v8 = vpop.f32.mrf.mxu0  ;;  %v1965_v9 = vsel %vm7612_vm2, %v7549_v6, %v1961_v63  ;;  %v1980_v7 = vsel %vm7621_vm5, %v7558_v37, %v1976_v2  ;;  %v1988_v46 = vmul.f32 %v7619_v25, %v7589_v38  ;;  %v1495_v39 = vadd.f32 %v7127_v4, %v7002_v41 }
 0x24c   : > { %9309 = vst [vmem:[#allocation49_spill] sm:$0xff] %v7600_v8  ;;  %5348 = vmatmul.msk.bf16.gmra.mxu3 %vm2446_vm1, %v9310_v1  ;;  %v7626_v49 = vpop.eup %5610  ;;  %vm1982_vm7 = vcmp.eq.f32.partialorder %v1981_v47, 8.507059e+37  ;;  %v1970_v6 = vsel %vm1967_vm6, %v1969_v0, %v1965_v9  ;;  %v1496_v37 = vadd.f32 %v7127_v4, %v7057_v42  ;;  %v3014_v42 = vsel %vm464_vm0, %v7239_v50, -inf }
 0x24d   : > { %v7604_v23 = vpop.f32.mrf.mxu3  ;;  %v2003_v3 = vmul.f32 %v7626_v49, %v7591_v32  ;;  %v1989_v41 = vsub.f32 1.0, %v1988_v46  ;;  %v5314_v31 = vmul.f32 -1.442695, %v1495_v39  ;;  %v1998_v47 = vand.u32 2147483648, %v7589_v38 }
 0x24e   : > { %v5315_v0 = vmul.f32 -1.442695, %v1496_v37  ;;  %v2013_v9 = vand.u32 2147483648, %v7591_v32  ;;  %vm1993_vm9 = vweird.f32 %v7619_v25  ;;  %vm2008_vm13 = vweird.f32 %v7626_v49 }
 0x24f   : > { %5328 = vmatmul.msk.bf16.gmra.mxu2 %vm2124_vm11, %v2117_v62  ;;  %1457 = vmatmul.bf16.gmra.mxu1 %v1156_v34  ;;  %v5613_v62 = vpop.eup %5612  ;;  %v7640_v35 = vpop.f32.mrf.mxu1  ;;  %v1985_v34 = vsel %vm1982_vm7, %v1984_v60, %v1980_v7  ;;  %v2004_v5 = vsub.f32 1.0, %v2003_v3  ;;  %v1990_v4 = vmul.f32 %v7619_v25, %v1989_v41  ;;  %v9319_v60 = vld [vmem:[#allocation10_spill] sm:$0xff]  ;;  %vm7675_vm10 = vmor %vm1992_vm8, %vm1993_vm9  ;;  %v1999_v37 = vor.u32 1.1754944e-38, %v1998_v47 }
 0x250   : > { %v5615_v61 = vpop.eup %5614  ;;  %9315 = vst [vmem:[#allocation26_spill] sm:$0xff] %v7640_v35  ;;  %v7648_v36 = vadd.f32 1.0, %v5613_v62  ;;  %v2118_v63 = vpack.c.bf16 %v1985_v34, %v1970_v6  ;;  %v9323_v34 = vld [vmem:[#allocation39_spill] sm:$0xff]  ;;  %vm7686_vm14 = vmor %vm2007_vm12, %vm2008_vm13  ;;  %v5895_v47 = vld [vmem:[%s9110_s2] ss:$0 sm:$0xff] }
 0x251   : > { %v7650_v13 = vadd.f32 1.0, %v5615_v61  ;;  %v2005_v53 = vmul.f32 %v7626_v49, %v2004_v5  ;;  %v1991_v62 = vadd.f32 %v7619_v25, %v1990_v4  ;;  %v1996_v61 = vand.u32 2147483647, %v7589_v38  ;;  %v7673_v46 = vpop.f32.mrf.mxu2 }
 0x252   : > { %5616 = vrcp.f32 %v7648_v36  ;;  %9320 = vst [vmem:[#allocation10_spill] sm:$0xff] %v7673_v46  ;;  %vm2022_vm3 = vweird.f32 %v7648_v36 }
 0x253   : > { %v7652_v1 = vpop.f32.mrf.mxu0  ;;  %5618 = vrcp.f32 %v7650_v13  ;;  %v2006_v39 = vadd.f32 %v7626_v49, %v2005_v53  ;;  %v1995_v5 = vsel %vm7675_vm10, %v7619_v25, %v1991_v62  ;;  %vm1997_vm15 = vcmp.eq.f32.partialorder %v1996_v61, 8.507059e+37 }
 0x254   : > { %5353 = vmatmul.msk.bf16.gmra.mxu0 %vm2446_vm1, %v9316_v44  ;;  %9317 = vst [vmem:[#allocation41_spill] sm:$0xff] %v7652_v1  ;;  %5620 = vpow2.f32 %v5314_v31  ;;  %v2011_v44 = vand.u32 2147483647, %v7591_v32  ;;  %v1498_v61 = vadd.f32 %v5895_v47, %v7154_v22  ;;  %v3032_v22 = vsel %vm464_vm0, %v7534_v55, -inf }
 0x255   : > { %v7654_v2 = vpop.f32.mrf.mxu3  ;;  %5622 = vpow2.f32 %v5315_v0  ;;  %v2010_v31 = vsel %vm7686_vm14, %v7626_v49, %v2006_v39  ;;  %v2014_v0 = vor.u32 1.1754944e-38, %v2013_v9  ;;  %v1497_v49 = vadd.f32 %v5895_v47, %v7094_v10 }
 0x256   : > { %vm2012_vm2 = vcmp.eq.f32.partialorder %v2011_v44, 8.507059e+37  ;;  %v5317_v10 = vmul.f32 -1.442695, %v1498_v61  ;;  %vm2037_vm6 = vweird.f32 %v7650_v13 }
 0x257   : > { %v7665_v7 = vpop.f32.mrf.mxu1  ;;  %v2015_v62 = vsel %vm2012_vm2, %v2014_v0, %v2010_v31  ;;  %v2028_v0 = vand.u32 2147483648, %v7648_v36 }
 0x258   : > { %9318 = vst [vmem:[#allocation50_spill] sm:$0xff] %v7665_v7  ;;  %v7682_v6 = vpop.eup %5616 }
 0x259   : > { %v2018_v53 = vmul.f32 %v7682_v6, %v7648_v36  ;;  %vm2023_vm4 = vweird.f32 %v7682_v6  ;;  %v2029_v47 = vor.u32 1.1754944e-38, %v2028_v0 }
 0x25a   : > { %3015 = vmax.xlane.f32.xlu1 %v3014_v42  ;;  %vm7745_vm5 = vmor %vm2022_vm3, %vm2023_vm4 }
 0x25b   : > { %v7693_v41 = vpop.f32.mrf.mxu0  ;;  %v2019_v38 = vsub.f32 1.0, %v2018_v53 }
 0x25c   : > { %5349 = vmatmul.msk.bf16.gmra.mxu3 %vm2446_vm1, %v9319_v60  ;;  %9326 = vst [vmem:[#allocation39_spill] sm:$0xff] %v7693_v41  ;;  %v2000_v60 = vsel %vm1997_vm15, %v1999_v37, %v1995_v5  ;;  %v5316_v41 = vmul.f32 -1.442695, %v1497_v49 }
 0x25d   : > { %v7702_v4 = vpop.f32.mrf.mxu3 }
 0x25f   : > { %5329 = vmatmul.msk.bf16.gmra.mxu2 %vm2124_vm11, %v2118_v63  ;;  %5354 = vmatmul.msk.bf16.vlgmr.msrb.gmra.mxu1 %vm2446_vm1, %v9323_v34  ;;  %v7691_v63 = vpop.eup %5618  ;;  %v2119_v34 = vpack.c.bf16 %v2015_v62, %v2000_v60  ;;  %v7722_v1 = vpop.f32.mrf.mxu1 }
 0x260   : > { %4016 = vmatpush.bf16.msrb.mxu1 %v7385_v45  ;;  %v5621_v42 = vpop.eup %5620  ;;  %v3023_v45 = vsel %vm464_vm0, %v7381_v20, -inf  ;;  %v2033_v25 = vmul.f32 %v7691_v63, %v7650_v13  ;;  %9327 = vst [vmem:[#allocation51_spill] sm:$0xff] %v7722_v1  ;;  %vm2038_vm7 = vweird.f32 %v7691_v63 }
 0x261   : > { %v5623_v32 = vpop.eup %5622  ;;  %v7718_v3 = vadd.f32 1.0, %v5621_v42  ;;  %v2043_v42 = vand.u32 2147483648, %v7650_v13  ;;  %vm7756_vm8 = vmor %vm2037_vm6, %vm2038_vm7 }
 0x262   : > { %v7714_v9 = vpop.permute.xlu2 %2877  ;;  %3024 = vmax.xlane.f32.xlu1 %v3023_v45  ;;  %v7720_v39 = vadd.f32 1.0, %v5623_v32  ;;  %v2034_v44 = vsub.f32 1.0, %v2033_v25  ;;  %v7725_v45 = vpop.f32.mrf.mxu2 }
 0x263   : > { %5624 = vrcp.f32 %v7718_v3  ;;  %vm2052_vm12 = vweird.f32 %v7718_v3 }
 0x264   : > { %4017 = vmatpush.bf16.msrb.mxu1 %v7070_v56  ;;  %5626 = vrcp.f32 %v7720_v39  ;;  %v7729_v56 = vpop.f32.mrf.mxu0  ;;  %v2035_v31 = vmul.f32 %v7691_v63, %v2034_v44  ;;  %vm2067_vm15 = vweird.f32 %v7720_v39 }
 0x265   : > { %9328 = vst [vmem:[#allocation52_spill] sm:$0xff] %v7729_v56  ;;  %5628 = vpow2.f32 %v5316_v41  ;;  %v7734_v37 = vpop.f32.mrf.mxu3  ;;  %v2026_v41 = vand.u32 2147483647, %v7648_v36  ;;  %v2041_v36 = vand.u32 2147483647, %v7650_v13  ;;  %v3038_v13 = vsel %vm464_vm0, %v7604_v23, -inf }
 0x266   : > { %5630 = vpow2.f32 %v5317_v10  ;;  %v2036_v25 = vadd.f32 %v7691_v63, %v2035_v31 }
 0x267   : > { %vm2027_vm9 = vcmp.eq.f32.partialorder %v2026_v41, 8.507059e+37  ;;  %vm2042_vm10 = vcmp.eq.f32.partialorder %v2041_v36, 8.507059e+37 }
 0x268   : > { %4018 = vmatpush.bf16.msrb.mxu1 %v7363_v17  ;;  %v2020_v17 = vmul.f32 %v7682_v6, %v2019_v38  ;;  %v2040_v61 = vsel %vm7756_vm8, %v7691_v63, %v2036_v25  ;;  %v7769_v38 = vpop.f32.mrf.mxu1 }
 0x269   : > { %9333 = vst [vmem:[#allocation53_spill] sm:$0xff] %v7769_v38 }
 0x26a   : > { %v2419_v5 = vpop.permute.xlu2 %2418  ;;  %3033 = vmax.xlane.f32.xlu1 %v3032_v22  ;;  %v2021_v32 = vadd.f32 %v7682_v6, %v2020_v17  ;;  %v7773_v10 = vpop.f32.mrf.mxu2 }
 0x26c   : > { %4019 = vmatpush.bf16.msrb.mxu1 %v7231_v19  ;;  %v7752_v19 = vpop.eup %5624  ;;  %v2025_v62 = vsel %vm7745_vm5, %v7682_v6, %v2021_v32  ;;  %v7779_v0 = vpop.f32.mrf.mxu0 }
 0x26d   : > { %v7761_v60 = vpop.eup %5626  ;;  %v2048_v22 = vmul.f32 %v7752_v19, %v7718_v3  ;;  %v2030_v63 = vsel %vm2027_vm9, %v2029_v47, %v2025_v62  ;;  %9334 = vst [vmem:[#allocation54_spill] sm:$0xff] %v7779_v0  ;;  %v7783_v53 = vpop.f32.mrf.mxu3  ;;  %vm2053_vm13 = vweird.f32 %v7752_v19 }
 0x26e   : > { %v2063_v6 = vmul.f32 %v7761_v60, %v7720_v39  ;;  %v3050_v47 = vsel %vm464_vm0, %v7783_v53, -inf  ;;  %vm7814_vm14 = vmor %vm2052_vm12, %vm2053_vm13  ;;  %vm2068_vm2 = vweird.f32 %v7761_v60 }
 0x26f   : > { %5330 = vmatmul.msk.bf16.gmra.mxu2 %vm2124_vm11, %v2119_v34  ;;  %5355 = vmatmul.msk.bf16.gmra.mxu1 %vm2446_vm1, %v6837_v57  ;;  %v2044_v34 = vor.u32 1.1754944e-38, %v2043_v42  ;;  %v5629_v57 = vpop.eup %5628  ;;  %v2942_v42 = vunpack.c.l.b16 %v2419_v5  ;;  %v2049_v56 = vsub.f32 1.0, %v2048_v22  ;;  %v2945_v5 = vunpack.c.l.b16 %v7447_v16  ;;  %vm7825_vm3 = vmor %vm2067_vm15, %vm2068_vm2 }
 0x270   : > { %v5631_v44 = vpop.eup %5630  ;;  %v7781_v41 = vadd.f32 1.0, %v5629_v57  ;;  %v2064_v8 = vsub.f32 1.0, %v2063_v6  ;;  %v7797_v62 = vpop.f32.mrf.mxu1  ;;  %v2058_v22 = vand.u32 2147483648, %v7718_v3  ;;  %v2073_v16 = vand.u32 2147483648, %v7720_v39 }
 0x271   : > { %v2045_v31 = vsel %vm2042_vm10, %v2044_v34, %v2040_v61  ;;  %v7785_v25 = vadd.f32 1.0, %v5631_v44  ;;  %9335 = vst [vmem:[#allocation55_spill] sm:$0xff] %v7797_v62  ;;  %v2050_v34 = vmul.f32 %v7752_v19, %v2049_v56  ;;  %v2944_v44 = vunpack.c.l.b16 %v7027_v51 }
 0x272   : > { %v2421_v17 = vpop.permute.xlu2 %2420  ;;  %3039 = vmax.xlane.f32.xlu1 %v3038_v13  ;;  %v2120_v36 = vpack.c.bf16 %v2045_v31, %v2030_v63  ;;  %5632 = vrcp.f32 %v7781_v41  ;;  %v2065_v57 = vmul.f32 %v7761_v60, %v2064_v8  ;;  %v7802_v13 = vpop.f32.mrf.mxu2  ;;  %vm2082_vm6 = vweird.f32 %v7781_v41 }
 0x273   : > { %v2943_v32 = vunpack.c.l.b16 %v2421_v17  ;;  %5634 = vrcp.f32 %v7785_v25  ;;  %9336 = vst [vmem:[#allocation56_spill] sm:$0xff] %v7802_v13  ;;  %v2051_v6 = vadd.f32 %v7752_v19, %v2050_v34  ;;  %v2056_v17 = vand.u32 2147483647, %v7718_v3 }
 0x274   : > { %v7810_v63 = vpack.c.b16 %v2945_v5, %v2944_v44  ;;  %v7812_v56 = vpop.f32.mrf.mxu0  ;;  %v2066_v8 = vadd.f32 %v7761_v60, %v2065_v57  ;;  %v2059_v3 = vor.u32 1.1754944e-38, %v2058_v22  ;;  %v2071_v5 = vand.u32 2147483647, %v7720_v39 }
 0x275   : > { %v7787_v49 = vpack.c.b16 %v2943_v32, %v2942_v42  ;;  %9337 = vst [vmem:[#allocation57_spill] sm:$0xff] %v7812_v56  ;;  %v7821_v42 = vpop.f32.mrf.mxu3  ;;  %v9340_v32 = vld [vmem:[#allocation23_spill] sm:$0xff]  ;;  %v2055_v34 = vsel %vm7814_vm14, %v7752_v19, %v2051_v6  ;;  %vm2057_vm4 = vcmp.eq.f32.partialorder %v2056_v17, 8.507059e+37  ;;  %v2074_v44 = vor.u32 1.1754944e-38, %v2073_v16 }
 0x276   : > { %v2070_v57 = vsel %vm7825_vm3, %v7761_v60, %v2066_v8  ;;  %vm2072_vm5 = vcmp.eq.f32.partialorder %v2071_v5, 8.507059e+37  ;;  %v3053_v22 = vsel %vm464_vm0, %v7821_v42, -inf  ;;  %v2060_v0 = vsel %vm2057_vm4, %v2059_v3, %v2055_v34  ;;  %v9346_v3 = vld [vmem:[#allocation35_spill] sm:$0xff] }
 0x277   : > { %2954 = vrot.lane.b32.xlu2 %v7787_v49, %s5904_s29  ;;  %v2075_v28 = vsel %vm2072_vm5, %v2074_v44, %v2070_v57  ;;  %v2872_v34 = vunpack.c.l.b16 %v9346_v3  ;;  %v2088_v57 = vand.u32 2147483648, %v7781_v41  ;;  %v2103_v44 = vand.u32 2147483648, %v7785_v25 }
 0x278   : > { %v5633_v31 = vpop.eup %5632  ;;  %v7842_v6 = vpop.f32.mrf.mxu1  ;;  %v2121_v16 = vpack.c.bf16 %v2075_v28, %v2060_v0  ;;  %v2086_v0 = vand.u32 2147483647, %v7781_v41  ;;  %vm2097_vm9 = vweird.f32 %v7785_v25 }
 0x279   : > { %v2078_v39 = vmul.f32 %v5633_v31, %v7781_v41  ;;  %9343 = vst [vmem:[#allocation23_spill] sm:$0xff] %v7842_v6  ;;  %vm2083_vm7 = vweird.f32 %v5633_v31 }
 0x27a   : > { %v2415_v61 = vpop.permute.xlu2 %2414  ;;  %3051 = vmax.xlane.f32.xlu1 %v3050_v47  ;;  %v5635_v47 = vpop.eup %5634  ;;  %vm7861_vm8 = vmor %vm2082_vm6, %vm2083_vm7  ;;  %vm2087_vm13 = vcmp.eq.f32.partialorder %v2086_v0, 8.507059e+37 }
 0x27b   : > { %v2940_v51 = vunpack.c.l.b16 %v2415_v61  ;;  %v7846_v60 = vpop.f32.mrf.mxu2  ;;  %v2079_v8 = vsub.f32 1.0, %v2078_v39  ;;  %vm2098_vm10 = vweird.f32 %v5635_v47 }
 0x27c   : > { %9344 = vst [vmem:[#allocation58_spill] sm:$0xff] %v7846_v60  ;;  %v7848_v5 = vpop.f32.mrf.mxu0  ;;  %vm2099_vm12 = vmor %vm2097_vm9, %vm2098_vm10 }
 0x27d   : > { %9345 = vst [vmem:[#allocation59_spill] sm:$0xff] %v7848_v5  ;;  %v2080_v61 = vmul.f32 %v5633_v31, %v2079_v8 }
 0x27f   : > { %5331 = vmatmul.msk.bf16.gmra.mxu2 %vm2124_vm11, %v2120_v36  ;;  %5356 = vmatmul.msk.bf16.gmra.mxu1 %vm2446_vm1, %v9340_v32  ;;  %v2093_v32 = vmul.f32 %v5635_v47, %v7785_v25  ;;  %v2081_v28 = vadd.f32 %v5633_v31, %v2080_v61 }
 0x280   : > { %2956 = vrot.lane.b32.xlu2 %v7810_v63, %s5904_s29 }
 0x281   : > { %v2094_v36 = vsub.f32 1.0, %v2093_v32  ;;  %v2085_v8 = vsel %vm7861_vm8, %v5633_v31, %v2081_v28  ;;  %v3017_v31 = vsel %vm464_vm0, %v7285_v33, -inf  ;;  %v3041_v28 = vsel %vm464_vm0, %v7654_v2, -inf }
 0x282   : > { %v2417_v56 = vpop.permute.xlu2 %2416  ;;  %3054 = vmax.xlane.f32.xlu1 %v3053_v22  ;;  %v2871_v22 = vunpack.c.l.b16 %v7210_v58  ;;  %v3011_v58 = vsel %vm464_vm0, %v7212_v12, -inf }
 0x283   : > { %v2941_v19 = vunpack.c.l.b16 %v2417_v56  ;;  %v2095_v56 = vmul.f32 %v5635_v47, %v2094_v36  ;;  %v7873_v41 = vpop.f32.mrf.mxu2 }
 0x284   : > { %v7859_v39 = vpack.c.b16 %v2872_v34, %v2871_v22  ;;  %9350 = vst [vmem:[#allocation60_spill] sm:$0xff] %v7873_v41  ;;  %v2104_v22 = vor.u32 1.1754944e-38, %v2103_v44  ;;  %v7877_v61 = vpop.f32.mrf.mxu0  ;;  %v3029_v44 = vsel %vm464_vm0, %v7487_v59, -inf }
 0x285   : > { %v7844_v17 = vpack.c.b16 %v2941_v19, %v2940_v51  ;;  %v2096_v32 = vadd.f32 %v5635_v47, %v2095_v56  ;;  %v7866_v51 = vpop.f32.mrf.mxu1  ;;  %v2089_v19 = vor.u32 1.1754944e-38, %v2088_v57  ;;  %9351 = vst [vmem:[#allocation61_spill] sm:$0xff] %v7877_v61 }
 0x286   : > { %9349 = vst [vmem:[#allocation35_spill] sm:$0xff] %v7866_v51 }
 0x287   : > { %2952 = vrot.lane.b32.xlu0 %v7844_v17, %s5904_s29  ;;  %v2100_v36 = vsel %vm2099_vm12, %v5635_v47, %v2096_v32  ;;  %v2090_v56 = vsel %vm2087_vm13, %v2089_v19, %v2085_v8  ;;  %v3044_v19 = vsel %vm464_vm0, %v7702_v4, -inf }
 0x28b   : > { %v7879_v34 = vpop.f32.mrf.mxu2 }
 0x28c   : > { %9352 = vst [vmem:[#allocation62_spill] sm:$0xff] %v7879_v34 }
 0x28f   : > { %5332 = vmatmul.msk.bf16.gmra.mxu2 %vm2124_vm11, %v2121_v16  ;;  %5357 = vmatmul.msk.bf16.gmra.mxu1 %vm2446_vm1, %v6869_v24  ;;  %v2101_v16 = vand.u32 2147483647, %v7785_v25  ;;  %v7882_v25 = vpop.f32.mrf.mxu0 }
 0x290   : > { %2883 = vrot.lane.b32.xlu0 %v7859_v39, %s5904_s29  ;;  %9353 = vst [vmem:[#allocation63_spill] sm:$0xff] %v7882_v25  ;;  %s5906_s29 = smov 32  }
 0x291   : > { %vm2102_vm14 = vcmp.eq.f32.partialorder %v2101_v16, 8.507059e+37  ;;  %v3020_v16 = vsel %vm464_vm0, %v7344_v14, -inf }
 0x292   : > { %v2105_v24 = vsel %vm2102_vm14, %v2104_v22, %v2100_v36  ;;  %v7908_v22 = vpop.f32.mrf.mxu3 }
 0x293   : > { %v2122_v3 = vpack.c.bf16 %v2105_v24, %v2090_v56  ;;  %v7894_v0 = vpop.f32.mrf.mxu2  ;;  %v3056_v56 = vsel %vm464_vm0, %v7908_v22, -inf  ;;  %v3026_v24 = vsel %vm464_vm0, %v7453_v26, -inf }
 0x294   : > { %9356 = vst [vmem:[#allocation66_spill] sm:$0xff] %v7894_v0 }
 0x297   : > { %v7884_v57 = vpop.f32.mrf.mxu0 }
 0x298   : > { %9354 = vst [vmem:[#allocation64_spill] sm:$0xff] %v7884_v57 }
 0x29b   : > { %v7904_v8 = vpop.f32.mrf.mxu2 }
 0x29c   : > { %9358 = vst [vmem:[#allocation68_spill] sm:$0xff] %v7904_v8 }
 0x29f   : > { %5333 = vmatmul.msk.bf16.gmra.mxu2 %vm2124_vm11, %v2122_v3  ;;  %v7888_v47 = vpop.f32.mrf.mxu0  ;;  %vm4932_vm11 = vcmask 519168  }
 0x2a0   : > { %9355 = vst [vmem:[#allocation65_spill] sm:$0xff] %v7888_v47 }
 0x2a2   : > { %v7914_v3 = vpop.permute.xlu1 %2950 }
 0x2a7   : > { %v7898_v32 = vpop.f32.mrf.mxu0 }
 0x2a8   : > { %9357 = vst [vmem:[#allocation67_spill] sm:$0xff] %v7898_v32 }
 0x2a9   : > { %3018 = vmax.xlane.f32.xlu2 %v3017_v31  ;;  %v7916_v31 = vpop.f32.mrf.mxu2 }
 0x2aa   : > { %9359 = vst [vmem:[#allocation69_spill] sm:$0xff] %v7916_v31 }
 0x2af   : > { %v7906_v36 = vpop.f32.mrf.mxu0 }
 0x2b1   : > { %3030 = vmax.xlane.f32.xlu2 %v3029_v44 }
 0x2b7   : > { %v7918_v44 = vpop.f32.mrf.mxu0 }
 0x2b9   : > { %3042 = vmax.xlane.f32.xlu2 %v3041_v28  ;;  %v3107_v28 = vsel %vm464_vm0, %v7906_v36, -inf }
 0x2ba   : > { %3012 = vmax.xlane.f32.xlu0 %v3011_v58  ;;  %v3035_v58 = vsel %vm464_vm0, %v7582_v52, -inf }
 0x2bf   : > { %v7931_v47 = vpop.f32.mrf.mxu0 }
 0x2c1   : > { %3045 = vmax.xlane.f32.xlu2 %v3044_v19 }
 0x2c2   : > { %3021 = vmax.xlane.f32.xlu0 %v3020_v16  ;;  %v7926_v16 = vpop.f32.mrf.mxu3 }
 0x2c3   : > { %v3059_v57 = vsel %vm464_vm0, %v7926_v16, -inf }
 0x2c7   : > { %v7946_v40 = vpop.f32.mrf.mxu0 }
 0x2c9   : > { %3057 = vmax.xlane.f32.xlu2 %v3056_v56 }
 0x2ca   : > { %3027 = vmax.xlane.f32.xlu0 %v3026_v24  ;;  %v7928_v24 = vpop.f32.mrf.mxu2  ;;  %v7938_v5 = vpop.f32.mrf.mxu3 }
 0x2cb   : > { %9360 = vst [vmem:[#allocation70_spill] sm:$0xff] %v7928_v24 }
 0x2cd   : > { %v3016_v56 = vpop.xlane.xlu1 %3015 }
 0x2ce   : > { %v3204_v32 = vsub.f32 %v7239_v50, %v3016_v56  ;;  %v3110_v50 = vsel %vm464_vm0, %v7918_v44, -inf }
 0x2cf   : > { %v7960_v54 = vpop.f32.mrf.mxu0 }
 0x2d0   : > { %v3269_v25 = vmul.f32 1.442695, %v3204_v32 }
 0x2d1   : > { %3108 = vmax.xlane.f32.xlu2 %v3107_v28  ;;  %v7924_v19 = vpop.permute.xlu2 %2954  ;;  %v3047_v28 = vsel %vm464_vm0, %v7734_v37, -inf }
 0x2d2   : > { %3036 = vmax.xlane.f32.xlu0 %v3035_v58  ;;  %5636 = vpow2.f32 %v3269_v25  ;;  %v7942_v56 = vpop.f32.mrf.mxu2  ;;  %v2977_v32 = vsel %vm2446_vm1, %v7924_v19, 0 }
 0x2d3   : > { %9361 = vst [vmem:[#allocation71_spill] sm:$0xff] %v7942_v56 }
 0x2d7   : > { %v7972_v6 = vpop.f32.mrf.mxu0 }
 0x2d9   : > { %3060 = vmax.xlane.f32.xlu2 %v3059_v57  ;;  %v3062_v57 = vsel %vm464_vm0, %v7938_v5, -inf }
 0x2da   : > { %3048 = vmax.xlane.f32.xlu0 %v3047_v28  ;;  %v2957_v58 = vpop.permute.xlu2 %2956  ;;  %v7952_v28 = vpop.f32.mrf.mxu1 }
 0x2db   : > { %v2980_v61 = vsel %vm2446_vm1, %v2957_v58, 0  ;;  %9362 = vst [vmem:[#allocation72_spill] sm:$0xff] %v7952_v28  ;;  %v7958_v21 = vpop.f32.mrf.mxu2 }
 0x2dc   : > { %2986 = vmatpush.bf16.xpose.msra.mxu3 %v2980_v61  ;;  %v7950_v61 = vpop.eup %5636  ;;  %9363 = vst [vmem:[#allocation73_spill] sm:$0xff] %v7958_v21 }
 0x2dd   : > { %v3398_v25 = vsel %vm464_vm0, %v7950_v61, 0.0 }
 0x2e1   : > { %3111 = vmax.xlane.f32.xlu2 %v3110_v50  ;;  %v3113_v50 = vsel %vm464_vm0, %v7931_v47, -inf }
 0x2e2   : > { %3063 = vmax.xlane.f32.xlu0 %v3062_v57  ;;  %v7962_v57 = vpop.f32.mrf.mxu3  ;;  %v7964_v51 = vpop.f32.mrf.mxu1 }
 0x2e3   : > { %9364 = vst [vmem:[#allocation74_spill] sm:$0xff] %v7964_v51  ;;  %v3065_v28 = vsel %vm464_vm0, %v7962_v57, -inf }
 0x2e4   : > { %2987 = vmatpush.bf16.xpose.msra.mxu3 %v2977_v32  ;;  %v3116_v32 = vsel %vm464_vm0, %v7946_v40, -inf }
 0x2e9   : > { %3399 = vadd.xlane.f32.xlu2 %v3398_v25  ;;  %v7970_v25 = vpop.f32.mrf.mxu2 }
 0x2ea   : > { %3114 = vmax.xlane.f32.xlu0 %v3113_v50  ;;  %9365 = vst [vmem:[#allocation75_spill] sm:$0xff] %v7970_v25  ;;  %v3122_v50 = vsel %vm464_vm0, %v7972_v6, -inf  ;;  %v7976_v62 = vpop.f32.mrf.mxu1  ;;  %v8029_v25 = vpop.xlane.xlu1 %3024 }
 0x2eb   : > { %9366 = vst [vmem:[#allocation76_spill] sm:$0xff] %v7976_v62 }
 0x2f1   : > { %3117 = vmax.xlane.f32.xlu2 %v3116_v32  ;;  %v7979_v1 = vpop.f32.mrf.mxu2 }
 0x2f2   : > { %3066 = vmax.xlane.f32.xlu0 %v3065_v28  ;;  %9367 = vst [vmem:[#allocation77_spill] sm:$0xff] %v7979_v1  ;;  %v2971_v28 = vsel %vm2446_vm1, %v7914_v3, 0  ;;  %v7984_v35 = vpop.f32.mrf.mxu1  ;;  %v9383_v1 = vld [vmem:[#allocation29_spill] sm:$0xff] }
 0x2f3   : > { %9368 = vst [vmem:[#allocation78_spill] sm:$0xff] %v7984_v35  ;;  %v7997_v35 = vpop.f32.mrf.mxu3 }
 0x2f9   : > { %v2953_v38 = vpop.permute.xlu0 %2952  ;;  %v7987_v62 = vpop.f32.mrf.mxu2 }
 0x2fa   : > { %3123 = vmax.xlane.f32.xlu0 %v3122_v50  ;;  %v2974_v51 = vsel %vm2446_vm1, %v2953_v38, 0  ;;  %9370 = vst [vmem:[#allocation12_spill] sm:$0xff] %v7987_v62  ;;  %v9371_v50 = vld [vmem:[#allocation6_spill] sm:$0xff]  ;;  %v7995_v29 = vpop.f32.mrf.mxu1 }
 0x2fb   : > { %2988 = vmatpush.bf16.xpose.msra.mxu3 %v2974_v51  ;;  %v9372_v51 = vld [vmem:[#allocation15_spill] sm:$0xff]  ;;  %9373 = vst [vmem:[#allocation6_spill] sm:$0xff] %v7995_v29  ;;  %v9379_v29 = vld [vmem:[#allocation32_spill] sm:$0xff] }
 0x2fc   : > { %v2904_v30 = vsel %vm2446_vm1, %v9372_v51, 0 }
 0x302   : > { %v2884_v32 = vpop.permute.xlu0 %2883 }
 0x303   : > { %v2907_v7 = vsel %vm2446_vm1, %v2884_v32, 0  ;;  %2989 = vmatpush.bf16.xpose.msra.mxu3 %v2971_v28  ;;  %v9376_v28 = vld [vmem:[#allocation3_spill] sm:$0xff] }
 0x304   : > { %2913 = vmatpush.bf16.xpose.msrb.mxu2 %v2907_v7  ;;  %v9374_v7 = vld [vmem:[#allocation21_spill] sm:$0xff] }
 0x30a   : > { %5362 = vmatmul.msk.bf16.vlgmr.msra.gmra.mxu3 %vm2446_vm1, %v7489_v15  ;;  %v8005_v15 = vpop.f32.mrf.mxu1 }
 0x30b   : > { %3886 = vmatpush.bf16.msrb.mxu3 %v9369_v11  ;;  %v8000_v11 = vpop.f32.mrf.mxu2  ;;  %9377 = vst [vmem:[#allocation21_spill] sm:$0xff] %v8005_v15 }
 0x30c   : > { %2914 = vmatpush.bf16.xpose.msrb.mxu2 %v2904_v30  ;;  %9375 = vst [vmem:[#allocation15_spill] sm:$0xff] %v8000_v11  ;;  %v8007_v30 = vpop.f32.mrf.mxu3 }
 0x30f   : > { %3887 = vmatpush.bf16.msrb.mxu3 %v9371_v50  ;;  %v2901_v50 = vsel %vm2446_vm1, %v9376_v28, 0 }
 0x313   : > { %3888 = vmatpush.bf16.msrb.mxu3 %v7301_v27  ;;  %v2898_v27 = vsel %vm2446_vm1, %v7714_v9, 0 }
 0x314   : > { %2915 = vmatpush.bf16.xpose.msrb.mxu2 %v2901_v50  ;;  %v8018_v50 = vpop.f32.mrf.mxu1 }
 0x315   : > { %9381 = vst [vmem:[#allocation32_spill] sm:$0xff] %v8018_v50 }
 0x317   : > { %3889 = vmatpush.bf16.msrb.mxu3 %v9374_v7  ;;  %v8013_v7 = vpop.f32.mrf.mxu2 }
 0x318   : > { %9378 = vst [vmem:[#allocation3_spill] sm:$0xff] %v8013_v7 }
 0x31a   : > { %5363 = vmatmul.msk.bf16.gmra.mxu3 %vm2446_vm1, %v7844_v17  ;;  %v8024_v17 = vpop.f32.mrf.mxu3 }
 0x31b   : > { %4146 = vmatpush.bf16.msra.mxu3 %v2957_v58 }
 0x31c   : > { %v3019_v58 = vpop.xlane.xlu2 %3018  ;;  %2916 = vmatpush.bf16.xpose.msrb.mxu2 %v2898_v27 }
 0x31d   : > { %v3205_v43 = vsub.f32 %v7285_v33, %v3019_v58  ;;  %v3588_v33 = vpack.c.bf16 %v7950_v61, %v7950_v61 }
 0x31f   : > { %4147 = vmatpush.bf16.msra.mxu3 %v7924_v19  ;;  %v9380_v19 = vld [vmem:[#allocation27_spill] sm:$0xff]  ;;  %v8027_v27 = vpop.f32.mrf.mxu2 }
 0x320   : > { %9384 = vst [vmem:[#allocation27_spill] sm:$0xff] %v8027_v27 }
 0x323   : > { %4148 = vmatpush.bf16.msra.mxu3 %v2953_v38  ;;  %v9382_v38 = vld [vmem:[#allocation34_spill] sm:$0xff] }
 0x324   : > { %3821 = vmatpush.bf16.msra.mxu2 %v9379_v29  ;;  %v8022_v15 = vpop.xlane.xlu2 %3030  ;;  %v9385_v29 = vld [vmem:[#allocation31_spill] sm:$0xff] }
 0x325   : > { %5358 = vmatmul.msk.bf16.vlgmr.msrb.gmra.mxu2 %vm2446_vm1, %v9382_v38 }
 0x327   : > { %4149 = vmatpush.bf16.msra.mxu3 %v7914_v3  ;;  %v8034_v3 = vpop.f32.mrf.mxu1  ;;  %v8043_v11 = vpop.f32.mrf.mxu2 }
 0x328   : > { %3822 = vmatpush.bf16.msra.mxu2 %v9380_v19  ;;  %9386 = vst [vmem:[#allocation34_spill] sm:$0xff] %v8034_v3 }
 0x329   : > { %9387 = vst [vmem:[#allocation29_spill] sm:$0xff] %v8043_v11 }
 0x32a   : > { %5364 = vmatmul.msk.bf16.gmra.mxu3 %vm2446_vm1, %v7787_v49  ;;  %v9388_v49 = vld [vmem:[#allocation42_spill] sm:$0xff] }
 0x32c   : > { %3823 = vmatpush.bf16.msra.mxu2 %v9383_v1  ;;  %v8036_v19 = vpop.xlane.xlu2 %3042  ;;  %v8040_v1 = vpop.f32.mrf.mxu3 }
 0x32d   : > { %v3013_v38 = vpop.xlane.xlu0 %3012 }
 0x32e   : > { %v3203_v50 = vsub.f32 %v7212_v12, %v3013_v38 }
 0x330   : > { %3824 = vmatpush.bf16.msra.mxu2 %v9385_v29  ;;  %v3267_v48 = vmul.f32 1.442695, %v3203_v50  ;;  %v3271_v29 = vmul.f32 1.442695, %v3205_v43 }
 0x332   : > { %5638 = vpow2.f32 %v3267_v48 }
 0x333   : > { %5640 = vpow2.f32 %v3271_v29 }
 0x334   : > { %4081 = vmatpush.bf16.msrb.mxu2 %v2884_v32  ;;  %v8045_v32 = vpop.xlane.xlu1 %3033  ;;  %v8050_v3 = vpop.xlane.xlu2 %3045 }
 0x335   : > { %5359 = vmatmul.msk.bf16.gmra.mxu2 %vm2446_vm1, %v9388_v49  ;;  %v3022_v12 = vpop.xlane.xlu0 %3021  ;;  %v8061_v49 = vpop.f32.mrf.mxu2 }
 0x336   : > { %v3206_v38 = vsub.f32 %v7344_v14, %v3022_v12  ;;  %9390 = vst [vmem:[#allocation42_spill] sm:$0xff] %v8061_v49 }
 0x338   : > { %4082 = vmatpush.bf16.msrb.mxu2 %v9372_v51  ;;  %v8052_v51 = vpop.f32.mrf.mxu1  ;;  %v5639_v58 = vpop.eup %5638  ;;  %v3273_v48 = vmul.f32 1.442695, %v3206_v38 }
 0x339   : > { %9389 = vst [vmem:[#allocation31_spill] sm:$0xff] %v8052_v51  ;;  %v3587_v50 = vpack.c.bf16 %v5639_v58, %v5639_v58  ;;  %v3395_v43 = vsel %vm464_vm0, %v5639_v58, 0.0  ;;  %v3660_v51 = vunpack.c.l.b16 %v3588_v33  ;;  %v5641_v12 = vpop.eup %5640 }
 0x33a   : > { %5642 = vpow2.f32 %v3273_v48  ;;  %3396 = vadd.xlane.f32.xlu1 %v3395_v43  ;;  %5365 = vmatmul.msk.bf16.gmra.mxu3 %vm2446_vm1, %v7810_v63 }
 0x33b   : > { %v3659_v14 = vunpack.c.l.b16 %v3587_v50  ;;  %v3401_v50 = vsel %vm464_vm0, %v5641_v12, 0.0 }
 0x33c   : > { %4083 = vmatpush.bf16.msrb.mxu2 %v9376_v28  ;;  %v8058_v28 = vpop.f32.mrf.mxu3  ;;  %v3040_v11 = vpop.xlane.xlu1 %3039 }
 0x33d   : > { %v3667_v61 = vpack.c.b16 %v3660_v51, %v3659_v14  ;;  %v3028_v29 = vpop.xlane.xlu0 %3027  ;;  %v3212_v38 = vsub.f32 %v7604_v23, %v3040_v11  ;;  %v9392_v14 = vld [vmem:[#allocation38_spill] sm:$0xff]  ;;  %v8080_v23 = vpop.f32.mrf.mxu2 }
 0x33e   : > { %v3208_v62 = vsub.f32 %v7453_v26, %v3028_v29  ;;  %9393 = vst [vmem:[#allocation38_spill] sm:$0xff] %v8080_v23 }
 0x33f   : > { %5366 = vmatmul.msk.bf16.vlgmr.msrb.gmra.mxu0 %vm464_vm0, %v3667_v61  ;;  %v3285_v63 = vmul.f32 1.442695, %v3212_v38  ;;  %v3589_v38 = vpack.c.bf16 %v5641_v12, %v5641_v12 }
 0x340   : > { %4084 = vmatpush.bf16.msrb.mxu2 %v7714_v9  ;;  %v8065_v9 = vpop.xlane.xlu2 %3057  ;;  %v5643_v58 = vpop.eup %5642  ;;  %v3277_v33 = vmul.f32 1.442695, %v3208_v62  ;;  %v3207_v62 = vsub.f32 %v7381_v20, %v8029_v25  ;;  %v3214_v25 = vsub.f32 %v7702_v4, %v8050_v3  ;;  %v3209_v4 = vsub.f32 %v7487_v59, %v8022_v15 }
 0x341   : > { %v8070_v48 = vpop.f32.mrf.mxu1  ;;  %v3404_v43 = vsel %vm464_vm0, %v5643_v58, 0.0  ;;  %v3590_v11 = vpack.c.bf16 %v5643_v58, %v5643_v58  ;;  %v3661_v20 = vunpack.c.l.b16 %v3589_v38  ;;  %v8103_v38 = vpop.f32.mrf.mxu0 }
 0x342   : > { %9391 = vst [vmem:[#allocation79_spill] sm:$0xff] %v8070_v48  ;;  %5644 = vpow2.f32 %v3277_v33  ;;  %3402 = vadd.xlane.f32.xlu1 %v3401_v50  ;;  %3405 = vadd.xlane.f32.xlu2 %v3404_v43  ;;  %v3068_v48 = vsel %vm464_vm0, %v7997_v35, -inf  ;;  %v3275_v49 = vmul.f32 1.442695, %v3207_v62  ;;  %v3289_v3 = vmul.f32 1.442695, %v3214_v25 }
 0x343   : > { %5646 = vpow2.f32 %v3285_v63  ;;  %v3662_v43 = vunpack.c.l.b16 %v3590_v11  ;;  %v3213_v63 = vsub.f32 %v7654_v2, %v8036_v19  ;;  %v3125_v59 = vsel %vm464_vm0, %v8103_v38, -inf }
 0x344   : > { %v8074_v51 = vpop.f32.mrf.mxu3 }
 0x345   : > { %5360 = vmatmul.msk.bf16.gmra.mxu2 %vm2446_vm1, %v9392_v14  ;;  %v3037_v61 = vpop.xlane.xlu0 %3036  ;;  %v3119_v14 = vsel %vm464_vm0, %v7960_v54, -inf  ;;  %v3287_v19 = vmul.f32 1.442695, %v3213_v63 }
 0x346   : > { %v3211_v29 = vsub.f32 %v7582_v52, %v3037_v61  ;;  %v3668_v61 = vpack.c.b16 %v3662_v43, %v3661_v20  ;;  %v3279_v20 = vmul.f32 1.442695, %v3209_v4 }
 0x348   : > { %v8078_v26 = vpop.xlane.xlu2 %3108  ;;  %v5645_v33 = vpop.eup %5644  ;;  %v3283_v50 = vmul.f32 1.442695, %v3211_v29 }
 0x349   : > { %v3410_v23 = vsel %vm464_vm0, %v5645_v33, 0.0  ;;  %v8090_v58 = vpop.f32.mrf.mxu1  ;;  %v8092_v52 = vpop.eup %5646 }
 0x34a   : > { %9394 = vst [vmem:[#allocation80_spill] sm:$0xff] %v8090_v58  ;;  %5648 = vpow2.f32 %v3283_v50  ;;  %3069 = vmax.xlane.f32.xlu1 %v3068_v48  ;;  %3120 = vmax.xlane.f32.xlu2 %v3119_v14  ;;  %v8101_v48 = vpop.f32.mrf.mxu2  ;;  %v3074_v50 = vsel %vm464_vm0, %v8024_v17, -inf  ;;  %v3052_v14 = vpop.xlane.xlu1 %3051 }
 0x34b   : > { %3411 = vadd.xlane.f32.xlu0 %v3410_v23  ;;  %5650 = vpow2.f32 %v3275_v49  ;;  %9395 = vst [vmem:[#allocation81_spill] sm:$0xff] %v8101_v48  ;;  %v3596_v23 = vpack.c.bf16 %v8092_v52, %v8092_v52  ;;  %v8169_v48 = vpop.f32.mrf.mxu0 }
 0x34c   : > { %v8098_v29 = vpop.f32.mrf.mxu3  ;;  %5652 = vpow2.f32 %v3289_v3 }
 0x34d   : > { %v3049_v11 = vpop.xlane.xlu0 %3048  ;;  %v3725_v15 = vunpack.c.l.b16 %v3596_v23  ;;  %5654 = vpow2.f32 %v3287_v19 }
 0x34f   : > { %5367 = vmatmul.msk.bf16.gmra.mxu0 %vm464_vm0, %v3668_v61  ;;  %v3592_v61 = vpack.c.bf16 %v5645_v33, %v5645_v33  ;;  %v3215_v33 = vsub.f32 %v7734_v37, %v3049_v11 }
 0x350   : > { %v3061_v12 = vpop.xlane.xlu2 %3060  ;;  %v8110_v2 = vpop.eup %5648 }
 0x351   : > { %v3219_v62 = vsub.f32 %v7926_v16, %v3061_v12  ;;  %v3595_v49 = vpack.c.bf16 %v8110_v2, %v8110_v2  ;;  %v3071_v16 = vsel %vm464_vm0, %v8007_v30, -inf  ;;  %v5651_v12 = vpop.eup %5650  ;;  %v8122_v63 = vpop.f32.mrf.mxu1  ;;  %v3664_v3 = vunpack.c.l.b16 %v3592_v61 }
 0x352   : > { %3072 = vmax.xlane.f32.xlu1 %v3071_v16  ;;  %3075 = vmax.xlane.f32.xlu2 %v3074_v50  ;;  %9396 = vst [vmem:[#allocation82_spill] sm:$0xff] %v8122_v63  ;;  %v3210_v50 = vsub.f32 %v7534_v55, %v8045_v32  ;;  %v3591_v4 = vpack.c.bf16 %v5651_v12, %v5651_v12  ;;  %v3407_v19 = vsel %vm464_vm0, %v5651_v12, 0.0  ;;  %v3077_v55 = vsel %vm464_vm0, %v8040_v1, -inf  ;;  %v8136_v32 = vpop.eup %5652  ;;  %v3055_v11 = vpop.xlane.xlu1 %3054 }
 0x353   : > { %v3299_v43 = vmul.f32 1.442695, %v3219_v62  ;;  %v3724_v25 = vunpack.c.l.b16 %v3595_v49  ;;  %3126 = vmax.xlane.f32.xlu0 %v3125_v59  ;;  %v8130_v59 = vpop.f32.mrf.mxu2  ;;  %v3598_v12 = vpack.c.bf16 %v8136_v32, %v8136_v32  ;;  %v3291_v61 = vmul.f32 1.442695, %v3215_v33 }
 0x354   : > { %v8128_v49 = vpop.f32.mrf.mxu3  ;;  %9397 = vst [vmem:[#allocation83_spill] sm:$0xff] %v8130_v59 }
 0x355   : > { %5361 = vmatmul.msk.bf16.gmra.mxu2 %vm2446_vm1, %v7859_v39  ;;  %v3732_v62 = vpack.c.b16 %v3725_v15, %v3724_v25  ;;  %v3064_v16 = vpop.xlane.xlu0 %3063  ;;  %5656 = vpow2.f32 %v3299_v43  ;;  %v3080_v43 = vsel %vm464_vm0, %v8058_v28, -inf  ;;  %v8140_v15 = vpop.eup %5654 }
 0x356   : > { %v3220_v23 = vsub.f32 %v7938_v5, %v3064_v16  ;;  %5658 = vpow2.f32 %v3279_v20  ;;  %v3281_v5 = vmul.f32 1.442695, %v3210_v50  ;;  %v3663_v20 = vunpack.c.l.b16 %v3591_v4 }
 0x357   : > { %5370 = vmatmul.msk.bf16.vlgmr.msra.gmra.mxu1 %vm464_vm0, %v3732_v62 }
 0x358   : > { %v3301_v39 = vmul.f32 1.442695, %v3220_v23  ;;  %v3112_v62 = vpop.xlane.xlu2 %3111  ;;  %v3669_v16 = vpack.c.b16 %v3664_v3, %v3663_v20  ;;  %v3216_v23 = vsub.f32 %v7783_v53, %v3052_v14  ;;  %v3727_v3 = vunpack.c.l.b16 %v3598_v12 }
 0x359   : > { %v8146_v50 = vpop.f32.mrf.mxu1  ;;  %v3419_v53 = vsel %vm464_vm0, %v8110_v2, 0.0  ;;  %v3083_v20 = vsel %vm464_vm0, %v8074_v51, -inf }
 0x35a   : > { %5660 = vpow2.f32 %v3301_v39  ;;  %3408 = vadd.xlane.f32.xlu1 %v3407_v19  ;;  %3078 = vmax.xlane.f32.xlu2 %v3077_v55  ;;  %9398 = vst [vmem:[#allocation84_spill] sm:$0xff] %v8146_v50  ;;  %v3597_v39 = vpack.c.bf16 %v8140_v15, %v8140_v15  ;;  %v3217_v55 = vsub.f32 %v7821_v42, %v3055_v11 }
 0x35b   : > { %3081 = vmax.xlane.f32.xlu0 %v3080_v43  ;;  %v8142_v25 = vpop.eup %5656  ;;  %5662 = vpow2.f32 %v3281_v5  ;;  %v3293_v43 = vmul.f32 1.442695, %v3216_v23  ;;  %v3236_v50 = vsub.f32 %v7918_v44, %v3112_v62  ;;  %v3235_v23 = vsub.f32 %v7906_v36, %v8078_v26 }
 0x35c   : > { %v5659_v37 = vpop.eup %5658  ;;  %v3603_v4 = vpack.c.bf16 %v8142_v25, %v8142_v25  ;;  %5664 = vpow2.f32 %v3291_v61  ;;  %v8162_v14 = vpop.f32.mrf.mxu3  ;;  %v3726_v42 = vunpack.c.l.b16 %v3597_v39  ;;  %v3295_v63 = vmul.f32 1.442695, %v3217_v55 }
 0x35d   : > { %v3413_v33 = vsel %vm464_vm0, %v5659_v37, 0.0  ;;  %v3593_v58 = vpack.c.bf16 %v5659_v37, %v5659_v37  ;;  %5666 = vpow2.f32 %v3293_v43  ;;  %v3333_v44 = vmul.f32 1.442695, %v3236_v50 }
 0x35e   : > { %v3789_v11 = vunpack.c.l.b16 %v3603_v4  ;;  %v3733_v59 = vpack.c.b16 %v3727_v3, %v3726_v42  ;;  %5668 = vpow2.f32 %v3295_v63  ;;  %v3092_v62 = vsel %vm464_vm0, %v8162_v14, -inf }
 0x35f   : > { %5368 = vmatmul.msk.bf16.gmra.mxu0 %vm464_vm0, %v3669_v16  ;;  %v8166_v16 = vpop.f32.mrf.mxu2  ;;  %v3665_v37 = vunpack.c.l.b16 %v3593_v58  ;;  %v3128_v4 = vsel %vm464_vm0, %v8169_v48, -inf  ;;  %v3331_v36 = vmul.f32 1.442695, %v3235_v23  ;;  %v3218_v58 = vsub.f32 %v7908_v22, %v8065_v9 }
 0x360   : > { %v8154_v19 = vpop.eup %5660  ;;  %9399 = vst [vmem:[#allocation85_spill] sm:$0xff] %v8166_v16  ;;  %v8173_v16 = vpop.xlane.xlu2 %3399  ;;  %5670 = vpow2.f32 %v3333_v44 }
 0x361   : > { %v3604_v5 = vpack.c.bf16 %v8154_v19, %v8154_v19  ;;  %v5663_v61 = vpop.eup %5662  ;;  %v8177_v39 = vpop.f32.mrf.mxu1  ;;  %5672 = vpow2.f32 %v3331_v36  ;;  %v3297_v42 = vmul.f32 1.442695, %v3218_v58 }
 0x362   : > { %3414 = vadd.xlane.f32.xlu1 %v3413_v33  ;;  %3420 = vadd.xlane.f32.xlu2 %v3419_v53  ;;  %v5665_v33 = vpop.eup %5664  ;;  %v3594_v53 = vpack.c.bf16 %v5663_v61, %v5663_v61  ;;  %9400 = vst [vmem:[#allocation86_spill] sm:$0xff] %v8177_v39  ;;  %v3416_v22 = vsel %vm464_vm0, %v5663_v61, 0.0 }
 0x363   : > { %v3790_v12 = vunpack.c.l.b16 %v3604_v5  ;;  %3084 = vmax.xlane.f32.xlu0 %v3083_v20  ;;  %v3431_v26 = vsel %vm464_vm0, %v5665_v33, 0.0  ;;  %v8184_v55 = vpop.eup %5666  ;;  %v3599_v50 = vpack.c.bf16 %v5665_v33, %v5665_v33  ;;  %5674 = vpow2.f32 %v3297_v42 }
 0x364   : > { %v8186_v3 = vpop.f32.mrf.mxu3  ;;  %v5669_v43 = vpop.eup %5668  ;;  %v3600_v20 = vpack.c.bf16 %v8184_v55, %v8184_v55 }
 0x365   : > { %v3797_v2 = vpack.c.b16 %v3790_v12, %v3789_v11  ;;  %v3728_v11 = vunpack.c.l.b16 %v3599_v50  ;;  %v3437_v33 = vsel %vm464_vm0, %v5669_v43, 0.0 }
 0x366   : > { %v8198_v9 = vpop.eup %5670  ;;  %v3729_v44 = vunpack.c.l.b16 %v3600_v20 }
 0x367   : > { %5371 = vmatmul.msk.bf16.gmra.mxu1 %vm464_vm0, %v3733_v59  ;;  %5374 = vmatmul.msk.bf16.vlgmr.msra.gmra.mxu2 %vm464_vm0, %v3797_v2  ;;  %v3666_v59 = vunpack.c.l.b16 %v3594_v53  ;;  %v8190_v63 = vpop.f32.mrf.mxu2  ;;  %v3428_v2 = vsel %vm464_vm0, %v8136_v32, 0.0  ;;  %v3115_v53 = vpop.xlane.xlu0 %3114  ;;  %v3620_v32 = vpack.c.bf16 %v8198_v9, %v8198_v9 }
 0x368   : > { %9401 = vst [vmem:[#allocation87_spill] sm:$0xff] %v8190_v63  ;;  %v3118_v12 = vpop.xlane.xlu2 %3117  ;;  %v3734_v61 = vpack.c.b16 %v3729_v44, %v3728_v11  ;;  %v3237_v36 = vsub.f32 %v7931_v47, %v3115_v53  ;;  %v3422_v44 = vsel %vm464_vm0, %v8092_v52, 0.0  ;;  %v3089_v52 = vsel %vm464_vm0, %v8128_v49, -inf }
 0x369   : > { %v3670_v5 = vpack.c.b16 %v3666_v59, %v3665_v37  ;;  %v8200_v23 = vpop.f32.mrf.mxu1  ;;  %v8203_v37 = vpop.eup %5672  ;;  %v3920_v50 = vunpack.c.l.b16 %v3620_v32 }
 0x36a   : > { %3093 = vmax.xlane.f32.xlu2 %v3092_v62  ;;  %3129 = vmax.xlane.f32.xlu1 %v3128_v4  ;;  %9402 = vst [vmem:[#allocation88_spill] sm:$0xff] %v8200_v23  ;;  %v3238_v62 = vsub.f32 %v7946_v40, %v3118_v12  ;;  %v3619_v59 = vpack.c.bf16 %v8203_v37, %v8203_v37  ;;  %v8220_v20 = vpop.eup %5674  ;;  %v3335_v42 = vmul.f32 1.442695, %v3237_v36 }
 0x36b   : > { %3432 = vadd.xlane.f32.xlu0 %v3431_v26  ;;  %v3602_v12 = vpack.c.bf16 %v8220_v20, %v8220_v20 }
 0x36c   : > { %v8208_v4 = vpop.f32.mrf.mxu3  ;;  %v3337_v58 = vmul.f32 1.442695, %v3238_v62  ;;  %v3919_v47 = vunpack.c.l.b16 %v3619_v59 }
 0x36d   : > { %v3098_v40 = vsel %vm464_vm0, %v8208_v4, -inf  ;;  %v3731_v53 = vunpack.c.l.b16 %v3602_v12  ;;  %v3425_v12 = vsel %vm464_vm0, %v8140_v15, 0.0 }
 0x36e   : > { %5676 = vpow2.f32 %v3337_v58 }
 0x36f   : > { %5369 = vmatmul.msk.bf16.gmra.mxu0 %vm464_vm0, %v3670_v5  ;;  %v8211_v26 = vpop.f32.mrf.mxu2  ;;  %v3086_v5 = vsel %vm464_vm0, %v8098_v29, -inf  ;;  %5678 = vpow2.f32 %v3335_v42 }
 0x370   : > { %9403 = vst [vmem:[#allocation89_spill] sm:$0xff] %v8211_v26 }
 0x371   : > { %v8222_v11 = vpop.f32.mrf.mxu1 }
 0x372   : > { %3429 = vadd.xlane.f32.xlu2 %v3428_v2  ;;  %3417 = vadd.xlane.f32.xlu1 %v3416_v22  ;;  %9404 = vst [vmem:[#allocation90_spill] sm:$0xff] %v8222_v11  ;;  %v3927_v2 = vpack.c.b16 %v3920_v50, %v3919_v47  ;;  %v3601_v22 = vpack.c.bf16 %v5669_v43, %v5669_v43 }
 0x373   : > { %3438 = vadd.xlane.f32.xlu0 %v3437_v33 }
 0x374   : > { %v8231_v62 = vpop.eup %5676  ;;  %v3730_v32 = vunpack.c.l.b16 %v3601_v22  ;;  %v3095_v22 = vsel %vm464_vm0, %v8186_v3, -inf }
 0x375   : > { %v3622_v36 = vpack.c.bf16 %v8231_v62, %v8231_v62 }
 0x376   : > { %v3735_v59 = vpack.c.b16 %v3731_v53, %v3730_v32  ;;  %v3434_v32 = vsel %vm464_vm0, %v8184_v55, 0.0 }
 0x377   : > { %5372 = vmatmul.msk.bf16.gmra.mxu1 %vm464_vm0, %v3734_v61  ;;  %v8227_v33 = vpop.f32.mrf.mxu2  ;;  %v8233_v61 = vpop.eup %5678  ;;  %v3922_v50 = vunpack.c.l.b16 %v3622_v36 }
 0x378   : > { %9405 = vst [vmem:[#allocation91_spill] sm:$0xff] %v8227_v33  ;;  %v3621_v43 = vpack.c.bf16 %v8233_v61, %v8233_v61  ;;  %v8261_v36 = vpop.f32.mrf.mxu3 }
 0x379   : > { %v8237_v58 = vpop.f32.mrf.mxu1 }
 0x37a   : > { %3099 = vmax.xlane.f32.xlu2 %v3098_v40  ;;  %3087 = vmax.xlane.f32.xlu1 %v3086_v5  ;;  %v3921_v5 = vunpack.c.l.b16 %v3621_v43 }
 0x37c   : > { %v3928_v42 = vpack.c.b16 %v3922_v50, %v3921_v5  ;;  %v3131_v50 = vsel %vm464_vm0, %v8237_v58, -inf }
 0x37f   : > { %5382 = vmatmul.msk.bf16.vlgmr.msra.gmra.mxu0 %vm464_vm0, %v3927_v2  ;;  %v8244_v40 = vpop.f32.mrf.mxu2 }
 0x380   : > { %9406 = vst [vmem:[#allocation92_spill] sm:$0xff] %v8244_v40  ;;  %v8271_v5 = vpop.f32.mrf.mxu3 }
 0x381   : > { %v8247_v47 = vpop.f32.mrf.mxu1  ;;  %v3104_v40 = vsel %vm464_vm0, %v8271_v5, -inf }
 0x382   : > { %3423 = vadd.xlane.f32.xlu1 %v3422_v44 }
 0x387   : > { %5373 = vmatmul.msk.bf16.gmra.mxu1 %vm464_vm0, %v3735_v59  ;;  %v8251_v2 = vpop.f32.mrf.mxu2 }
 0x388   : > { %9407 = vst [vmem:[#allocation93_spill] sm:$0xff] %v8251_v2 }
 0x389   : > { %v8255_v53 = vpop.f32.mrf.mxu1 }
 0x38a   : > { %3090 = vmax.xlane.f32.xlu1 %v3089_v52  ;;  %v3067_v52 = vpop.xlane.xlu0 %3066  ;;  %v3137_v7 = vsel %vm464_vm0, %v8255_v53, -inf }
 0x38d   : > { %v8283_v11 = vpop.f32.mrf.mxu3 }
 0x38f   : > { %5383 = vmatmul.msk.bf16.gmra.mxu0 %vm464_vm0, %v3928_v42  ;;  %v8257_v44 = vpop.f32.mrf.mxu2 }
 0x390   : > { %9408 = vst [vmem:[#allocation94_spill] sm:$0xff] %v8257_v44  ;;  %v3221_v44 = vsub.f32 %v7962_v57, %v3067_v52 }
 0x391   : > { %v8263_v59 = vpop.f32.mrf.mxu1 }
 0x392   : > { %3426 = vadd.xlane.f32.xlu1 %v3425_v12  ;;  %v3303_v33 = vmul.f32 1.442695, %v3221_v44 }
 0x395   : > { %v8300_v27 = vpop.f32.mrf.mxu3 }
 0x399   : > { %v8273_v55 = vpop.f32.mrf.mxu1 }
 0x39a   : > { %3096 = vmax.xlane.f32.xlu1 %v3095_v22  ;;  %v3134_v22 = vsel %vm464_vm0, %v8247_v47, -inf }
 0x39d   : > { %v8350_v60 = vpop.f32.mrf.mxu3 }
 0x3a2   : > { %3435 = vadd.xlane.f32.xlu1 %v3434_v32 }
 0x3a8   : > { %v8265_v15 = vpop.f32.mrf.mxu2 }
 0x3a9   : > { %v3155_v43 = vsel %vm464_vm0, %v8265_v15, -inf }
 0x3aa   : > { %3156 = vmax.xlane.f32.xlu2 %v3155_v43  ;;  %3132 = vmax.xlane.f32.xlu1 %v3131_v50  ;;  %v3101_v43 = vsel %vm464_vm0, %v8261_v36, -inf  ;;  %v3124_v50 = vpop.xlane.xlu0 %3123 }
 0x3ab   : > { %v3240_v2 = vsub.f32 %v7972_v6, %v3124_v50 }
 0x3ad   : > { %v3397_v42 = vpop.xlane.xlu1 %3396  ;;  %v3341_v26 = vmul.f32 1.442695, %v3240_v2  ;;  %v3440_v2 = vsel %vm464_vm0, %v8220_v20, 0.0 }
 0x3ae   : > { %5680 = vrcp.f32 %v3397_v42 }
 0x3af   : > { %5682 = vrcp.f32 %v8173_v16 }
 0x3b0   : > { %v8275_v12 = vpop.f32.mrf.mxu2  ;;  %5684 = vpow2.f32 %v3303_v33  ;;  %v3182_v33 = vsel %vm464_vm0, %v8300_v27, -inf }
 0x3b1   : > { %v3158_v32 = vsel %vm464_vm0, %v8275_v12, -inf  ;;  %5686 = vpow2.f32 %v3341_v26 }
 0x3b2   : > { %3135 = vmax.xlane.f32.xlu2 %v3134_v22  ;;  %3159 = vmax.xlane.f32.xlu0 %v3158_v32  ;;  %v3179_v22 = vsel %vm464_vm0, %v8283_v11, -inf  ;;  %v8293_v32 = vpop.f32.mrf.mxu1 }
 0x3b3   : > { %3102 = vmax.xlane.f32.xlu1 %v3101_v43  ;;  %v3443_v43 = vsel %vm464_vm0, %v8142_v25, 0.0 }
 0x3b4   : > { %v5681_v57 = vpop.eup %5680 }
 0x3b5   : > { %v3403_v23 = vpop.xlane.xlu1 %3402  ;;  %v8285_v39 = vpop.xlane.xlu2 %3405 }
 0x3b8   : > { %v8297_v52 = vpop.f32.mrf.mxu2 }
 0x3b9   : > { %v3161_v44 = vsel %vm464_vm0, %v8297_v52, -inf }
 0x3ba   : > { %3105 = vmax.xlane.f32.xlu2 %v3104_v40  ;;  %3180 = vmax.xlane.f32.xlu0 %v3179_v22 }
 0x3bb   : > { %3444 = vadd.xlane.f32.xlu1 %v3443_v43 }
 0x3bc   : > { %v3696_v6 = vpop.f32.mrf.mxu0 }
 0x3bd   : > { %v4235_v42 = vmul.f32 %v5681_v57, %v3696_v6  ;;  %v3070_v50 = vpop.xlane.xlu1 %3069  ;;  %v3121_v63 = vpop.xlane.xlu2 %3120 }
 0x3be   : > { %v3222_v40 = vsub.f32 %v7997_v35, %v3070_v50  ;;  %v3239_v22 = vsub.f32 %v7960_v54, %v3121_v63  ;;  %v8304_v25 = vpop.xlane.xlu0 %3411  ;;  %v8312_v57 = vpop.f32.mrf.mxu1 }
 0x3bf   : > { %v5683_v54 = vpop.eup %5682  ;;  %v4299_v20 = vpack.c.bf16 %v4235_v42, %v4235_v42  ;;  %v3140_v42 = vsel %vm464_vm0, %v8263_v59, -inf }
 0x3c0   : > { %v3305_v16 = vmul.f32 1.442695, %v3222_v40  ;;  %v3339_v43 = vmul.f32 1.442695, %v3239_v22  ;;  %v8314_v35 = vpop.eup %5684  ;;  %v8318_v22 = vpop.f32.mrf.mxu2 }
 0x3c1   : > { %v8316_v26 = vpop.eup %5686  ;;  %v3164_v21 = vsel %vm464_vm0, %v8318_v22, -inf }
 0x3c2   : > { %3441 = vadd.xlane.f32.xlu2 %v3440_v2  ;;  %3162 = vmax.xlane.f32.xlu0 %v3161_v44  ;;  %5688 = vpow2.f32 %v3305_v16  ;;  %v3605_v16 = vpack.c.bf16 %v8314_v35, %v8314_v35 }
 0x3c3   : > { %3183 = vmax.xlane.f32.xlu1 %v3182_v33  ;;  %5690 = vpow2.f32 %v3339_v43 }
 0x3c4   : > { %v3698_v63 = vpop.f32.mrf.mxu0  ;;  %5692 = vrcp.f32 %v3403_v23  ;;  %v3624_v23 = vpack.c.bf16 %v8316_v26, %v8316_v26 }
 0x3c5   : > { %v4236_v6 = vmul.f32 %v5683_v54, %v3698_v63  ;;  %v3073_v50 = vpop.xlane.xlu1 %3072  ;;  %v3076_v40 = vpop.xlane.xlu2 %3075 }
 0x3c6   : > { %v3223_v2 = vsub.f32 %v8007_v30, %v3073_v50  ;;  %v3224_v44 = vsub.f32 %v8024_v17, %v3076_v40  ;;  %v8324_v33 = vpop.xlane.xlu0 %3126  ;;  %v3924_v24 = vunpack.c.l.b16 %v3624_v23 }
 0x3c7   : > { %v4300_v43 = vpack.c.bf16 %v4236_v6, %v4236_v6  ;;  %v8336_v6 = vunpack.c.l.b16 %v4299_v20 }
 0x3c8   : > { %v8330_v54 = vpop.eup %5688  ;;  %v3307_v30 = vmul.f32 1.442695, %v3223_v2  ;;  %v3309_v63 = vmul.f32 1.442695, %v3224_v44  ;;  %v3791_v2 = vunpack.c.l.b16 %v3605_v16  ;;  %v3491_v16 = vsel %vm464_vm0, %v8203_v37, 0.0 }
 0x3c9   : > { %v8334_v17 = vpop.eup %5690  ;;  %9409 = vst [vmem:[#allocation95_spill] sm:$0xff] %v8336_v6  ;;  %v3606_v50 = vpack.c.bf16 %v8330_v54, %v8330_v54  ;;  %v8340_v40 = vunpack.c.l.b16 %v4300_v43 }
 0x3ca   : > { %3138 = vmax.xlane.f32.xlu2 %v3137_v7  ;;  %3141 = vmax.xlane.f32.xlu0 %v3140_v42  ;;  %v3623_v56 = vpack.c.bf16 %v8334_v17, %v8334_v17  ;;  %5694 = vpow2.f32 %v3307_v30  ;;  %v5693_v20 = vpop.eup %5692  ;;  %v8348_v42 = vpop.f32.mrf.mxu1  ;;  %v3500_v7 = vsel %vm464_vm0, %v8231_v62, 0.0 }
 0x3cb   : > { %9410 = vst [vmem:[#allocation96_spill] sm:$0xff] %v8340_v40  ;;  %3165 = vmax.xlane.f32.xlu1 %v3164_v21  ;;  %v3792_v44 = vunpack.c.l.b16 %v3606_v50  ;;  %5696 = vpow2.f32 %v3309_v63  ;;  %v3185_v63 = vsel %vm464_vm0, %v8350_v60, -inf }
 0x3cc   : > { %v3923_v31 = vunpack.c.l.b16 %v3623_v56  ;;  %v3701_v43 = vpop.f32.mrf.mxu0  ;;  %5698 = vrcp.f32 %v8285_v39  ;;  %v3494_v56 = vsel %vm464_vm0, %v8198_v9, 0.0 }
 0x3cd   : > { %v4237_v8 = vmul.f32 %v5693_v20, %v3701_v43  ;;  %v3409_v0 = vpop.xlane.xlu1 %3408  ;;  %v3079_v34 = vpop.xlane.xlu2 %3078  ;;  %v3798_v41 = vpack.c.b16 %v3792_v44, %v3791_v2 }
 0x3ce   : > { %v3929_v21 = vpack.c.b16 %v3924_v24, %v3923_v31  ;;  %v3082_v30 = vpop.xlane.xlu0 %3081  ;;  %5700 = vrcp.f32 %v3409_v0  ;;  %v8379_v0 = vpop.f32.mrf.mxu2 }
 0x3cf   : > { %5375 = vmatmul.msk.bf16.gmra.mxu2 %vm464_vm0, %v3798_v41  ;;  %v3225_v41 = vsub.f32 %v8040_v1, %v3079_v34  ;;  %v3226_v24 = vsub.f32 %v8058_v28, %v3082_v30  ;;  %v4301_v44 = vpack.c.bf16 %v4237_v8, %v4237_v8  ;;  %v3241_v34 = vsub.f32 %v8103_v38, %v8324_v33 }
 0x3d0   : > { %5384 = vmatmul.msk.bf16.gmra.mxu0 %vm464_vm0, %v3929_v21  ;;  %v8359_v23 = vpop.eup %5694  ;;  %v3143_v30 = vsel %vm464_vm0, %v8273_v55, -inf  ;;  %v3449_v8 = vsel %vm464_vm0, %v8314_v35, 0.0 }
 0x3d1   : > { %9411 = vst [vmem:[#allocation97_spill] sm:$0xff] %v8359_v23  ;;  %v8363_v39 = vpop.eup %5696  ;;  %v3607_v9 = vpack.c.bf16 %v8359_v23, %v8359_v23  ;;  %v3311_v1 = vmul.f32 1.442695, %v3225_v41  ;;  %v3343_v38 = vmul.f32 1.442695, %v3241_v34 }
 0x3d2   : > { %3492 = vadd.xlane.f32.xlu2 %v3491_v16  ;;  %3495 = vadd.xlane.f32.xlu0 %v3494_v56  ;;  %v5699_v31 = vpop.eup %5698  ;;  %v3608_v2 = vpack.c.bf16 %v8363_v39, %v8363_v39  ;;  %v3446_v16 = vsel %vm464_vm0, %v8154_v19, 0.0  ;;  %v3313_v56 = vmul.f32 1.442695, %v3226_v24 }
 0x3d3   : > { %3186 = vmax.xlane.f32.xlu1 %v3185_v63  ;;  %v3793_v63 = vunpack.c.l.b16 %v3607_v9 }
 0x3d4   : > { %v3703_v37 = vpop.f32.mrf.mxu0  ;;  %v3761_v50 = vpop.f32.mrf.mxu1 }
 0x3d5   : > { %v4238_v20 = vmul.f32 %v5699_v31, %v3703_v37  ;;  %v3415_v43 = vpop.xlane.xlu1 %3414  ;;  %v3421_v21 = vpop.xlane.xlu2 %3420  ;;  %v3794_v31 = vunpack.c.l.b16 %v3608_v2  ;;  %v8381_v37 = vunpack.c.l.b16 %v4301_v44 }
 0x3d6   : > { %5702 = vrcp.f32 %v3421_v21  ;;  %v5701_v41 = vpop.eup %5700 }
 0x3d7   : > { %v4302_v28 = vpack.c.bf16 %v4238_v20, %v4238_v20  ;;  %5704 = vpow2.f32 %v3311_v1  ;;  %v3799_v21 = vpack.c.b16 %v3794_v31, %v3793_v63  ;;  %v3497_v1 = vsel %vm464_vm0, %v8233_v61, 0.0  ;;  %v8408_v63 = vpop.f32.mrf.mxu2 }
 0x3d8   : > { %5706 = vpow2.f32 %v3313_v56 }
 0x3d9   : > { %v8383_v19 = vunpack.c.l.b16 %v4302_v28  ;;  %5708 = vrcp.f32 %v8304_v25  ;;  %v3085_v28 = vpop.xlane.xlu0 %3084  ;;  %v3146_v25 = vsel %vm464_vm0, %v8293_v32, -inf }
 0x3da   : > { %3447 = vadd.xlane.f32.xlu2 %v3446_v16  ;;  %3144 = vmax.xlane.f32.xlu0 %v3143_v30  ;;  %5710 = vpow2.f32 %v3343_v38  ;;  %v3167_v30 = vsel %vm464_vm0, %v8379_v0, -inf }
 0x3db   : > { %3450 = vadd.xlane.f32.xlu1 %v3449_v8 }
 0x3dc   : > { %v3706_v24 = vpop.f32.mrf.mxu0  ;;  %v8387_v20 = vpop.f32.mrf.mxu1 }
 0x3dd   : > { %v5703_v35 = vpop.eup %5702  ;;  %v4239_v9 = vmul.f32 %v5701_v41, %v3706_v24  ;;  %v8389_v2 = vpop.xlane.xlu2 %3093 }
 0x3de   : > { %v3130_v44 = vpop.xlane.xlu1 %3129  ;;  %v8392_v16 = vmul.f32 %v5703_v35, %v3761_v50  ;;  %v8400_v8 = vpop.eup %5704 }
 0x3df   : > { %v3242_v34 = vsub.f32 %v8169_v48, %v3130_v44  ;;  %5376 = vmatmul.msk.bf16.gmra.mxu2 %vm464_vm0, %v3799_v21  ;;  %9412 = vst [vmem:[#allocation98_spill] sm:$0xff] %v8400_v8  ;;  %v8404_v50 = vpop.eup %5706  ;;  %v8406_v48 = vpop.f32.mrf.mxu3  ;;  %v3609_v24 = vpack.c.bf16 %v8400_v8, %v8400_v8  ;;  %v4303_v44 = vpack.c.bf16 %v4239_v9, %v4239_v9  ;;  %v3170_v9 = vsel %vm464_vm0, %v8408_v63, -inf }
 0x3e0   : > { %9413 = vst [vmem:[#allocation99_spill] sm:$0xff] %v8404_v50  ;;  %v5709_v61 = vpop.eup %5708  ;;  %v3610_v35 = vpack.c.bf16 %v8404_v50, %v8404_v50 }
 0x3e1   : > { %v3345_v56 = vmul.f32 1.442695, %v3242_v34  ;;  %v8412_v41 = vpop.eup %5710  ;;  %v8429_v33 = vunpack.c.l.b16 %v4303_v44 }
 0x3e2   : > { %3498 = vadd.xlane.f32.xlu2 %v3497_v1  ;;  %3168 = vmax.xlane.f32.xlu0 %v3167_v30 }
 0x3e3   : > { %3147 = vmax.xlane.f32.xlu1 %v3146_v25  ;;  %5712 = vpow2.f32 %v3345_v56  ;;  %v3227_v56 = vsub.f32 %v8074_v51, %v3085_v28  ;;  %v3625_v25 = vpack.c.bf16 %v8412_v41, %v8412_v41 }
 0x3e4   : > { %5714 = vrcp.f32 %v3415_v43  ;;  %v3708_v31 = vpop.f32.mrf.mxu0  ;;  %v8410_v38 = vpop.f32.mrf.mxu1  ;;  %v3188_v43 = vsel %vm464_vm0, %v8406_v48, -inf }
 0x3e5   : > { %v4240_v21 = vmul.f32 %v5709_v61, %v3708_v31  ;;  %v3430_v34 = vpop.xlane.xlu2 %3429  ;;  %v3795_v31 = vunpack.c.l.b16 %v3609_v24  ;;  %v3315_v8 = vmul.f32 1.442695, %v3227_v56  ;;  %v3925_v13 = vunpack.c.l.b16 %v3625_v25 }
 0x3e6   : > { %v3418_v1 = vpop.xlane.xlu1 %3417  ;;  %5716 = vrcp.f32 %v3430_v34  ;;  %v3796_v34 = vunpack.c.l.b16 %v3610_v35  ;;  %v3503_v56 = vsel %vm464_vm0, %v8334_v17, 0.0 }
 0x3e7   : > { %v4304_v30 = vpack.c.bf16 %v4240_v21, %v4240_v21  ;;  %v3433_v21 = vpop.xlane.xlu0 %3432 }
 0x3e8   : > { %5718 = vrcp.f32 %v3433_v21  ;;  %v3800_v6 = vpack.c.b16 %v3796_v34, %v3795_v31  ;;  %v3152_v21 = vsel %vm464_vm0, %v8348_v42, -inf }
 0x3e9   : > { %v8427_v61 = vpop.eup %5712  ;;  %v8431_v51 = vunpack.c.l.b16 %v4304_v30  ;;  %5720 = vrcp.f32 %v3418_v1  ;;  %v3149_v1 = vsel %vm464_vm0, %v8312_v57, -inf }
 0x3ea   : > { %3189 = vmax.xlane.f32.xlu2 %v3188_v43  ;;  %3501 = vadd.xlane.f32.xlu0 %v3500_v7  ;;  %v5715_v28 = vpop.eup %5714  ;;  %v3626_v43 = vpack.c.bf16 %v8427_v61, %v8427_v61  ;;  %5722 = vpow2.f32 %v3315_v8 }
 0x3eb   : > { %3171 = vmax.xlane.f32.xlu1 %v3170_v9 }
 0x3ec   : > { %v5717_v50 = vpop.eup %5716  ;;  %v3926_v23 = vunpack.c.l.b16 %v3626_v43  ;;  %v3711_v24 = vpop.f32.mrf.mxu0 }
 0x3ed   : > { %v3768_v35 = vpop.f32.mrf.mxu1  ;;  %v4241_v44 = vmul.f32 %v5715_v28, %v3711_v24 }
 0x3ee   : > { %v8437_v30 = vmul.f32 %v5717_v50, %v3768_v35  ;;  %v3088_v7 = vpop.xlane.xlu1 %3087  ;;  %v3930_v46 = vpack.c.b16 %v3926_v23, %v3925_v13  ;;  %v3452_v50 = vsel %vm464_vm0, %v8330_v54, 0.0  ;;  %v8448_v13 = vpop.f32.mrf.mxu3 }
 0x3ef   : > { %v3228_v40 = vsub.f32 %v8098_v29, %v3088_v7  ;;  %5377 = vmatmul.msk.bf16.gmra.mxu2 %vm464_vm0, %v3800_v6  ;;  %v5719_v29 = vpop.eup %5718  ;;  %v4305_v54 = vpack.c.bf16 %v4241_v44, %v4241_v44  ;;  %v3191_v7 = vsel %vm464_vm0, %v8448_v13, -inf }
 0x3f0   : > { %5385 = vmatmul.msk.bf16.gmra.mxu0 %vm464_vm0, %v3930_v46  ;;  %v5721_v6 = vpop.eup %5720  ;;  %v3230_v46 = vsub.f32 %v8162_v14, %v8389_v2 }
 0x3f1   : > { %v3317_v25 = vmul.f32 1.442695, %v3228_v40  ;;  %v8450_v17 = vpop.eup %5722  ;;  %v8452_v40 = vpop.f32.mrf.mxu2  ;;  %v8466_v2 = vunpack.c.l.b16 %v4305_v54 }
 0x3f2   : > { %3504 = vadd.xlane.f32.xlu2 %v3503_v56  ;;  %3453 = vadd.xlane.f32.xlu0 %v3452_v50  ;;  %9414 = vst [vmem:[#allocation100_spill] sm:$0xff] %v8450_v17  ;;  %v3611_v43 = vpack.c.bf16 %v8450_v17, %v8450_v17  ;;  %v3173_v24 = vsel %vm464_vm0, %v8452_v40, -inf  ;;  %v3321_v14 = vmul.f32 1.442695, %v3230_v46 }
 0x3f3   : > { %3150 = vmax.xlane.f32.xlu1 %v3149_v1  ;;  %5724 = vpow2.f32 %v3317_v25  ;;  %v3439_v25 = vpop.xlane.xlu0 %3438 }
 0x3f4   : > { %v3713_v23 = vpop.f32.mrf.mxu0 }
 0x3f5   : > { %v3771_v8 = vpop.f32.mrf.mxu1  ;;  %v4242_v9 = vmul.f32 %v5721_v6, %v3713_v23 }
 0x3f6   : > { %v8456_v31 = vmul.f32 %v5719_v29, %v3771_v8  ;;  %v3424_v34 = vpop.xlane.xlu1 %3423  ;;  %v3854_v29 = vunpack.c.l.b16 %v3611_v43  ;;  %v4307_v8 = vpack.c.bf16 %v8392_v16, %v8392_v16  ;;  %v3509_v43 = vsel %vm464_vm0, %v8412_v41, 0.0  ;;  %v3100_v41 = vpop.xlane.xlu2 %3099 }
 0x3f7   : > { %5726 = vrcp.f32 %v3424_v34  ;;  %v4306_v28 = vpack.c.bf16 %v4242_v9, %v4242_v9  ;;  %v8481_v9 = vpop.f32.mrf.mxu3  ;;  %v3506_v16 = vsel %vm464_vm0, %v8316_v26, 0.0 }
 0x3f8   : > { %5728 = vpow2.f32 %v3321_v14  ;;  %v8491_v14 = vunpack.c.l.b16 %v4307_v8  ;;  %v3232_v8 = vsub.f32 %v8208_v4, %v3100_v41  ;;  %v4310_v41 = vpack.c.bf16 %v8437_v30, %v8437_v30 }
 0x3f9   : > { %v8464_v35 = vpop.eup %5724  ;;  %v8468_v44 = vunpack.c.l.b16 %v4306_v28  ;;  %5730 = vrcp.f32 %v3439_v25 }
 0x3fa   : > { %3153 = vmax.xlane.f32.xlu2 %v3152_v21  ;;  %3174 = vmax.xlane.f32.xlu0 %v3173_v24  ;;  %v3612_v56 = vpack.c.bf16 %v8464_v35, %v8464_v35 }
 0x3fb   : > { %3192 = vmax.xlane.f32.xlu1 %v3191_v7 }
 0x3fc   : > { %v3855_v6 = vunpack.c.l.b16 %v3612_v56 }
 0x3fd   : > { %v5727_v1 = vpop.eup %5726  ;;  %v8476_v23 = vpop.f32.mrf.mxu1 }
 0x3fe   : > { %v4244_v46 = vmul.f32 %v5727_v1, %v8387_v20  ;;  %v3091_v54 = vpop.xlane.xlu1 %3090  ;;  %v3862_v34 = vpack.c.b16 %v3855_v6, %v3854_v29  ;;  %v3194_v20 = vsel %vm464_vm0, %v8481_v9, -inf  ;;  %v8501_v6 = vpop.f32.mrf.mxu2 }
 0x3ff   : > { %v3229_v28 = vsub.f32 %v8128_v49, %v3091_v54  ;;  %v8495_v49 = vpop.eup %5728 }
 0x400   : > { %v4308_v21 = vpack.c.bf16 %v4244_v46, %v4244_v46  ;;  %5378 = vmatmul.msk.bf16.vlgmr.msrb.gmra.mxu3 %vm464_vm0, %v3862_v34  ;;  %v5731_v25 = vpop.eup %5730  ;;  %v3614_v46 = vpack.c.bf16 %v8495_v49, %v8495_v49  ;;  %v3512_v34 = vsel %vm464_vm0, %v8427_v61, 0.0 }
 0x401   : > { %v3319_v24 = vmul.f32 1.442695, %v3229_v28 }
 0x402   : > { %3510 = vadd.xlane.f32.xlu2 %v3509_v43  ;;  %3507 = vadd.xlane.f32.xlu0 %v3506_v16  ;;  %v8493_v7 = vunpack.c.l.b16 %v4308_v21  ;;  %v3176_v21 = vsel %vm464_vm0, %v8501_v6, -inf  ;;  %v3325_v43 = vmul.f32 1.442695, %v3232_v8  ;;  %v8521_v8 = vunpack.c.l.b16 %v4310_v41 }
 0x403   : > { %5732 = vpow2.f32 %v3319_v24  ;;  %3195 = vmax.xlane.f32.xlu1 %v3194_v20  ;;  %v3857_v24 = vunpack.c.l.b16 %v3614_v46  ;;  %v8514_v20 = vpop.f32.mrf.mxu3 }
 0x404   : > { %v3197_v46 = vsel %vm464_vm0, %v8514_v20, -inf }
 0x405   : > { %v3776_v1 = vpop.f32.mrf.mxu1 }
 0x406   : > { %v8499_v26 = vmul.f32 %v5731_v25, %v3776_v1  ;;  %v3427_v29 = vpop.xlane.xlu1 %3426 }
 0x407   : > { %5734 = vrcp.f32 %v3427_v29 }
 0x408   : > { %5736 = vpow2.f32 %v3325_v43 }
 0x409   : > { %v8506_v54 = vpop.eup %5732 }
 0x40a   : > { %v3613_v28 = vpack.c.bf16 %v8506_v54, %v8506_v54  ;;  %3513 = vadd.xlane.f32.xlu0 %v3512_v34 }
 0x40b   : > { %3177 = vmax.xlane.f32.xlu1 %v3176_v21 }
 0x40c   : > { %v3856_v4 = vunpack.c.l.b16 %v3613_v28 }
 0x40d   : > { %v5735_v16 = vpop.eup %5734 }
 0x40e   : > { %v4245_v25 = vmul.f32 %v5735_v16, %v8410_v38  ;;  %v3097_v61 = vpop.xlane.xlu1 %3096  ;;  %v3863_v1 = vpack.c.b16 %v3857_v24, %v3856_v4  ;;  %v8529_v30 = vpop.eup %5736 }
 0x40f   : > { %v3231_v29 = vsub.f32 %v8186_v3, %v3097_v61  ;;  %v8531_v3 = vpop.f32.mrf.mxu3  ;;  %v3616_v43 = vpack.c.bf16 %v8529_v30, %v8529_v30 }
 0x410   : > { %v4309_v34 = vpack.c.bf16 %v4245_v25, %v4245_v25  ;;  %5379 = vmatmul.msk.bf16.gmra.mxu3 %vm464_vm0, %v3863_v1 }
 0x411   : > { %v3323_v56 = vmul.f32 1.442695, %v3231_v29  ;;  %v3859_v16 = vunpack.c.l.b16 %v3616_v43  ;;  %v4311_v29 = vpack.c.bf16 %v8456_v31, %v8456_v31 }
 0x412   : > { %v8525_v28 = vunpack.c.l.b16 %v4309_v34 }
 0x413   : > { %5738 = vpow2.f32 %v3323_v56  ;;  %3198 = vmax.xlane.f32.xlu1 %v3197_v46  ;;  %v3200_v56 = vsel %vm464_vm0, %v8531_v3, -inf  ;;  %v8547_v43 = vunpack.c.l.b16 %v4311_v29 }
 0x416   : > { %v3436_v21 = vpop.xlane.xlu1 %3435 }
 0x417   : > { %5740 = vrcp.f32 %v3436_v21 }
 0x419   : > { %v8535_v24 = vpop.eup %5738 }
 0x41a   : > { %v3615_v4 = vpack.c.bf16 %v8535_v24, %v8535_v24 }
 0x41b   : > { %3201 = vmax.xlane.f32.xlu1 %v3200_v56 }
 0x41c   : > { %v3858_v41 = vunpack.c.l.b16 %v3615_v4 }
 0x41d   : > { %v3157_v25 = vpop.xlane.xlu2 %3156  ;;  %v5741_v61 = vpop.eup %5740 }
 0x41e   : > { %v3251_v1 = vsub.f32 %v8265_v15, %v3157_v25  ;;  %v4248_v34 = vmul.f32 %v5741_v61, %v8476_v23  ;;  %v3133_v46 = vpop.xlane.xlu1 %3132  ;;  %v3864_v21 = vpack.c.b16 %v3859_v16, %v3858_v41 }
 0x41f   : > { %v3243_v50 = vsub.f32 %v8237_v58, %v3133_v46 }
 0x420   : > { %v3363_v38 = vmul.f32 1.442695, %v3251_v1  ;;  %v4312_v62 = vpack.c.bf16 %v4248_v34, %v4248_v34  ;;  %5380 = vmatmul.msk.bf16.gmra.mxu3 %vm464_vm0, %v3864_v21 }
 0x421   : > { %v3347_v17 = vmul.f32 1.442695, %v3243_v50 }
 0x422   : > { %5742 = vpow2.f32 %v3363_v38  ;;  %v8549_v4 = vunpack.c.l.b16 %v4312_v62 }
 0x423   : > { %5744 = vpow2.f32 %v3347_v17 }
 0x425   : > { %v3136_v15 = vpop.xlane.xlu2 %3135  ;;  %v3160_v56 = vpop.xlane.xlu0 %3159 }
 0x426   : > { %v3244_v23 = vsub.f32 %v8247_v47, %v3136_v15  ;;  %v3252_v16 = vsub.f32 %v8275_v12, %v3160_v56  ;;  %v3103_v58 = vpop.xlane.xlu1 %3102 }
 0x427   : > { %v3233_v25 = vsub.f32 %v8261_v36, %v3103_v58 }
 0x428   : > { %v5743_v41 = vpop.eup %5742  ;;  %v3349_v38 = vmul.f32 1.442695, %v3244_v23  ;;  %v3365_v50 = vmul.f32 1.442695, %v3252_v16 }
 0x429   : > { %v3539_v61 = vsel %vm464_vm0, %v5743_v41, 0.0  ;;  %v5745_v62 = vpop.eup %5744  ;;  %v3327_v17 = vmul.f32 1.442695, %v3233_v25  ;;  %v3635_v15 = vpack.c.bf16 %v5743_v41, %v5743_v41 }
 0x42a   : > { %5746 = vpow2.f32 %v3349_v38  ;;  %3540 = vadd.xlane.f32.xlu0 %v3539_v61  ;;  %v3515_v1 = vsel %vm464_vm0, %v5745_v62, 0.0  ;;  %v3627_v46 = vpack.c.bf16 %v5745_v62, %v5745_v62 }
 0x42b   : > { %5748 = vpow2.f32 %v3365_v50  ;;  %3516 = vadd.xlane.f32.xlu1 %v3515_v1  ;;  %v4049_v62 = vunpack.c.l.b16 %v3635_v15 }
 0x42c   : > { %5750 = vpow2.f32 %v3327_v17  ;;  %v3984_v61 = vunpack.c.l.b16 %v3627_v46 }
 0x42d   : > { %v3106_v29 = vpop.xlane.xlu2 %3105  ;;  %v3181_v47 = vpop.xlane.xlu0 %3180 }
 0x42e   : > { %v3234_v12 = vsub.f32 %v8271_v5, %v3106_v29  ;;  %v3259_v34 = vsub.f32 %v8283_v11, %v3181_v47  ;;  %v8560_v21 = vpop.xlane.xlu1 %3444 }
 0x430   : > { %v5747_v36 = vpop.eup %5746  ;;  %v3329_v56 = vmul.f32 1.442695, %v3234_v12  ;;  %v3379_v23 = vmul.f32 1.442695, %v3259_v34 }
 0x431   : > { %v5749_v16 = vpop.eup %5748  ;;  %v3628_v58 = vpack.c.bf16 %v5747_v36, %v5747_v36  ;;  %v3518_v38 = vsel %vm464_vm0, %v5747_v36, 0.0 }
 0x432   : > { %v3636_v50 = vpack.c.bf16 %v5749_v16, %v5749_v16  ;;  %5752 = vpow2.f32 %v3329_v56  ;;  %3519 = vadd.xlane.f32.xlu2 %v3518_v38  ;;  %v3542_v25 = vsel %vm464_vm0, %v5749_v16, 0.0  ;;  %v8564_v11 = vpop.eup %5750 }
 0x433   : > { %v3985_v5 = vunpack.c.l.b16 %v3628_v58  ;;  %5754 = vpow2.f32 %v3379_v23  ;;  %3543 = vadd.xlane.f32.xlu0 %v3542_v25  ;;  %9415 = vst [vmem:[#allocation101_spill] sm:$0xff] %v8564_v11  ;;  %v3617_v34 = vpack.c.bf16 %v8564_v11, %v8564_v11 }
 0x434   : > { %v4050_v17 = vunpack.c.l.b16 %v3636_v50 }
 0x435   : > { %v3992_v41 = vpack.c.b16 %v3985_v5, %v3984_v61  ;;  %v3442_v1 = vpop.xlane.xlu2 %3441  ;;  %v3163_v29 = vpop.xlane.xlu0 %3162  ;;  %v3860_v38 = vunpack.c.l.b16 %v3617_v34 }
 0x436   : > { %v4057_v47 = vpack.c.b16 %v4050_v17, %v4049_v62  ;;  %5756 = vrcp.f32 %v3442_v1  ;;  %v3253_v12 = vsub.f32 %v8297_v52, %v3163_v29  ;;  %v3184_v46 = vpop.xlane.xlu1 %3183  ;;  %v3778_v61 = vpop.f32.mrf.mxu1 }
 0x437   : > { %5386 = vmatmul.msk.bf16.vlgmr.msrb.gmra.mxu1 %vm464_vm0, %v3992_v41  ;;  %v3260_v15 = vsub.f32 %v8300_v27, %v3184_v46  ;;  %v4313_v27 = vpack.c.bf16 %v8499_v26, %v8499_v26 }
 0x438   : > { %v8570_v36 = vpop.eup %5752  ;;  %v3367_v56 = vmul.f32 1.442695, %v3253_v12  ;;  %5390 = vmatmul.msk.bf16.vlgmr.msrb.gmra.mxu2 %vm464_vm0, %v4057_v47 }
 0x439   : > { %v5755_v23 = vpop.eup %5754  ;;  %v3618_v16 = vpack.c.bf16 %v8570_v36, %v8570_v36  ;;  %v3381_v58 = vmul.f32 1.442695, %v3260_v15  ;;  %v8588_v26 = vunpack.c.l.b16 %v4313_v27 }
 0x43a   : > { %5758 = vpow2.f32 %v3367_v56  ;;  %v3563_v52 = vsel %vm464_vm0, %v5755_v23, 0.0 }
 0x43b   : > { %v3861_v50 = vunpack.c.l.b16 %v3618_v16  ;;  %3564 = vadd.xlane.f32.xlu2 %v3563_v52  ;;  %5760 = vpow2.f32 %v3381_v58  ;;  %9417 = vst [vmem:[#allocation103_spill] sm:$0xff] %v8588_v26 }
 0x43c   : > { %v5757_v25 = vpop.eup %5756 }
 0x43d   : > { %v4250_v5 = vmul.f32 %v5757_v25, %v3778_v61  ;;  %v3139_v62 = vpop.xlane.xlu2 %3138  ;;  %v3142_v17 = vpop.xlane.xlu0 %3141  ;;  %v3865_v41 = vpack.c.b16 %v3861_v50, %v3860_v38 }
 0x43e   : > { %v3245_v1 = vsub.f32 %v8255_v53, %v3139_v62  ;;  %v3246_v29 = vsub.f32 %v8263_v59, %v3142_v17  ;;  %v3166_v12 = vpop.xlane.xlu1 %3165  ;;  %v3826_v59 = vpop.f32.mrf.mxu2 }
 0x43f   : > { %v4314_v47 = vpack.c.bf16 %v4250_v5, %v4250_v5  ;;  %5381 = vmatmul.msk.bf16.gmra.mxu3 %vm464_vm0, %v3865_v41  ;;  %v3254_v15 = vsub.f32 %v8318_v22, %v3166_v12  ;;  %v8594_v61 = vpop.f32.mrf.mxu0  ;;  %v3643_v5 = vpack.c.bf16 %v5755_v23, %v5755_v23 }
 0x440   : > { %v5759_v34 = vpop.eup %5758  ;;  %v3351_v46 = vmul.f32 1.442695, %v3245_v1  ;;  %v3353_v56 = vmul.f32 1.442695, %v3246_v29 }
 0x441   : > { %v3545_v16 = vsel %vm464_vm0, %v5759_v34, 0.0  ;;  %v8584_v58 = vunpack.c.l.b16 %v4314_v47  ;;  %v8586_v52 = vpop.eup %5760  ;;  %v3369_v53 = vmul.f32 1.442695, %v3254_v15  ;;  %v3637_v27 = vpack.c.bf16 %v5759_v34, %v5759_v34 }
 0x442   : > { %5762 = vpow2.f32 %v3351_v46  ;;  %v3644_v22 = vpack.c.bf16 %v8586_v52, %v8586_v52  ;;  %v4114_v15 = vunpack.c.l.b16 %v3643_v5 }
 0x443   : > { %9416 = vst [vmem:[#allocation102_spill] sm:$0xff] %v8584_v58  ;;  %5764 = vpow2.f32 %v3353_v56  ;;  %3546 = vadd.xlane.f32.xlu2 %v3545_v16  ;;  %v4051_v38 = vunpack.c.l.b16 %v3637_v27 }
 0x444   : > { %5766 = vpow2.f32 %v3369_v53  ;;  %v4115_v1 = vunpack.c.l.b16 %v3644_v22 }
 0x445   : > { %v3493_v50 = vpop.xlane.xlu2 %3492  ;;  %v3496_v25 = vpop.xlane.xlu0 %3495  ;;  %5768 = vrcp.f32 %v8560_v21 }
 0x446   : > { %v3187_v62 = vpop.xlane.xlu1 %3186  ;;  %v4122_v31 = vpack.c.b16 %v4115_v1, %v4114_v15  ;;  %v3828_v34 = vpop.f32.mrf.mxu2 }
 0x447   : > { %v3958_v5 = vpop.f32.mrf.mxu0 }
 0x448   : > { %v5763_v17 = vpop.eup %5762 }
 0x449   : > { %v5765_v41 = vpop.eup %5764  ;;  %v3629_v29 = vpack.c.bf16 %v5763_v17, %v5763_v17  ;;  %v3521_v47 = vsel %vm464_vm0, %v5763_v17, 0.0 }
 0x44a   : > { %v5767_v12 = vpop.eup %5766  ;;  %v3630_v46 = vpack.c.bf16 %v5765_v41, %v5765_v41  ;;  %v3524_v56 = vsel %vm464_vm0, %v5765_v41, 0.0  ;;  %3522 = vadd.xlane.f32.xlu1 %v3521_v47 }
 0x44b   : > { %v3986_v16 = vunpack.c.l.b16 %v3629_v29  ;;  %v3638_v53 = vpack.c.bf16 %v5767_v12, %v5767_v12  ;;  %3525 = vadd.xlane.f32.xlu2 %v3524_v56  ;;  %v5769_v26 = vpop.eup %5768  ;;  %v3548_v1 = vsel %vm464_vm0, %v5767_v12, 0.0 }
 0x44c   : > { %v3987_v23 = vunpack.c.l.b16 %v3630_v46  ;;  %v4251_v29 = vmul.f32 %v5769_v26, %v3826_v59 }
 0x44d   : > { %v4052_v11 = vunpack.c.l.b16 %v3638_v53  ;;  %v3448_v21 = vpop.xlane.xlu2 %3447  ;;  %v3145_v22 = vpop.xlane.xlu0 %3144 }
 0x44e   : > { %5770 = vrcp.f32 %v3448_v21  ;;  %v3993_v58 = vpack.c.b16 %v3987_v23, %v3986_v16  ;;  %v3247_v17 = vsub.f32 %v8273_v55, %v3145_v22  ;;  %v3451_v41 = vpop.xlane.xlu1 %3450  ;;  %v4315_v56 = vpack.c.bf16 %v4251_v29, %v4251_v29 }
 0x44f   : > { %5394 = vmatmul.msk.bf16.vlgmr.msra.gmra.mxu3 %vm464_vm0, %v4122_v31  ;;  %v4058_v47 = vpack.c.b16 %v4052_v11, %v4051_v38  ;;  %5772 = vrcp.f32 %v3451_v41  ;;  %v3261_v31 = vsub.f32 %v8350_v60, %v3187_v62 }
 0x450   : > { %5387 = vmatmul.msk.bf16.gmra.mxu1 %vm464_vm0, %v3993_v58  ;;  %v3355_v27 = vmul.f32 1.442695, %v3247_v17  ;;  %v3961_v17 = vpop.f32.mrf.mxu0 }
 0x451   : > { %5391 = vmatmul.msk.bf16.gmra.mxu2 %vm464_vm0, %v4058_v47  ;;  %v3383_v60 = vmul.f32 1.442695, %v3261_v31 }
 0x452   : > { %5774 = vpow2.f32 %v3355_v27  ;;  %v3831_v11 = vpop.f32.mrf.mxu2 }
 0x453   : > { %3549 = vadd.xlane.f32.xlu2 %v3548_v1  ;;  %5776 = vrcp.f32 %v3493_v50 }
 0x454   : > { %v5771_v46 = vpop.eup %5770  ;;  %5778 = vrcp.f32 %v3496_v25 }
 0x455   : > { %v4252_v15 = vmul.f32 %v5771_v46, %v3828_v34  ;;  %v3499_v55 = vpop.xlane.xlu2 %3498  ;;  %v5773_v16 = vpop.eup %5772  ;;  %v8609_v34 = vunpack.c.l.b16 %v4315_v56 }
 0x456   : > { %v3169_v38 = vpop.xlane.xlu0 %3168  ;;  %v8605_v53 = vmul.f32 %v5773_v16, %v3831_v11  ;;  %v3148_v59 = vpop.xlane.xlu1 %3147  ;;  %5780 = vrcp.f32 %v3499_v55 }
 0x457   : > { %v4316_v58 = vpack.c.bf16 %v4252_v15, %v4252_v15  ;;  %v3255_v26 = vsub.f32 %v8379_v0, %v3169_v38  ;;  %v3248_v12 = vsub.f32 %v8293_v32, %v3148_v59 }
 0x458   : > { %v5775_v23 = vpop.eup %5774 }
 0x459   : > { %v3371_v21 = vmul.f32 1.442695, %v3255_v26  ;;  %v8611_v22 = vunpack.c.l.b16 %v4316_v58  ;;  %v3357_v62 = vmul.f32 1.442695, %v3248_v12  ;;  %v3527_v50 = vsel %vm464_vm0, %v5775_v23, 0.0  ;;  %v5777_v25 = vpop.eup %5776 }
 0x45a   : > { %3528 = vadd.xlane.f32.xlu0 %v3527_v50  ;;  %v5779_v41 = vpop.eup %5778  ;;  %v4267_v55 = vmul.f32 %v5777_v25, %v8594_v61  ;;  %v3631_v31 = vpack.c.bf16 %v5775_v23, %v5775_v23 }
 0x45b   : > { %5782 = vpow2.f32 %v3371_v21  ;;  %v4268_v16 = vmul.f32 %v5779_v41, %v3958_v5  ;;  %v3963_v21 = vpop.f32.mrf.mxu0 }
 0x45c   : > { %5784 = vpow2.f32 %v3357_v62  ;;  %v5781_v27 = vpop.eup %5780  ;;  %v3988_v62 = vunpack.c.l.b16 %v3631_v31 }
 0x45d   : > { %v3190_v32 = vpop.xlane.xlu2 %3189  ;;  %5786 = vpow2.f32 %v3383_v60  ;;  %v4269_v38 = vmul.f32 %v5781_v27, %v3961_v17  ;;  %v4331_v60 = vpack.c.bf16 %v4267_v55, %v4267_v55 }
 0x45e   : > { %v3262_v47 = vsub.f32 %v8406_v48, %v3190_v32  ;;  %v3502_v29 = vpop.xlane.xlu0 %3501  ;;  %v3172_v1 = vpop.xlane.xlu1 %3171 }
 0x45f   : > { %5788 = vrcp.f32 %v3502_v29  ;;  %v3256_v56 = vsub.f32 %v8408_v63, %v3172_v1  ;;  %v4332_v63 = vpack.c.bf16 %v4268_v16, %v4268_v16  ;;  %v4333_v5 = vpack.c.bf16 %v4269_v38, %v4269_v38 }
 0x460   : > { %v3385_v46 = vmul.f32 1.442695, %v3262_v47  ;;  %v4475_v1 = vunpack.c.l.b16 %v4331_v60 }
 0x461   : > { %v5783_v15 = vpop.eup %5782  ;;  %v3373_v58 = vmul.f32 1.442695, %v3256_v56  ;;  %v4477_v31 = vunpack.c.l.b16 %v4333_v5 }
 0x462   : > { %v5785_v11 = vpop.eup %5784  ;;  %5790 = vpow2.f32 %v3385_v46  ;;  %v3551_v26 = vsel %vm464_vm0, %v5783_v15, 0.0  ;;  %v4476_v46 = vunpack.c.l.b16 %v4332_v63  ;;  %v3639_v56 = vpack.c.bf16 %v5783_v15, %v5783_v15  ;;  %v3833_v63 = vpop.f32.mrf.mxu2 }
 0x463   : > { %v3632_v59 = vpack.c.bf16 %v5785_v11, %v5785_v11  ;;  %3552 = vadd.xlane.f32.xlu1 %v3551_v26  ;;  %v8620_v48 = vpop.eup %5786  ;;  %5792 = vpow2.f32 %v3373_v58  ;;  %v3530_v26 = vsel %vm464_vm0, %v5785_v11, 0.0 }
 0x464   : > { %v3645_v17 = vpack.c.bf16 %v8620_v48, %v8620_v48  ;;  %v4053_v60 = vunpack.c.l.b16 %v3639_v56 }
 0x465   : > { %v5789_v12 = vpop.eup %5788  ;;  %v3989_v50 = vunpack.c.l.b16 %v3632_v59  ;;  %v3505_v61 = vpop.xlane.xlu2 %3504 }
 0x466   : > { %v4270_v23 = vmul.f32 %v5789_v12, %v3963_v21  ;;  %v3454_v25 = vpop.xlane.xlu0 %3453  ;;  %v3151_v32 = vpop.xlane.xlu1 %3150  ;;  %v4116_v59 = vunpack.c.l.b16 %v3645_v17 }
 0x467   : > { %5794 = vrcp.f32 %v3454_v25  ;;  %v3994_v41 = vpack.c.b16 %v3989_v50, %v3988_v62  ;;  %v3249_v27 = vsub.f32 %v8312_v57, %v3151_v32  ;;  %v4317_v32 = vpack.c.bf16 %v8605_v53, %v8605_v53 }
 0x468   : > { %v8624_v47 = vpop.eup %5790  ;;  %v4334_v29 = vpack.c.bf16 %v4270_v23, %v4270_v23  ;;  %v4507_v23 = vpack.c.b16 %v4476_v46, %v4475_v1 }
 0x469   : > { %v3646_v55 = vpack.c.bf16 %v8624_v47, %v8624_v47  ;;  %5388 = vmatmul.msk.bf16.gmra.mxu1 %vm464_vm0, %v3994_v41  ;;  %v5793_v16 = vpop.eup %5792  ;;  %v3359_v58 = vmul.f32 1.442695, %v3249_v27 }
 0x46a   : > { %v4478_v38 = vunpack.c.l.b16 %v4334_v29  ;;  %v3640_v21 = vpack.c.bf16 %v5793_v16, %v5793_v16  ;;  %v3554_v56 = vsel %vm464_vm0, %v5793_v16, 0.0 }
 0x46b   : > { %v4117_v12 = vunpack.c.l.b16 %v3646_v55  ;;  %3531 = vadd.xlane.f32.xlu1 %v3530_v26  ;;  %5796 = vpow2.f32 %v3359_v58 }
 0x46c   : > { %v4508_v62 = vpack.c.b16 %v4478_v38, %v4477_v31  ;;  %v4054_v15 = vunpack.c.l.b16 %v3640_v21  ;;  %5798 = vrcp.f32 %v3505_v61  ;;  %v3966_v31 = vpop.f32.mrf.mxu0 }
 0x46d   : > { %v5795_v57 = vpop.eup %5794  ;;  %v3154_v50 = vpop.xlane.xlu2 %3153  ;;  %v4123_v25 = vpack.c.b16 %v4117_v12, %v4116_v59 }
 0x46e   : > { %v4254_v5 = vmul.f32 %v5795_v57, %v3833_v63  ;;  %v3250_v41 = vsub.f32 %v8348_v42, %v3154_v50  ;;  %v3175_v11 = vpop.xlane.xlu0 %3174  ;;  %4525 = vrot.lane.b32.xlu2 %v4508_v62, %s5906_s29  ;;  %4523 = vrot.lane.b32.xlu0 %v4507_v23, %s5906_s29  ;;  %v3193_v17 = vpop.xlane.xlu1 %3192  ;;  %v4059_v29 = vpack.c.b16 %v4054_v15, %v4053_v60  ;;  %v8640_v42 = vunpack.c.l.b16 %v4317_v32 }
 0x46f   : > { %5395 = vmatmul.msk.bf16.gmra.mxu3 %vm464_vm0, %v4123_v25  ;;  %v3263_v46 = vsub.f32 %v8448_v13, %v3193_v17  ;;  %v3257_v53 = vsub.f32 %v8452_v40, %v3175_v11 }
 0x470   : > { %v4318_v27 = vpack.c.bf16 %v4254_v5, %v4254_v5  ;;  %v3361_v1 = vmul.f32 1.442695, %v3250_v41  ;;  %5392 = vmatmul.msk.bf16.gmra.mxu2 %vm464_vm0, %v4059_v29 }
 0x471   : > { %v5797_v38 = vpop.eup %5796  ;;  %v3387_v58 = vmul.f32 1.442695, %v3263_v46  ;;  %v3375_v13 = vmul.f32 1.442695, %v3257_v53 }
 0x472   : > { %5800 = vpow2.f32 %v3361_v1  ;;  %v8643_v55 = vunpack.c.l.b16 %v4318_v27  ;;  %v5799_v59 = vpop.eup %5798  ;;  %v3633_v40 = vpack.c.bf16 %v5797_v38, %v5797_v38  ;;  %v3533_v63 = vsel %vm464_vm0, %v5797_v38, 0.0 }
 0x473   : > { %3555 = vadd.xlane.f32.xlu1 %v3554_v56  ;;  %v4271_v57 = vmul.f32 %v5799_v59, %v3966_v31 }
 0x474   : > { %v3990_v15 = vunpack.c.l.b16 %v3633_v40  ;;  %v3968_v25 = vpop.f32.mrf.mxu0 }
 0x475   : > { %v4335_v41 = vpack.c.bf16 %v4271_v57, %v4271_v57 }
 0x476   : > { %v3508_v61 = vpop.xlane.xlu0 %3507  ;;  %v3196_v12 = vpop.xlane.xlu1 %3195 }
 0x477   : > { %5802 = vrcp.f32 %v3508_v61  ;;  %v3264_v62 = vsub.f32 %v8481_v9, %v3196_v12  ;;  %v4479_v53 = vunpack.c.l.b16 %v4335_v41 }
 0x478   : > { %v5801_v21 = vpop.eup %5800  ;;  %5804 = vpow2.f32 %v3387_v58 }
 0x479   : > { %v3634_v16 = vpack.c.bf16 %v5801_v21, %v5801_v21  ;;  %5806 = vpow2.f32 %v3375_v13  ;;  %v3389_v60 = vmul.f32 1.442695, %v3264_v62  ;;  %v3536_v57 = vsel %vm464_vm0, %v5801_v21, 0.0 }
 0x47b   : > { %v3991_v50 = vunpack.c.l.b16 %v3634_v16  ;;  %3534 = vadd.xlane.f32.xlu1 %v3533_v63  ;;  %5808 = vpow2.f32 %v3389_v60 }
 0x47c   : > { %v3971_v21 = vpop.f32.mrf.mxu0 }
 0x47d   : > { %v5803_v23 = vpop.eup %5802  ;;  %v3995_v32 = vpack.c.b16 %v3991_v50, %v3990_v15 }
 0x47e   : > { %v8649_v5 = vpop.eup %5804  ;;  %v4272_v11 = vmul.f32 %v5803_v23, %v3968_v25  ;;  %v3178_v9 = vpop.xlane.xlu1 %3177 }
 0x47f   : > { %v5807_v17 = vpop.eup %5806  ;;  %5389 = vmatmul.msk.bf16.gmra.mxu1 %vm464_vm0, %v3995_v32  ;;  %v3258_v27 = vsub.f32 %v8501_v6, %v3178_v9  ;;  %v3647_v1 = vpack.c.bf16 %v8649_v5, %v8649_v5  ;;  %v3566_v9 = vsel %vm464_vm0, %v8586_v52, 0.0 }
 0x480   : > { %v4336_v29 = vpack.c.bf16 %v4272_v11, %v4272_v11  ;;  %v3557_v38 = vsel %vm464_vm0, %v5807_v17, 0.0  ;;  %v3641_v62 = vpack.c.bf16 %v5807_v17, %v5807_v17  ;;  %v3514_v11 = vpop.xlane.xlu0 %3513 }
 0x481   : > { %v8655_v46 = vpop.eup %5808  ;;  %v3377_v31 = vmul.f32 1.442695, %v3258_v27  ;;  %v4118_v61 = vunpack.c.l.b16 %v3647_v1 }
 0x482   : > { %v4480_v56 = vunpack.c.l.b16 %v4336_v29  ;;  %v3648_v58 = vpack.c.bf16 %v8655_v46, %v8655_v46  ;;  %v4055_v15 = vunpack.c.l.b16 %v3641_v62  ;;  %v3511_v29 = vpop.xlane.xlu2 %3510  ;;  %v8678_v62 = vpop.f32.mrf.mxu2 }
 0x483   : > { %3558 = vadd.xlane.f32.xlu1 %v3557_v38  ;;  %5810 = vpow2.f32 %v3377_v31 }
 0x484   : > { %v4509_v13 = vpack.c.b16 %v4480_v56, %v4479_v53  ;;  %v4119_v59 = vunpack.c.l.b16 %v3648_v58 }
 0x486   : > { %4527 = vrot.lane.b32.xlu0 %v4509_v13, %s5906_s29  ;;  %v3199_v6 = vpop.xlane.xlu1 %3198  ;;  %v4124_v40 = vpack.c.b16 %v4119_v59, %v4118_v61  ;;  %v3973_v13 = vpop.f32.mrf.mxu0 }
 0x487   : > { %v3265_v12 = vsub.f32 %v8514_v20, %v3199_v6 }
 0x488   : > { %5396 = vmatmul.msk.bf16.gmra.mxu3 %vm464_vm0, %v4124_v40 }
 0x489   : > { %v5811_v16 = vpop.eup %5810  ;;  %v3391_v63 = vmul.f32 1.442695, %v3265_v12 }
 0x48a   : > { %v3642_v60 = vpack.c.bf16 %v5811_v16, %v5811_v16  ;;  %v3560_v20 = vsel %vm464_vm0, %v5811_v16, 0.0 }
 0x48b   : > { %3537 = vadd.xlane.f32.xlu1 %v3536_v57  ;;  %5812 = vpow2.f32 %v3391_v63 }
 0x48c   : > { %v4056_v50 = vunpack.c.l.b16 %v3642_v60 }
 0x48e   : > { %v3202_v23 = vpop.xlane.xlu1 %3201  ;;  %v4060_v25 = vpack.c.b16 %v4056_v50, %v4055_v15  ;;  %v8683_v15 = vpop.f32.mrf.mxu2 }
 0x48f   : > { %v3266_v32 = vsub.f32 %v8531_v3, %v3202_v23 }
 0x490   : > { %5393 = vmatmul.msk.bf16.gmra.mxu2 %vm464_vm0, %v4060_v25 }
 0x491   : > { %v3393_v41 = vmul.f32 1.442695, %v3266_v32  ;;  %v8667_v17 = vpop.eup %5812  ;;  %v8687_v32 = vpop.f32.mrf.mxu3 }
 0x492   : > { %v3649_v3 = vpack.c.bf16 %v8667_v17, %v8667_v17 }
 0x493   : > { %3561 = vadd.xlane.f32.xlu1 %v3560_v20  ;;  %5814 = vpow2.f32 %v3393_v41  ;;  %v5483_v20 = vld [vmem:[%s9112_s4 + $0x18] sm:$0xff] }
 0x494   : > { %5816 = vrcp.f32 %v3514_v11  ;;  %v4120_v53 = vunpack.c.l.b16 %v3649_v3  ;;  %4815 = vmatpush.bf16.msrb.mxu0 %v5483_v20  ;;  %v5482_v3 = vld [vmem:[%s9112_s4 + $0x10] sm:$0xff] }
 0x495   : > { %5818 = vrcp.f32 %v3511_v29 }
 0x497   : > { %3567 = vadd.xlane.f32.xlu2 %v3566_v9 }
 0x498   : > { %4816 = vmatpush.bf16.msrb.mxu0 %v5482_v3 }
 0x499   : > { %v8673_v27 = vpop.eup %5814 }
 0x49a   : > { %v3650_v1 = vpack.c.bf16 %v8673_v27, %v8673_v27  ;;  %v5817_v31 = vpop.eup %5816 }
 0x49b   : > { %v5819_v58 = vpop.eup %5818  ;;  %v4274_v61 = vmul.f32 %v5817_v31, %v3973_v13  ;;  %v8700_v13 = vpop.f32.mrf.mxu3 }
 0x49c   : > { %v4121_v56 = vunpack.c.l.b16 %v3650_v1  ;;  %v4273_v52 = vmul.f32 %v5819_v58, %v3971_v21  ;;  %v8695_v1 = vpop.f32.mrf.mxu2  ;;  %v5481_v58 = vld [vmem:[%s9112_s4 + $0x8] sm:$0xff] }
 0x49d   : > { %v4338_v59 = vpack.c.bf16 %v4274_v61, %v4274_v61  ;;  %4817 = vmatpush.bf16.msrb.mxu0 %v5481_v58 }
 0x49e   : > { %v4125_v38 = vpack.c.b16 %v4121_v56, %v4120_v53  ;;  %v4337_v40 = vpack.c.bf16 %v4273_v52, %v4273_v52  ;;  %v3517_v63 = vpop.xlane.xlu1 %3516  ;;  %v5480_v52 = vld [vmem:[%s9112_s4] sm:$0xff] }
 0x49f   : > { %v4482_v12 = vunpack.c.l.b16 %v4338_v59  ;;  %5820 = vrcp.f32 %v3517_v63 }
 0x4a0   : > { %5397 = vmatmul.msk.bf16.gmra.mxu3 %vm464_vm0, %v4125_v38  ;;  %v4481_v16 = vunpack.c.l.b16 %v4337_v40 }
 0x4a1   : > { %4818 = vmatpush.bf16.msrb.mxu0 %v5480_v52 }
 0x4a2   : > { %v4510_v57 = vpack.c.b16 %v4482_v12, %v4481_v16  ;;  %v2268_v16 = vpack.c.bf16 %v7725_v45, %v7725_v45 }
 0x4a3   : > { %v8714_v63 = vpop.f32.mrf.mxu3 }
 0x4a4   : > { %v8708_v40 = vpop.f32.mrf.mxu2  ;;  %9418 = vst [vmem:[#allocation104_spill] sm:$0xff] %v8714_v63 }
 0x4a5   : > { %v3520_v6 = vpop.xlane.xlu2 %3519  ;;  %v5821_v25 = vpop.eup %5820 }
 0x4a6   : > { %5822 = vrcp.f32 %v3520_v6  ;;  %v8706_v6 = vpop.xlane.xlu0 %3540 }
 0x4ab   : > { %v8728_v52 = vpop.f32.mrf.mxu3 }
 0x4ac   : > { %v5823_v11 = vpop.eup %5822 }
 0x4ae   : > { %v8680_v60 = vpop.xlane.xlu2 %3564 }
 0x4af   : > { %4529 = vrot.lane.b32.xlu2 %v4510_v57, %s5906_s29  ;;  %v2269_v57 = vpack.c.bf16 %v7773_v10, %v7773_v10 }
 0x4b4   : > { %v4021_v50 = vpop.f32.mrf.mxu1 }
 0x4b5   : > { %v4275_v41 = vmul.f32 %v5821_v25, %v4021_v50 }
 0x4b6   : > { %v8685_v23 = vpop.xlane.xlu2 %3546 }
 0x4b7   : > { %v4339_v9 = vpack.c.bf16 %v4275_v41, %v4275_v41  ;;  %v9419_v41 = vpack.c.b16 %v8383_v19, %v8381_v37 }
 0x4b9   : > { %v4483_v31 = vunpack.c.l.b16 %v4339_v9 }
 0x4bb   : > { %v8720_v9 = vpop.f32.mrf.mxu2 }
 0x4bc   : > { %v4023_v21 = vpop.f32.mrf.mxu1 }
 0x4bd   : > { %v4276_v29 = vmul.f32 %v5823_v11, %v4023_v21  ;;  %v3523_v12 = vpop.xlane.xlu1 %3522  ;;  %v4653_v11 = vunpack.c.l.bf16 %v2268_v16  ;;  %v4654_v21 = vunpack.c.l.bf16 %v2269_v57 }
 0x4be   : > { %v3526_v53 = vpop.xlane.xlu2 %3525  ;;  %5824 = vrcp.f32 %v3523_v12  ;;  %v3458_v12 = vsel %vm464_vm0, %v8363_v39, 0.0 }
 0x4bf   : > { %v4340_v56 = vpack.c.bf16 %v4276_v29, %v4276_v29  ;;  %5826 = vrcp.f32 %v3526_v53 }
 0x4c1   : > { %v4484_v38 = vunpack.c.l.b16 %v4340_v56  ;;  %v3544_v56 = vpop.xlane.xlu0 %3543 }
 0x4c3   : > { %v4511_v61 = vpack.c.b16 %v4484_v38, %v4483_v31 }
 0x4c4   : > { %v5825_v45 = vpop.eup %5824 }
 0x4c5   : > { %4531 = vrot.lane.b32.xlu1 %v4511_v61, %s5906_s29  ;;  %v5827_v58 = vpop.eup %5826 }
 0x4c6   : > { %v3550_v59 = vpop.xlane.xlu2 %3549 }
 0x4cd   : > { %v4026_v50 = vpop.f32.mrf.mxu1 }
 0x4ce   : > { %v4526_v25 = vpop.permute.xlu2 %4525  ;;  %v4277_v31 = vmul.f32 %v5825_v45, %v4026_v50  ;;  %v3529_v50 = vpop.xlane.xlu0 %3528 }
 0x4cf   : > { %v4561_v20 = vsel %vm2446_vm1, %v9419_v41, %v4526_v25  ;;  %v8732_v25 = vpop.f32.mrf.mxu2  ;;  %v8739_v45 = vpop.f32.mrf.mxu3  ;;  %5828 = vrcp.f32 %v3529_v50 }
 0x4d0   : > { %v4621_v29 = vunpack.c.l.bf16 %v4561_v20  ;;  %v4622_v3 = vunpack.c.h.bf16 %v4561_v20  ;;  %v4341_v19 = vpack.c.bf16 %v4277_v31, %v4277_v31 }
 0x4d2   : > { %v8722_v10 = vmul.f32 %v4653_v11, %v4621_v29  ;;  %v8724_v38 = vmul.f32 %v4654_v21, %v4622_v3  ;;  %v4485_v41 = vunpack.c.l.b16 %v4341_v19  ;;  %v2266_v21 = vpack.c.bf16 %v7646_v18, %v7646_v18  ;;  %v9420_v29 = vld [vmem:[#allocation10_spill] sm:$0xff] }
 0x4d3   : > { %v2267_v3 = vpack.c.bf16 %v9420_v29, %v9420_v29  ;;  %9421 = vst [vmem:[#allocation10_spill] sm:$0xff] %v8739_v45 }
 0x4d5   : > { %v4028_v37 = vpop.f32.mrf.mxu1  ;;  %v5829_v29 = vpop.eup %5828 }
 0x4d6   : > { %v4278_v61 = vmul.f32 %v5827_v58, %v4028_v37  ;;  %v3553_v57 = vpop.xlane.xlu1 %3552  ;;  %v9422_v37 = vld [vmem:[#allocation96_spill] sm:$0xff] }
 0x4d7   : > { %v4091_v31 = vpop.f32.mrf.mxu2  ;;  %v8746_v45 = vpop.f32.mrf.mxu3 }
 0x4d8   : > { %v4342_v16 = vpack.c.bf16 %v4278_v61, %v4278_v61  ;;  %3459 = vadd.xlane.f32.xlu2 %v3458_v12  ;;  %v9423_v61 = vld [vmem:[#allocation95_spill] sm:$0xff] }
 0x4d9   : > { %v9424_v12 = vpack.c.b16 %v9422_v37, %v9423_v61  ;;  %v9425_v61 = vld [vmem:[#allocation97_spill] sm:$0xff] }
 0x4da   : > { %v4486_v20 = vunpack.c.l.b16 %v4342_v16  ;;  %v4651_v16 = vunpack.c.l.bf16 %v2266_v21  ;;  %v3455_v50 = vsel %vm464_vm0, %v9425_v61, 0.0 }
 0x4dc   : > { %v4512_v11 = vpack.c.b16 %v4486_v20, %v4485_v41  ;;  %v4652_v41 = vunpack.c.l.bf16 %v2267_v3 }
 0x4de   : > { %4533 = vrot.lane.b32.xlu0 %v4512_v11, %s5906_s29  ;;  %v3532_v58 = vpop.xlane.xlu1 %3531 }
 0x4df   : > { %5830 = vrcp.f32 %v3532_v58 }
 0x4e0   : > { %v4524_v39 = vpop.permute.xlu0 %4523  ;;  %5832 = vrcp.f32 %v3550_v59  ;;  %v8751_v59 = vpop.f32.mrf.mxu3 }
 0x4e1   : > { %v4557_v19 = vsel %vm2446_vm1, %v9424_v12, %v4524_v39  ;;  %5834 = vrcp.f32 %v8685_v23  ;;  %v4093_v39 = vpop.f32.mrf.mxu2 }
 0x4e2   : > { %v4619_v20 = vunpack.c.l.bf16 %v4557_v19  ;;  %v4620_v11 = vunpack.c.h.bf16 %v4557_v19  ;;  %5836 = vrcp.f32 %v3553_v57 }
 0x4e3   : > { %5838 = vrcp.f32 %v3544_v56 }
 0x4e4   : > { %v4683_v0 = vmul.f32 %v4651_v16, %v4619_v20  ;;  %v4684_v18 = vmul.f32 %v4652_v41, %v4620_v11  ;;  %v9426_v11 = vld [vmem:[#allocation56_spill] sm:$0xff]  ;;  %5840 = vrcp.f32 %v8706_v6 }
 0x4e5   : > { %v5831_v3 = vpop.eup %5830 }
 0x4e6   : > { %v4031_v26 = vpop.f32.mrf.mxu1  ;;  %v4715_v53 = vpack.c.bf16 %v4684_v18, %v4683_v0  ;;  %v3556_v21 = vpop.xlane.xlu1 %3555  ;;  %v2270_v18 = vpack.c.bf16 %v9426_v11, %v9426_v11 }
 0x4e7   : > { %v4279_v63 = vmul.f32 %v5829_v29, %v4031_v26  ;;  %v5833_v0 = vpop.eup %5832  ;;  %5842 = vrcp.f32 %v3556_v21 }
 0x4e8   : > { %5414 = vmatmul.msk.bf16.vlgmr.msrb.gmra.mxu0 %vm464_vm0, %v4715_v53  ;;  %v4286_v58 = vmul.f32 %v5833_v0, %v4093_v39  ;;  %v5835_v16 = vpop.eup %5834  ;;  %v9428_v0 = vpack.c.b16 %v8431_v51, %v8429_v33  ;;  %v8769_v51 = vpop.f32.mrf.mxu3  ;;  %5844 = vrcp.f32 %v8680_v60 }
 0x4e9   : > { %v4343_v12 = vpack.c.bf16 %v4279_v63, %v4279_v63  ;;  %v4285_v26 = vmul.f32 %v5835_v16, %v4091_v31  ;;  %v5837_v56 = vpop.eup %5836 }
 0x4ea   : > { %v4350_v63 = vpack.c.bf16 %v4286_v58, %v4286_v58  ;;  %v5839_v61 = vpop.eup %5838  ;;  %v9429_v58 = vpack.c.bf16 %v8724_v38, %v8722_v10 }
 0x4eb   : > { %v4487_v23 = vunpack.c.l.b16 %v4343_v12  ;;  %v4349_v57 = vpack.c.bf16 %v4285_v26, %v4285_v26 }
 0x4ec   : > { %v4494_v12 = vunpack.c.l.b16 %v4350_v63 }
 0x4ee   : > { %v4033_v37 = vpop.f32.mrf.mxu1 }
 0x4ef   : > { %v4280_v19 = vmul.f32 %v5831_v3, %v4033_v37  ;;  %3456 = vadd.xlane.f32.xlu1 %v3455_v50  ;;  %v9427_v3 = vld [vmem:[#allocation58_spill] sm:$0xff]  ;;  %v3535_v37 = vpop.xlane.xlu1 %3534  ;;  %v4655_v50 = vunpack.c.l.bf16 %v2270_v18 }
 0x4f0   : > { %v2271_v39 = vpack.c.bf16 %v9427_v3, %v9427_v3 }
 0x4f1   : > { %v4344_v53 = vpack.c.bf16 %v4280_v19, %v4280_v19 }
 0x4f2   : > { %v4656_v21 = vunpack.c.l.bf16 %v2271_v39 }
 0x4f3   : > { %v4488_v41 = vunpack.c.l.b16 %v4344_v53  ;;  %v4096_v20 = vpop.f32.mrf.mxu2  ;;  %v4284_v53 = vmul.f32 %v5839_v61, %v8732_v25 }
 0x4f4   : > { %v4287_v19 = vmul.f32 %v5837_v56, %v4096_v20 }
 0x4f5   : > { %v4513_v29 = vpack.c.b16 %v4488_v41, %v4487_v23  ;;  %v5841_v23 = vpop.eup %5840  ;;  %v4493_v41 = vunpack.c.l.b16 %v4349_v57  ;;  %v4348_v38 = vpack.c.bf16 %v4284_v53, %v4284_v53 }
 0x4f6   : > { %v5843_v11 = vpop.eup %5842  ;;  %v4283_v20 = vmul.f32 %v5841_v23, %v8720_v9  ;;  %v4351_v3 = vpack.c.bf16 %v4287_v19, %v4287_v19  ;;  %v4151_v19 = vpop.f32.mrf.mxu3  ;;  %v9430_v23 = vld [vmem:[#allocation60_spill] sm:$0xff] }
 0x4f7   : > { %4535 = vrot.lane.b32.xlu2 %v4513_v29, %s5906_s29  ;;  %v4516_v29 = vpack.c.b16 %v4494_v12, %v4493_v41  ;;  %v4492_v9 = vunpack.c.l.b16 %v4348_v38  ;;  %v2272_v60 = vpack.c.bf16 %v9430_v23, %v9430_v23  ;;  %v3572_v41 = vsel %vm464_vm0, %v8624_v47, 0.0 }
 0x4f8   : > { %v4528_v31 = vpop.permute.xlu0 %4527  ;;  %5415 = vmatmul.msk.bf16.gmra.mxu0 %vm464_vm0, %v9429_v58  ;;  %v4347_v25 = vpack.c.bf16 %v4283_v20, %v4283_v20  ;;  %v8774_v57 = vunpack.c.l.b16 %v4351_v3 }
 0x4f9   : > { %v4565_v6 = vsel %vm2446_vm1, %v9428_v0, %v4528_v31  ;;  %v8772_v31 = vpop.xlane.xlu1 %3558 }
 0x4fa   : > { %v4623_v16 = vunpack.c.l.bf16 %v4565_v6  ;;  %v4624_v26 = vunpack.c.h.bf16 %v4565_v6  ;;  %v4491_v0 = vunpack.c.l.b16 %v4347_v25  ;;  %v3569_v6 = vsel %vm464_vm0, %v8620_v48, 0.0 }
 0x4fb   : > { %v4098_v33 = vpop.f32.mrf.mxu2 }
 0x4fc   : > { %v4687_v18 = vmul.f32 %v4655_v50, %v4623_v16  ;;  %v4688_v63 = vmul.f32 %v4656_v21, %v4624_v26  ;;  %v4288_v10 = vmul.f32 %v5843_v11, %v4098_v33  ;;  %v4515_v12 = vpack.c.b16 %v4492_v9, %v4491_v0  ;;  %v4036_v58 = vpop.f32.mrf.mxu1  ;;  %v5845_v16 = vpop.eup %5844  ;;  %v9431_v11 = vld [vmem:[#allocation62_spill] sm:$0xff] }
 0x4fd   : > { %v4291_v26 = vmul.f32 %v5845_v16, %v4151_v19  ;;  %v2273_v48 = vpack.c.bf16 %v9431_v11, %v9431_v11 }
 0x4fe   : > { %v4717_v56 = vpack.c.bf16 %v4688_v63, %v4687_v18  ;;  %v4352_v39 = vpack.c.bf16 %v4288_v10, %v4288_v10  ;;  %v4153_v63 = vpop.f32.mrf.mxu3  ;;  %v4657_v10 = vunpack.c.l.bf16 %v2272_v60 }
 0x4ff   : > { %4541 = vrot.lane.b32.xlu2 %v4516_v29, %s5906_s29  ;;  %v4355_v18 = vpack.c.bf16 %v4291_v26, %v4291_v26  ;;  %v4658_v25 = vunpack.c.l.bf16 %v2273_v48  ;;  %v9433_v48 = vld [vmem:[#allocation99_spill] sm:$0xff] }
 0x500   : > { %v8776_v61 = vunpack.c.l.b16 %v4352_v39 }
 0x501   : > { %v3538_v21 = vpop.xlane.xlu1 %3537 }
 0x502   : > { %v4517_v50 = vpack.c.b16 %v8776_v61, %v8774_v57  ;;  %v9449_v61 = vld [vmem:[#allocation40_spill] sm:$0xff] }
 0x504   : > { %v4038_v38 = vpop.f32.mrf.mxu1 }
 0x508   : > { %3570 = vadd.xlane.f32.xlu0 %v3569_v6  ;;  %4539 = vrot.lane.b32.xlu1 %v4515_v12, %s5906_s29  ;;  %v8795_v12 = vunpack.c.l.b16 %v4355_v18 }
 0x509   : > { %5416 = vmatmul.msk.bf16.gmra.mxu0 %vm464_vm0, %v4717_v56  ;;  %v9432_v56 = vpack.c.b16 %v8468_v44, %v8466_v2  ;;  %v3562_v18 = vpop.xlane.xlu1 %3561 }
 0x50a   : > { %v3568_v53 = vpop.xlane.xlu2 %3567 }
 0x50b   : > { %5846 = vrcp.f32 %v3568_v53 }
 0x50c   : > { %5848 = vrcp.f32 %v3538_v21 }
 0x50d   : > { %5850 = vrcp.f32 %v3535_v37 }
 0x50e   : > { %5852 = vrcp.f32 %v3562_v18 }
 0x50f   : > { %5854 = vrcp.f32 %v8772_v31 }
 0x510   : > { %3573 = vadd.xlane.f32.xlu0 %v3572_v41 }
 0x511   : > { %v5847_v20 = vpop.eup %5846 }
 0x512   : > { %v4292_v33 = vmul.f32 %v5847_v20, %v4153_v63  ;;  %v4530_v29 = vpop.permute.xlu2 %4529  ;;  %v5849_v3 = vpop.eup %5848  ;;  %v3464_v20 = vsel %vm464_vm0, %v9433_v48, 0.0  ;;  %v3575_v63 = vsel %vm464_vm0, %v8649_v5, 0.0  ;;  %v9441_v48 = vld [vmem:[#allocation73_spill] sm:$0xff] }
 0x513   : > { %v4569_v39 = vsel %vm2446_vm1, %v9432_v56, %v4530_v29  ;;  %v4282_v19 = vmul.f32 %v5849_v3, %v4038_v38  ;;  %v5851_v53 = vpop.eup %5850  ;;  %v9435_v3 = vld [vmem:[#allocation68_spill] sm:$0xff]  ;;  %v3584_v56 = vsel %vm464_vm0, %v8673_v27, 0.0  ;;  %v3473_v27 = vsel %vm464_vm0, %v8506_v54, 0.0  ;;  %v9438_v54 = vld [vmem:[#allocation69_spill] sm:$0xff] }
 0x514   : > { %v4356_v47 = vpack.c.bf16 %v4292_v33, %v4292_v33  ;;  %v4625_v9 = vunpack.c.l.bf16 %v4569_v39  ;;  %v4626_v0 = vunpack.c.h.bf16 %v4569_v39  ;;  %v4281_v16 = vmul.f32 %v5851_v53, %v4036_v58  ;;  %v9434_v33 = vld [vmem:[#allocation66_spill] sm:$0xff]  ;;  %v4101_v53 = vpop.f32.mrf.mxu2 }
 0x515   : > { %v4346_v2 = vpack.c.bf16 %v4282_v19, %v4282_v19  ;;  %v3581_v58 = vsel %vm464_vm0, %v8667_v17, 0.0  ;;  %v2274_v29 = vpack.c.bf16 %v9434_v33, %v9434_v33 }
 0x516   : > { %v8797_v6 = vunpack.c.l.b16 %v4356_v47  ;;  %v4689_v37 = vmul.f32 %v4657_v10, %v4625_v9  ;;  %v4690_v21 = vmul.f32 %v4658_v25, %v4626_v0  ;;  %v4345_v44 = vpack.c.bf16 %v4281_v16, %v4281_v16 }
 0x517   : > { %v4490_v60 = vunpack.c.l.b16 %v4346_v2  ;;  %v2275_v10 = vpack.c.bf16 %v9435_v3, %v9435_v3  ;;  %v4659_v39 = vunpack.c.l.bf16 %v2274_v29  ;;  %v9436_v25 = vpack.c.b16 %v8493_v7, %v8491_v14 }
 0x518   : > { %v4718_v26 = vpack.c.bf16 %v4690_v21, %v4689_v37  ;;  %v4519_v23 = vpack.c.b16 %v8797_v6, %v8795_v12  ;;  %v4489_v41 = vunpack.c.l.b16 %v4345_v44  ;;  %v3578_v0 = vsel %vm464_vm0, %v8655_v46, 0.0 }
 0x519   : > { %v4660_v47 = vunpack.c.l.bf16 %v2275_v10  ;;  %v3470_v14 = vsel %vm464_vm0, %v8464_v35, 0.0  ;;  %v3479_v7 = vsel %vm464_vm0, %v8535_v24, 0.0  ;;  %v3476_v46 = vsel %vm464_vm0, %v8495_v49, 0.0 }
 0x51a   : > { %5417 = vmatmul.msk.bf16.gmra.mxu0 %vm464_vm0, %v4718_v26  ;;  %v4514_v11 = vpack.c.b16 %v4490_v60, %v4489_v41  ;;  %v9437_v26 = vld [vmem:[#allocation98_spill] sm:$0xff]  ;;  %v2276_v44 = vpack.c.bf16 %v9438_v54, %v9438_v54  ;;  %v3482_v24 = vsel %vm464_vm0, %v8529_v30, 0.0  ;;  %v9440_v41 = vld [vmem:[#allocation71_spill] sm:$0xff] }
 0x51b   : > { %v3461_v2 = vsel %vm464_vm0, %v9437_v26, 0.0  ;;  %v9439_v60 = vld [vmem:[#allocation70_spill] sm:$0xff]  ;;  %v2278_v49 = vpack.c.bf16 %v9440_v41, %v9440_v41 }
 0x51c   : > { %v2277_v35 = vpack.c.bf16 %v9439_v60, %v9439_v60  ;;  %v4661_v18 = vunpack.c.l.bf16 %v2276_v44  ;;  %v4103_v29 = vpop.f32.mrf.mxu2  ;;  %v9446_v44 = vpack.c.b16 %v8643_v55, %v8640_v42  ;;  %v9447_v42 = vld [vmem:[#allocation37_spill] sm:$0xff]  ;;  %v9448_v55 = vld [vmem:[#allocation8_spill] sm:$0xff] }
 0x51e   : > { %v4662_v33 = vunpack.c.l.bf16 %v2277_v35 }
 0x524   : > { %4537 = vrot.lane.b32.xlu0 %v4514_v11, %s5906_s29 }
 0x528   : > { %3465 = vadd.xlane.f32.xlu2 %v3464_v20  ;;  %v2279_v20 = vpack.c.bf16 %v9441_v48, %v9441_v48 }
 0x530   : > { %3582 = vadd.xlane.f32.xlu2 %v3581_v58  ;;  %v9442_v58 = vpack.c.b16 %v8521_v8, %v8525_v28 }
 0x532   : > { %3576 = vadd.xlane.f32.xlu1 %v3575_v63 }
 0x537   : > { %v4532_v38 = vpop.permute.xlu1 %4531 }
 0x538   : > { %v4573_v17 = vsel %vm2446_vm1, %v9436_v25, %v4532_v38  ;;  %3585 = vadd.xlane.f32.xlu2 %v3584_v56  ;;  %v5853_v38 = vpop.eup %5852  ;;  %v4663_v56 = vunpack.c.l.bf16 %v2278_v49  ;;  %v9443_v25 = vpack.c.b16 %v8549_v4, %v8547_v43 }
 0x539   : > { %v4627_v5 = vunpack.c.l.bf16 %v4573_v17  ;;  %v4628_v9 = vunpack.c.h.bf16 %v4573_v17 }
 0x53a   : > { %3579 = vadd.xlane.f32.xlu1 %v3578_v0 }
 0x53b   : > { %v4691_v19 = vmul.f32 %v4659_v39, %v4627_v5  ;;  %v4692_v37 = vmul.f32 %v4660_v47, %v4628_v9  ;;  %v4664_v47 = vunpack.c.l.bf16 %v2279_v20  ;;  %v4290_v5 = vmul.f32 %v5853_v38, %v4103_v29  ;;  %v5855_v9 = vpop.eup %5854 }
 0x53d   : > { %v4719_v21 = vpack.c.bf16 %v4692_v37, %v4691_v19  ;;  %v4289_v19 = vmul.f32 %v5855_v9, %v4101_v53  ;;  %v4354_v43 = vpack.c.bf16 %v4290_v5, %v4290_v5 }
 0x53f   : > { %5418 = vmatmul.msk.bf16.gmra.mxu0 %vm464_vm0, %v4719_v21  ;;  %v4353_v26 = vpack.c.bf16 %v4289_v19, %v4289_v19  ;;  %v4498_v35 = vunpack.c.l.b16 %v4354_v43  ;;  %v9456_v43 = vld [vmem:[#allocation44_spill] sm:$0xff] }
 0x540   : > { %3474 = vadd.xlane.f32.xlu2 %v3473_v27  ;;  %v9444_v27 = vld [vmem:[#allocation3_spill] sm:$0xff] }
 0x541   : > { %v4497_v49 = vunpack.c.l.b16 %v4353_v26 }
 0x542   : > { %3471 = vadd.xlane.f32.xlu1 %v3470_v14  ;;  %v2284_v14 = vpack.c.bf16 %v9444_v27, %v9444_v27 }
 0x543   : > { %v4518_v20 = vpack.c.b16 %v4498_v35, %v4497_v49  ;;  %v9459_v49 = vld [vmem:[#allocation5_spill] sm:$0xff] }
 0x544   : > { %v4669_v54 = vunpack.c.l.bf16 %v2284_v14 }
 0x548   : > { %3480 = vadd.xlane.f32.xlu2 %v3479_v7  ;;  %v9445_v7 = vld [vmem:[#allocation27_spill] sm:$0xff] }
 0x54a   : > { %3477 = vadd.xlane.f32.xlu1 %v3476_v46  ;;  %v2285_v46 = vpack.c.bf16 %v9445_v7, %v9445_v7 }
 0x54b   : > { %v8830_v16 = vpop.xlane.xlu2 %3459 }
 0x54c   : > { %v4670_v60 = vunpack.c.l.bf16 %v2285_v46 }
 0x54e   : > { %3462 = vadd.xlane.f32.xlu0 %v3461_v2 }
 0x550   : > { %v4534_v11 = vpop.permute.xlu0 %4533  ;;  %3483 = vadd.xlane.f32.xlu2 %v3482_v24 }
 0x551   : > { %v4577_v63 = vsel %vm2446_vm1, %v9442_v58, %v4534_v11 }
 0x552   : > { %v4629_v3 = vunpack.c.l.bf16 %v4577_v63  ;;  %v4630_v30 = vunpack.c.h.bf16 %v4577_v63  ;;  %v1384_v63 = vadd.f32 %v9448_v55, %v9447_v42 }
 0x553   : > { %v4536_v10 = vpop.permute.xlu2 %4535 }
 0x554   : > { %v4693_v39 = vmul.f32 %v4661_v18, %v4629_v3  ;;  %v4694_v31 = vmul.f32 %v4662_v33, %v4630_v30  ;;  %v4581_v17 = vsel %vm2446_vm1, %v9443_v25, %v4536_v10 }
 0x555   : > { %v4631_v8 = vunpack.c.l.bf16 %v4581_v17  ;;  %v4632_v28 = vunpack.c.h.bf16 %v4581_v17 }
 0x556   : > { %v4720_v0 = vpack.c.bf16 %v4694_v31, %v4693_v39  ;;  %v9452_v39 = vld [vmem:[#allocation48_spill] sm:$0xff] }
 0x557   : > { %v4695_v37 = vmul.f32 %v4663_v56, %v4631_v8  ;;  %v4696_v21 = vmul.f32 %v4664_v47, %v4632_v28  ;;  %v9451_v56 = vld [vmem:[#allocation43_spill] sm:$0xff]  ;;  %v9453_v47 = vld [vmem:[#allocation12_spill] sm:$0xff] }
 0x558   : > { %5419 = vmatmul.msk.bf16.gmra.mxu0 %vm464_vm0, %v4720_v0  ;;  %v1389_v31 = vadd.f32 %v9452_v39, %v9451_v56  ;;  %v2282_v5 = vpack.c.bf16 %v9453_v47, %v9453_v47  ;;  %v9454_v8 = vld [vmem:[#allocation15_spill] sm:$0xff] }
 0x559   : > { %v4721_v4 = vpack.c.bf16 %v4696_v21, %v4695_v37  ;;  %v2283_v28 = vpack.c.bf16 %v9454_v8, %v9454_v8  ;;  %v9455_v37 = vpack.c.b16 %v8611_v22, %v8609_v34  ;;  %v9462_v56 = vld [vmem:[#allocation19_spill] sm:$0xff] }
 0x55a   : > { %v4667_v27 = vunpack.c.l.bf16 %v2282_v5 }
 0x55b   : > { %v4542_v2 = vpop.permute.xlu2 %4541  ;;  %v4668_v14 = vunpack.c.l.bf16 %v2283_v28 }
 0x55c   : > { %v4593_v53 = vsel %vm2446_vm1, %v9446_v44, %v4542_v2 }
 0x55d   : > { %v4637_v24 = vunpack.c.l.bf16 %v4593_v53  ;;  %v4638_v41 = vunpack.c.h.bf16 %v4593_v53 }
 0x55f   : > { %v8862_v11 = vmul.f32 %v4669_v54, %v4637_v24  ;;  %v8864_v48 = vmul.f32 %v4670_v60, %v4638_v41  ;;  %v4156_v60 = vpop.f32.mrf.mxu3  ;;  %v9458_v41 = vld [vmem:[#allocation45_spill] sm:$0xff] }
 0x561   : > { %v4724_v58 = vpack.c.bf16 %v8864_v48, %v8862_v11  ;;  %v9476_v48 = vld [vmem:[#allocation101_spill] sm:$0xff] }
 0x562   : > { %4543 = vrot.lane.b32.xlu0 %v4517_v50, %s5906_s29  ;;  %v9450_v50 = vld [vmem:[#allocation28_spill] sm:$0xff]  ;;  %v8887_v38 = vpop.xlane.xlu1 %3456 }
 0x563   : > { %4545 = vrot.lane.b32.xlu1 %v4518_v20, %s5906_s29  ;;  %v1386_v29 = vadd.f32 %v9450_v50, %v9449_v61  ;;  %v1394_v20 = vadd.f32 %v9459_v49, %v9458_v41 }
 0x565   : > { %v4820_v18 = vpop.f32.mrf.mxu0 }
 0x566   : > { %v4821_v33 = vadd.f32 %v4820_v18, %v1384_v63 }
 0x568   : > { %5420 = vmatmul.msk.bf16.gmra.mxu0 %vm464_vm0, %v4721_v4  ;;  %v4900_v57 = vpack.c.bf16 %v4821_v33, %v4821_v33  ;;  %v9457_v4 = vld [vmem:[#allocation36_spill] sm:$0xff] }
 0x569   : > { %v1391_v26 = vadd.f32 %v9457_v4, %v9456_v43  ;;  %v9467_v43 = vld [vmem:[#allocation102_spill] sm:$0xff]  ;;  %v9468_v4 = vld [vmem:[#allocation103_spill] sm:$0xff] }
 0x56a   : > { %4933 = vst.msk [vmem:[%s8880_s23] sm:$0xf] %vm4932_vm11, %v4900_v57  ;;  %v4158_v57 = vpop.f32.mrf.mxu3 }
 0x56d   : > { %v4822_v3 = vpop.f32.mrf.mxu0 }
 0x56e   : > { %v4823_v30 = vadd.f32 %v4822_v3, %v1386_v29  ;;  %v9460_v29 = vld [vmem:[#allocation100_spill] sm:$0xff] }
 0x56f   : > { %v3467_v3 = vsel %vm464_vm0, %v9460_v29, 0.0 }
 0x570   : > { %v4901_v10 = vpack.c.bf16 %v4823_v30, %v4823_v30  ;;  %v3488_v30 = vsel %vm464_vm0, %v8570_v36, 0.0 }
 0x572   : > { %4934 = vst.msk [vmem:[%s8880_s23 + $0x4] sm:$0xf] %vm4932_vm11, %v4901_v10  ;;  %v9461_v10 = vld [vmem:[#allocation46_spill] sm:$0xff] }
 0x573   : > { %v1396_v39 = vadd.f32 %v9462_v56, %v9461_v10 }
 0x575   : > { %v4825_v25 = vpop.f32.mrf.mxu0 }
 0x576   : > { %v4826_v17 = vadd.f32 %v4825_v25, %v1389_v31 }
 0x578   : > { %v4902_v9 = vpack.c.bf16 %v4826_v17, %v4826_v17 }
 0x57a   : > { %v4540_v0 = vpop.permute.xlu1 %4539  ;;  %4935 = vst.msk [vmem:[%s8880_s23 + $0x8] sm:$0xf] %vm4932_vm11, %v4902_v9  ;;  %v9463_v9 = vld [vmem:[#allocation75_spill] sm:$0xff] }
 0x57b   : > { %v3571_v19 = vpop.xlane.xlu0 %3570  ;;  %v4589_v21 = vsel %vm2446_vm1, %v9455_v37, %v4540_v0  ;;  %v2280_v0 = vpack.c.bf16 %v9463_v9, %v9463_v9  ;;  %v9465_v37 = vld [vmem:[#allocation4_spill] sm:$0xff] }
 0x57c   : > { %v4635_v7 = vunpack.c.l.bf16 %v4589_v21  ;;  %v4636_v46 = vunpack.c.h.bf16 %v4589_v21  ;;  %5856 = vrcp.f32 %v3571_v19  ;;  %v9464_v19 = vld [vmem:[#allocation77_spill] sm:$0xff] }
 0x57d   : > { %v4827_v44 = vpop.f32.mrf.mxu0  ;;  %v2281_v36 = vpack.c.bf16 %v9464_v19, %v9464_v19  ;;  %v9466_v21 = vld [vmem:[#allocation9_spill] sm:$0xff] }
 0x57e   : > { %v8905_v2 = vmul.f32 %v4667_v27, %v4635_v7  ;;  %v8907_v54 = vmul.f32 %v4668_v14, %v4636_v46  ;;  %v4828_v53 = vadd.f32 %v4827_v44, %v1391_v26  ;;  %v1399_v27 = vadd.f32 %v9466_v21, %v9465_v37  ;;  %v4161_v14 = vpop.f32.mrf.mxu3 }
 0x57f   : > { %v4665_v46 = vunpack.c.l.bf16 %v2280_v0  ;;  %v9469_v26 = vpack.c.b16 %v9467_v43, %v9468_v4 }
 0x580   : > { %v4723_v34 = vpack.c.bf16 %v8907_v54, %v8905_v2  ;;  %v4903_v22 = vpack.c.bf16 %v4828_v53, %v4828_v53  ;;  %v9472_v54 = vld [vmem:[#allocation2_spill] sm:$0xff] }
 0x582   : > { %4936 = vst.msk [vmem:[%s8880_s23 + $0xc] sm:$0xf] %vm4932_vm11, %v4903_v22  ;;  %v5857_v24 = vpop.eup %5856 }
 0x583   : > { %v3574_v35 = vpop.xlane.xlu0 %3573  ;;  %v4293_v55 = vmul.f32 %v5857_v24, %v4156_v60  ;;  %v4666_v60 = vunpack.c.l.bf16 %v2281_v36 }
 0x584   : > { %5858 = vrcp.f32 %v3574_v35 }
 0x585   : > { %v4357_v61 = vpack.c.bf16 %v4293_v55, %v4293_v55 }
 0x586   : > { %v4830_v42 = vpop.f32.mrf.mxu0 }
 0x587   : > { %v4831_v63 = vadd.f32 %v4830_v42, %v1394_v20  ;;  %v4501_v17 = vunpack.c.l.b16 %v4357_v61  ;;  %v4163_v61 = vpop.f32.mrf.mxu3 }
 0x589   : > { %v4904_v18 = vpack.c.bf16 %v4831_v63, %v4831_v63  ;;  %v9470_v63 = vld [vmem:[#allocation47_spill] sm:$0xff] }
 0x58a   : > { %v5859_v33 = vpop.eup %5858 }
 0x58b   : > { %v4294_v50 = vmul.f32 %v5859_v33, %v4158_v57  ;;  %4937 = vst.msk [vmem:[%s8880_s23 + $0x10] sm:$0xf] %vm4932_vm11, %v4904_v18  ;;  %v9471_v18 = vld [vmem:[#allocation25_spill] sm:$0xff] }
 0x58c   : > { %3468 = vadd.xlane.f32.xlu0 %v3467_v3  ;;  %v1401_v33 = vadd.f32 %v9471_v18, %v9470_v63 }
 0x58d   : > { %v4358_v31 = vpack.c.bf16 %v4294_v50, %v4294_v50  ;;  %3489 = vadd.xlane.f32.xlu1 %v3488_v30 }
 0x58e   : > { %v4832_v25 = vpop.f32.mrf.mxu0 }
 0x58f   : > { %v4502_v47 = vunpack.c.l.b16 %v4358_v31  ;;  %v4833_v5 = vadd.f32 %v4832_v25, %v1396_v39  ;;  %v4166_v10 = vpop.f32.mrf.mxu3 }
 0x591   : > { %v4905_v8 = vpack.c.bf16 %v4833_v5, %v4833_v5  ;;  %v4520_v28 = vpack.c.b16 %v4502_v47, %v4501_v17 }
 0x593   : > { %4938 = vst.msk [vmem:[%s8880_s23 + $0x14] sm:$0xf] %vm4932_vm11, %v4905_v8  ;;  %4549 = vrot.lane.b32.xlu2 %v4520_v28, %s5906_s29 }
 0x596   : > { %v4538_v7 = vpop.permute.xlu0 %4537 }
 0x597   : > { %v4585_v44 = vsel %vm2446_vm1, %v9469_v26, %v4538_v7  ;;  %v4835_v53 = vpop.f32.mrf.mxu0  ;;  %v4168_v17 = vpop.f32.mrf.mxu3  ;;  %v9474_v26 = vld [vmem:[#allocation13_spill] sm:$0xff] }
 0x598   : > { %v4633_v22 = vunpack.c.l.bf16 %v4585_v44  ;;  %v4634_v35 = vunpack.c.h.bf16 %v4585_v44  ;;  %v4836_v24 = vadd.f32 %v4835_v53, %v1399_v27  ;;  %v9475_v44 = vld [vmem:[#allocation26_spill] sm:$0xff] }
 0x599   : > { %v1406_v53 = vadd.f32 %v9475_v44, %v9474_v26 }
 0x59a   : > { %v4697_v41 = vmul.f32 %v4665_v46, %v4633_v22  ;;  %v4698_v49 = vmul.f32 %v4666_v60, %v4634_v35  ;;  %v4906_v20 = vpack.c.bf16 %v4836_v24, %v4836_v24 }
 0x59b   : > { %v3466_v42 = vpop.xlane.xlu2 %3465 }
 0x59c   : > { %v4722_v55 = vpack.c.bf16 %v4698_v49, %v4697_v41  ;;  %4939 = vst.msk [vmem:[%s8880_s23 + $0x18] sm:$0xf] %vm4932_vm11, %v4906_v20 }
 0x59e   : > { %5421 = vmatmul.msk.bf16.gmra.mxu0 %vm464_vm0, %v4722_v55 }
 0x59f   : > { %v4837_v57 = vpop.f32.mrf.mxu0 }
 0x5a0   : > { %v4838_v50 = vadd.f32 %v4837_v57, %v1401_v33  ;;  %4547 = vrot.lane.b32.xlu0 %v4519_v23, %s5906_s29  ;;  %v9477_v57 = vld [vmem:[#allocation29_spill] sm:$0xff] }
 0x5a2   : > { %v4907_v29 = vpack.c.bf16 %v4838_v50, %v4838_v50 }
 0x5a3   : > { %v3583_v3 = vpop.xlane.xlu2 %3582 }
 0x5a4   : > { %4940 = vst.msk [vmem:[%s8880_s23 + $0x1c] sm:$0xf] %vm4932_vm11, %v4907_v29  ;;  %5860 = vrcp.f32 %v3583_v3 }
 0x5a5   : > { %v3577_v30 = vpop.xlane.xlu1 %3576 }
 0x5a6   : > { %5862 = vrcp.f32 %v3577_v30 }
 0x5aa   : > { %v5861_v39 = vpop.eup %5860 }
 0x5ab   : > { %v3586_v56 = vpop.xlane.xlu2 %3585  ;;  %v4297_v12 = vmul.f32 %v5861_v39, %v4166_v10  ;;  %v9480_v10 = vld [vmem:[#allocation50_spill] sm:$0xff] }
 0x5ac   : > { %5864 = vrcp.f32 %v3586_v56  ;;  %v5863_v25 = vpop.eup %5862 }
 0x5ad   : > { %v3580_v31 = vpop.xlane.xlu1 %3579  ;;  %v4295_v6 = vmul.f32 %v5863_v25, %v4161_v14  ;;  %v4361_v47 = vpack.c.bf16 %v4297_v12, %v4297_v12 }
 0x5ae   : > { %5422 = vmatmul.msk.bf16.gmra.mxu0 %vm464_vm0, %v4723_v34  ;;  %5866 = vrcp.f32 %v3580_v31  ;;  %v9473_v34 = vld [vmem:[#allocation16_spill] sm:$0xff] }
 0x5af   : > { %v4359_v28 = vpack.c.bf16 %v4295_v6, %v4295_v6  ;;  %v4505_v19 = vunpack.c.l.b16 %v4361_v47  ;;  %v1404_v7 = vadd.f32 %v9473_v34, %v9472_v54  ;;  %5868 = vrcp.f32 %v8887_v38 }
 0x5b0   : > { %5870 = vrcp.f32 %v8830_v16  ;;  %v3485_v16 = vsel %vm464_vm0, %v9476_v48, 0.0 }
 0x5b1   : > { %v4503_v21 = vunpack.c.l.b16 %v4359_v28 }
 0x5b2   : > { %v5865_v23 = vpop.eup %5864 }
 0x5b3   : > { %v4298_v5 = vmul.f32 %v5865_v23, %v4168_v17 }
 0x5b4   : > { %v5867_v8 = vpop.eup %5866 }
 0x5b5   : > { %v4362_v9 = vpack.c.bf16 %v4298_v5, %v4298_v5  ;;  %v4296_v0 = vmul.f32 %v5867_v8, %v4163_v61  ;;  %v5869_v60 = vpop.eup %5868 }
 0x5b6   : > { %v5871_v41 = vpop.eup %5870  ;;  %v4255_v38 = vmul.f32 %v5869_v60, %v8678_v62  ;;  %v2286_v62 = vpack.c.bf16 %v9477_v57, %v9477_v57 }
 0x5b7   : > { %v4506_v36 = vunpack.c.l.b16 %v4362_v9  ;;  %v4360_v37 = vpack.c.bf16 %v4296_v0, %v4296_v0  ;;  %v4256_v11 = vmul.f32 %v5871_v41, %v8683_v15  ;;  %v9478_v15 = vld [vmem:[#allocation42_spill] sm:$0xff] }
 0x5b8   : > { %v4319_v20 = vpack.c.bf16 %v4255_v38, %v4255_v38  ;;  %v2287_v29 = vpack.c.bf16 %v9478_v15, %v9478_v15  ;;  %v4671_v25 = vunpack.c.l.bf16 %v2286_v62 }
 0x5b9   : > { %v4504_v27 = vunpack.c.l.b16 %v4360_v37  ;;  %v4522_v2 = vpack.c.b16 %v4506_v36, %v4505_v19  ;;  %v4320_v55 = vpack.c.bf16 %v4256_v11, %v4256_v11  ;;  %v9481_v37 = vld [vmem:[#allocation20_spill] sm:$0xff] }
 0x5ba   : > { %v4415_v18 = vunpack.c.l.b16 %v4319_v20  ;;  %v4672_v17 = vunpack.c.l.bf16 %v2287_v29 }
 0x5bb   : > { %4553 = vrot.lane.b32.xlu1 %v4522_v2, %s5906_s29  ;;  %v4521_v14 = vpack.c.b16 %v4504_v27, %v4503_v21  ;;  %v4416_v50 = vunpack.c.l.b16 %v4320_v55  ;;  %v9482_v21 = vld [vmem:[#allocation51_spill] sm:$0xff] }
 0x5bc   : > { %v4840_v46 = vpop.f32.mrf.mxu0  ;;  %v1411_v27 = vadd.f32 %v9482_v21, %v9481_v37 }
 0x5bd   : > { %v4841_v43 = vadd.f32 %v4840_v46, %v1404_v7  ;;  %4551 = vrot.lane.b32.xlu2 %v4521_v14, %s5906_s29  ;;  %v4437_v30 = vpack.c.b16 %v4416_v50, %v4415_v18  ;;  %v9483_v46 = vld [vmem:[#allocation38_spill] sm:$0xff]  ;;  %v9488_v18 = vld [vmem:[#allocation55_spill] sm:$0xff]  ;;  %v3475_v50 = vpop.xlane.xlu2 %3474 }
 0x5be   : > { %5423 = vmatmul.msk.bf16.gmra.mxu0 %vm464_vm0, %v4724_v58  ;;  %v3472_v58 = vpop.xlane.xlu1 %3471 }
 0x5bf   : > { %v4908_v4 = vpack.c.bf16 %v4841_v43, %v4841_v43  ;;  %v2288_v43 = vpack.c.bf16 %v9483_v46, %v9483_v46 }
 0x5c1   : > { %4941 = vst.msk [vmem:[%s8880_s23 + $0x20] sm:$0xf] %vm4932_vm11, %v4908_v4  ;;  %v3463_v35 = vpop.xlane.xlu0 %3462  ;;  %v9484_v4 = vld [vmem:[#allocation81_spill] sm:$0xff]  ;;  %v4673_v41 = vunpack.c.l.bf16 %v2288_v43 }
 0x5c2   : > { %5872 = vrcp.f32 %v3463_v35  ;;  %v2289_v26 = vpack.c.bf16 %v9484_v4, %v9484_v4  ;;  %v9486_v35 = vld [vmem:[#allocation53_spill] sm:$0xff] }
 0x5c3   : > { %5874 = vrcp.f32 %v3466_v42  ;;  %v9479_v42 = vld [vmem:[#allocation18_spill] sm:$0xff] }
 0x5c4   : > { %v4842_v22 = vpop.f32.mrf.mxu0  ;;  %v1409_v56 = vadd.f32 %v9480_v10, %v9479_v42  ;;  %v4674_v38 = vunpack.c.l.bf16 %v2289_v26  ;;  %5876 = vrcp.f32 %v3472_v58  ;;  %v9489_v58 = vld [vmem:[#allocation83_spill] sm:$0xff] }
 0x5c5   : > { %v4843_v24 = vadd.f32 %v4842_v22, %v1406_v53  ;;  %v9485_v22 = vld [vmem:[#allocation24_spill] sm:$0xff]  ;;  %v3481_v10 = vpop.xlane.xlu2 %3480 }
 0x5c6   : > { %v3478_v39 = vpop.xlane.xlu1 %3477 }
 0x5c7   : > { %v4909_v49 = vpack.c.bf16 %v4843_v24, %v4843_v24  ;;  %v1414_v24 = vadd.f32 %v9486_v35, %v9485_v22  ;;  %v9494_v35 = vld [vmem:[#allocation87_spill] sm:$0xff] }
 0x5c8   : > { %v5873_v63 = vpop.eup %5872 }
 0x5c9   : > { %4942 = vst.msk [vmem:[%s8880_s23 + $0x24] sm:$0xf] %vm4932_vm11, %v4909_v49  ;;  %v5875_v33 = vpop.eup %5874  ;;  %v4257_v61 = vmul.f32 %v5873_v63, %v8695_v1  ;;  %v9487_v63 = vld [vmem:[#allocation30_spill] sm:$0xff] }
 0x5ca   : > { %3486 = vadd.xlane.f32.xlu0 %v3485_v16  ;;  %v4258_v3 = vmul.f32 %v5875_v33, %v8708_v40  ;;  %v1416_v33 = vadd.f32 %v9488_v18, %v9487_v63  ;;  %v5877_v29 = vpop.eup %5876  ;;  %v9497_v63 = vld [vmem:[#allocation22_spill] sm:$0xff]  ;;  %v9498_v18 = vld [vmem:[#allocation35_spill] sm:$0xff] }
 0x5cb   : > { %v4321_v12 = vpack.c.bf16 %v4257_v61, %v4257_v61 }
 0x5cc   : > { %v4322_v8 = vpack.c.bf16 %v4258_v3, %v4258_v3 }
 0x5cd   : > { %v4417_v0 = vunpack.c.l.b16 %v4321_v12 }
 0x5ce   : > { %v4418_v36 = vunpack.c.l.b16 %v4322_v8 }
 0x5d0   : > { %v4438_v54 = vpack.c.b16 %v4418_v36, %v4417_v0 }
 0x5d4   : > { %v4544_v31 = vpop.permute.xlu0 %4543 }
 0x5d5   : > { %v4597_v6 = vsel %vm2446_vm1, %v4437_v30, %v4544_v31  ;;  %v4845_v23 = vpop.f32.mrf.mxu0  ;;  %v4546_v2 = vpop.permute.xlu1 %4545  ;;  %v4260_v30 = vmul.f32 %v5877_v29, %v8700_v13 }
 0x5d6   : > { %v4639_v1 = vunpack.c.l.bf16 %v4597_v6  ;;  %v4640_v47 = vunpack.c.h.bf16 %v4597_v6  ;;  %v4846_v5 = vadd.f32 %v4845_v23, %v1409_v56  ;;  %v4601_v14 = vsel %vm2446_vm1, %v4438_v54, %v4546_v2 }
 0x5d7   : > { %v4641_v53 = vunpack.c.l.bf16 %v4601_v14  ;;  %v4642_v60 = vunpack.c.h.bf16 %v4601_v14  ;;  %v4324_v31 = vpack.c.bf16 %v4260_v30, %v4260_v30  ;;  %v9493_v14 = vld [vmem:[#allocation23_spill] sm:$0xff] }
 0x5d8   : > { %v4703_v28 = vmul.f32 %v4671_v25, %v4639_v1  ;;  %v4704_v9 = vmul.f32 %v4672_v17, %v4640_v47  ;;  %v4910_v40 = vpack.c.bf16 %v4846_v5, %v4846_v5  ;;  %v2290_v1 = vpack.c.bf16 %v9489_v58, %v9489_v58  ;;  %v9490_v47 = vld [vmem:[#allocation85_spill] sm:$0xff]  ;;  %v9491_v5 = vld [vmem:[#allocation104_spill] sm:$0xff] }
 0x5d9   : > { %v4705_v11 = vmul.f32 %v4673_v41, %v4641_v53  ;;  %v4706_v48 = vmul.f32 %v4674_v38, %v4642_v60  ;;  %v4420_v17 = vunpack.c.l.b16 %v4324_v31  ;;  %v9495_v41 = vld [vmem:[#allocation89_spill] sm:$0xff] }
 0x5da   : > { %v4725_v19 = vpack.c.bf16 %v4704_v9, %v4703_v28  ;;  %4943 = vst.msk [vmem:[%s8880_s23 + $0x28] sm:$0xf] %vm4932_vm11, %v4910_v40  ;;  %v4675_v0 = vunpack.c.l.bf16 %v2290_v1  ;;  %v2293_v38 = vpack.c.bf16 %v9495_v41, %v9495_v41  ;;  %v9499_v31 = vld [vmem:[#allocation17_spill] sm:$0xff] }
 0x5db   : > { %v4726_v55 = vpack.c.bf16 %v4706_v48, %v4705_v11 }
 0x5dc   : > { %5424 = vmatmul.msk.bf16.gmra.mxu0 %vm464_vm0, %v4725_v19 }
 0x5dd   : > { %v4847_v34 = vpop.f32.mrf.mxu0 }
 0x5de   : > { %v4848_v7 = vadd.f32 %v4847_v34, %v1411_v27 }
 0x5e0   : > { %v4911_v44 = vpack.c.bf16 %v4848_v7, %v4848_v7  ;;  %v9492_v7 = vld [vmem:[#allocation7_spill] sm:$0xff] }
 0x5e1   : > { %v1419_v46 = vadd.f32 %v9493_v14, %v9492_v7  ;;  %v9505_v7 = vld [vmem:[#allocation11_spill] sm:$0xff]  ;;  %v9506_v14 = vld [vmem:[#allocation76_spill] sm:$0xff] }
 0x5e2   : > { %4944 = vst.msk [vmem:[%s8880_s23 + $0x2c] sm:$0xf] %vm4932_vm11, %v4911_v44 }
 0x5e5   : > { %v4850_v49 = vpop.f32.mrf.mxu0 }
 0x5e6   : > { %v4851_v16 = vadd.f32 %v4850_v49, %v1414_v24  ;;  %v2292_v24 = vpack.c.bf16 %v9494_v35, %v9494_v35  ;;  %v9508_v35 = vld [vmem:[#allocation78_spill] sm:$0xff] }
 0x5e8   : > { %v4912_v20 = vpack.c.bf16 %v4851_v16, %v4851_v16 }
 0x5ea   : > { %4945 = vst.msk [vmem:[%s8880_s23 + $0x30] sm:$0xf] %vm4932_vm11, %v4912_v20  ;;  %v9496_v20 = vld [vmem:[#allocation10_spill] sm:$0xff] }
 0x5ec   : > { %5425 = vmatmul.msk.bf16.gmra.mxu0 %vm464_vm0, %v4726_v55 }
 0x5ed   : > { %v4852_v57 = vpop.f32.mrf.mxu0 }
 0x5ee   : > { %v4853_v62 = vadd.f32 %v4852_v57, %v1416_v33  ;;  %v1421_v33 = vadd.f32 %v9498_v18, %v9497_v63  ;;  %v4677_v57 = vunpack.c.l.bf16 %v2292_v24  ;;  %v9509_v18 = vld [vmem:[#allocation93_spill] sm:$0xff] }
 0x5f0   : > { %v4913_v61 = vpack.c.bf16 %v4853_v62, %v4853_v62  ;;  %v4678_v62 = vunpack.c.l.bf16 %v2293_v38 }
 0x5f2   : > { %4946 = vst.msk [vmem:[%s8880_s23 + $0x34] sm:$0xf] %vm4932_vm11, %v4913_v61 }
 0x5ff   : > { %v3469_v15 = vpop.xlane.xlu0 %3468 }
 0x600   : > { %5878 = vrcp.f32 %v3469_v15 }
 0x601   : > { %5880 = vrcp.f32 %v3478_v39  ;;  %v2291_v39 = vpack.c.bf16 %v9490_v47, %v9490_v47  ;;  %v9501_v47 = vld [vmem:[#allocation91_spill] sm:$0xff] }
 0x602   : > { %5882 = vrcp.f32 %v3475_v50 }
 0x603   : > { %v4676_v19 = vunpack.c.l.bf16 %v2291_v39  ;;  %v2294_v39 = vpack.c.bf16 %v9501_v47, %v9501_v47 }
 0x606   : > { %v5879_v3 = vpop.eup %5878 }
 0x607   : > { %v4259_v42 = vmul.f32 %v5879_v3, %v8687_v32  ;;  %v5881_v25 = vpop.eup %5880  ;;  %v3484_v32 = vpop.xlane.xlu2 %3483 }
 0x608   : > { %v5883_v6 = vpop.eup %5882  ;;  %v4262_v23 = vmul.f32 %v5881_v25, %v8728_v52  ;;  %5884 = vrcp.f32 %v3484_v32  ;;  %v9500_v25 = vld [vmem:[#allocation72_spill] sm:$0xff] }
 0x609   : > { %v4323_v56 = vpack.c.bf16 %v4259_v42, %v4259_v42  ;;  %v4261_v13 = vmul.f32 %v5883_v6, %v9491_v5  ;;  %5886 = vrcp.f32 %v3481_v10  ;;  %v9502_v5 = vld [vmem:[#allocation92_spill] sm:$0xff] }
 0x60a   : > { %v4326_v9 = vpack.c.bf16 %v4262_v23, %v4262_v23 }
 0x60b   : > { %v4419_v12 = vunpack.c.l.b16 %v4323_v56  ;;  %v4325_v52 = vpack.c.bf16 %v4261_v13, %v4261_v13  ;;  %v2295_v13 = vpack.c.bf16 %v9502_v5, %v9502_v5  ;;  %v9515_v5 = vld [vmem:[#allocation39_spill] sm:$0xff] }
 0x60c   : > { %v4422_v2 = vunpack.c.l.b16 %v4326_v9  ;;  %v9503_v9 = vld [vmem:[#allocation14_spill] sm:$0xff] }
 0x60d   : > { %v4439_v8 = vpack.c.b16 %v4420_v17, %v4419_v12  ;;  %v4421_v34 = vunpack.c.l.b16 %v4325_v52  ;;  %v1424_v12 = vadd.f32 %v9500_v25, %v9499_v31 }
 0x60e   : > { %v5885_v44 = vpop.eup %5884 }
 0x60f   : > { %v4550_v43 = vpop.permute.xlu2 %4549  ;;  %v4440_v4 = vpack.c.b16 %v4422_v2, %v4421_v34  ;;  %v5887_v22 = vpop.eup %5886  ;;  %v4264_v11 = vmul.f32 %v5885_v44, %v8746_v45 }
 0x610   : > { %v4263_v55 = vmul.f32 %v5887_v22, %v9496_v20  ;;  %v3490_v2 = vpop.xlane.xlu1 %3489  ;;  %v9507_v22 = vld [vmem:[#allocation33_spill] sm:$0xff] }
 0x611   : > { %v4609_v60 = vsel %vm2446_vm1, %v4440_v4, %v4550_v43  ;;  %v4328_v61 = vpack.c.bf16 %v4264_v11, %v4264_v11  ;;  %5888 = vrcp.f32 %v3490_v2  ;;  %v1431_v24 = vadd.f32 %v9508_v35, %v9507_v22 }
 0x612   : > { %v4548_v28 = vpop.permute.xlu0 %4547  ;;  %v4645_v48 = vunpack.c.l.bf16 %v4609_v60  ;;  %v4646_v16 = vunpack.c.h.bf16 %v4609_v60  ;;  %v4327_v30 = vpack.c.bf16 %v4263_v55, %v4263_v55 }
 0x613   : > { %v4605_v40 = vsel %vm2446_vm1, %v4439_v8, %v4548_v28  ;;  %v4424_v45 = vunpack.c.l.b16 %v4328_v61 }
 0x614   : > { %v4643_v36 = vunpack.c.l.bf16 %v4605_v40  ;;  %v4644_v37 = vunpack.c.h.bf16 %v4605_v40  ;;  %v4709_v15 = vmul.f32 %v4677_v57, %v4645_v48  ;;  %v4710_v29 = vmul.f32 %v4678_v62, %v4646_v16  ;;  %v9504_v40 = vld [vmem:[#allocation74_spill] sm:$0xff] }
 0x615   : > { %v4423_v56 = vunpack.c.l.b16 %v4327_v30  ;;  %v9510_v57 = vld [vmem:[#allocation94_spill] sm:$0xff] }
 0x616   : > { %v4707_v21 = vmul.f32 %v4675_v0, %v4643_v36  ;;  %v4708_v27 = vmul.f32 %v4676_v19, %v4644_v37  ;;  %v4728_v10 = vpack.c.bf16 %v4710_v29, %v4709_v15  ;;  %v1426_v0 = vadd.f32 %v9504_v40, %v9503_v9  ;;  %v9517_v40 = vld [vmem:[#allocation52_spill] sm:$0xff] }
 0x617   : > { %v4552_v6 = vpop.permute.xlu2 %4551  ;;  %v4441_v23 = vpack.c.b16 %v4424_v45, %v4423_v56  ;;  %v4679_v19 = vunpack.c.l.bf16 %v2294_v39  ;;  %v4680_v36 = vunpack.c.l.bf16 %v2295_v13  ;;  %v5889_v44 = vpop.eup %5888  ;;  %v9512_v56 = vld [vmem:[#allocation6_spill] sm:$0xff]  ;;  %v9516_v13 = vld [vmem:[#allocation32_spill] sm:$0xff] }
 0x618   : > { %v4727_v54 = vpack.c.bf16 %v4708_v27, %v4707_v21  ;;  %v4266_v60 = vmul.f32 %v5889_v44, %v8769_v51  ;;  %v2297_v51 = vpack.c.bf16 %v9510_v57, %v9510_v57 }
 0x619   : > { %v4613_v1 = vsel %vm2446_vm1, %v4441_v23, %v4552_v6  ;;  %v9513_v23 = vld [vmem:[#allocation41_spill] sm:$0xff] }
 0x61a   : > { %5426 = vmatmul.msk.bf16.gmra.mxu0 %vm464_vm0, %v4727_v54  ;;  %v4647_v32 = vunpack.c.l.bf16 %v4613_v1  ;;  %v4648_v28 = vunpack.c.h.bf16 %v4613_v1  ;;  %v4330_v11 = vpack.c.bf16 %v4266_v60, %v4266_v60  ;;  %v4682_v29 = vunpack.c.l.bf16 %v2297_v51  ;;  %v9524_v60 = vld [vmem:[#allocation80_spill] sm:$0xff] }
 0x61b   : > { %v4855_v26 = vpop.f32.mrf.mxu0 }
 0x61c   : > { %v4856_v53 = vadd.f32 %v4855_v26, %v1419_v46  ;;  %v4711_v52 = vmul.f32 %v4679_v19, %v4647_v32  ;;  %v4712_v21 = vmul.f32 %v4680_v36, %v4648_v28  ;;  %v1429_v46 = vadd.f32 %v9506_v14, %v9505_v7  ;;  %v9521_v14 = vld [vmem:[#allocation57_spill] sm:$0xff] }
 0x61d   : > { %v4426_v55 = vunpack.c.l.b16 %v4330_v11 }
 0x61e   : > { %v4914_v49 = vpack.c.bf16 %v4856_v53, %v4856_v53  ;;  %v4729_v34 = vpack.c.bf16 %v4712_v21, %v4711_v52  ;;  %v9519_v21 = vld [vmem:[#allocation54_spill] sm:$0xff] }
 0x620   : > { %4947 = vst.msk [vmem:[%s8880_s23 + $0x38] sm:$0xf] %vm4932_vm11, %v4914_v49 }
 0x623   : > { %v4857_v50 = vpop.f32.mrf.mxu0 }
 0x624   : > { %v4858_v3 = vadd.f32 %v4857_v50, %v1421_v33  ;;  %v2296_v33 = vpack.c.bf16 %v9509_v18, %v9509_v18 }
 0x626   : > { %v4915_v42 = vpack.c.bf16 %v4858_v3, %v4858_v3  ;;  %v4681_v15 = vunpack.c.l.bf16 %v2296_v33 }
 0x628   : > { %4948 = vst.msk [vmem:[%s8880_s23 + $0x3c] sm:$0xf] %vm4932_vm11, %v4915_v42 }
 0x62a   : > { %5427 = vmatmul.msk.bf16.gmra.mxu0 %vm464_vm0, %v4728_v10  ;;  %v9511_v10 = vld [vmem:[#allocation49_spill] sm:$0xff] }
 0x62b   : > { %v4860_v17 = vpop.f32.mrf.mxu0  ;;  %v1434_v31 = vadd.f32 %v9512_v56, %v9511_v10 }
 0x62c   : > { %v4861_v58 = vadd.f32 %v4860_v17, %v1424_v12  ;;  %v9514_v17 = vld [vmem:[#allocation21_spill] sm:$0xff] }
 0x62d   : > { %v4554_v61 = vpop.permute.xlu1 %4553 }
 0x62e   : > { %v4916_v8 = vpack.c.bf16 %v4861_v58, %v4861_v58  ;;  %v1436_v58 = vadd.f32 %v9514_v17, %v9513_v23 }
 0x630   : > { %4949 = vst.msk [vmem:[%s8880_s23 + $0x40] sm:$0xf] %vm4932_vm11, %v4916_v8  ;;  %v1439_v8 = vadd.f32 %v9516_v13, %v9515_v5 }
 0x633   : > { %v4862_v37 = vpop.f32.mrf.mxu0 }
 0x634   : > { %v4863_v27 = vadd.f32 %v4862_v37, %v1426_v0  ;;  %v9518_v0 = vld [vmem:[#allocation34_spill] sm:$0xff] }
 0x635   : > { %v1441_v19 = vadd.f32 %v9518_v0, %v9517_v40 }
 0x636   : > { %v4917_v54 = vpack.c.bf16 %v4863_v27, %v4863_v27  ;;  %v9520_v27 = vld [vmem:[#allocation31_spill] sm:$0xff] }
 0x637   : > { %v1444_v2 = vadd.f32 %v9520_v27, %v9519_v21 }
 0x638   : > { %4950 = vst.msk [vmem:[%s8880_s23 + $0x44] sm:$0xf] %vm4932_vm11, %v4917_v54 }
 0x63a   : > { %5428 = vmatmul.msk.bf16.gmra.mxu0 %vm464_vm0, %v4729_v34 }
 0x63b   : > { %v4865_v43 = vpop.f32.mrf.mxu0 }
 0x63c   : > { %v4866_v4 = vadd.f32 %v4865_v43, %v1429_v46  ;;  %v9522_v46 = vld [vmem:[#allocation79_spill] sm:$0xff] }
 0x63d   : > { %v3487_v26 = vpop.xlane.xlu0 %3486  ;;  %v1446_v43 = vadd.f32 %v9522_v46, %v9521_v14 }
 0x63e   : > { %v4918_v53 = vpack.c.bf16 %v4866_v4, %v4866_v4  ;;  %5890 = vrcp.f32 %v3487_v26 }
 0x640   : > { %4951 = vst.msk [vmem:[%s8880_s23 + $0x48] sm:$0xf] %vm4932_vm11, %v4918_v53  ;;  %v9523_v53 = vld [vmem:[#allocation59_spill] sm:$0xff] }
 0x641   : > { %v1449_v22 = vadd.f32 %v9524_v60, %v9523_v53 }
 0x643   : > { %v4867_v41 = vpop.f32.mrf.mxu0 }
 0x644   : > { %v5891_v38 = vpop.eup %5890  ;;  %v4868_v49 = vadd.f32 %v4867_v41, %v1431_v24 }
 0x645   : > { %v4265_v48 = vmul.f32 %v5891_v38, %v8751_v59  ;;  %v9525_v38 = vld [vmem:[#allocation61_spill] sm:$0xff] }
 0x646   : > { %v4919_v16 = vpack.c.bf16 %v4868_v49, %v4868_v49  ;;  %v9526_v49 = vld [vmem:[#allocation82_spill] sm:$0xff] }
 0x647   : > { %v4329_v20 = vpack.c.bf16 %v4265_v48, %v4265_v48  ;;  %v1451_v11 = vadd.f32 %v9526_v49, %v9525_v38 }
 0x648   : > { %4952 = vst.msk [vmem:[%s8880_s23 + $0x4c] sm:$0xf] %vm4932_vm11, %v4919_v16 }
 0x649   : > { %v4425_v63 = vunpack.c.l.b16 %v4329_v20 }
 0x64b   : > { %v4442_v62 = vpack.c.b16 %v4426_v55, %v4425_v63  ;;  %v9527_v55 = vld [vmem:[#allocation63_spill] sm:$0xff]  ;;  %v9528_v63 = vld [vmem:[#allocation84_spill] sm:$0xff] }
 0x64c   : > { %v1454_v18 = vadd.f32 %v9528_v63, %v9527_v55 }
 0x64d   : > { %v4617_v50 = vsel %vm2446_vm1, %v4442_v62, %v4554_v61  ;;  %v9529_v62 = vld [vmem:[#allocation64_spill] sm:$0xff]  ;;  %v9530_v61 = vld [vmem:[#allocation86_spill] sm:$0xff] }
 0x64e   : > { %v4649_v59 = vunpack.c.l.bf16 %v4617_v50  ;;  %v4650_v3 = vunpack.c.h.bf16 %v4617_v50  ;;  %v1456_v50 = vadd.f32 %v9530_v61, %v9529_v62 }
 0x650   : > { %v4713_v30 = vmul.f32 %v4681_v15, %v4649_v59  ;;  %v4714_v42 = vmul.f32 %v4682_v29, %v4650_v3  ;;  %v9531_v3 = vld [vmem:[#allocation65_spill] sm:$0xff] }
 0x652   : > { %v4730_v45 = vpack.c.bf16 %v4714_v42, %v4713_v30  ;;  %v9532_v30 = vld [vmem:[#allocation88_spill] sm:$0xff] }
 0x653   : > { %v1459_v42 = vadd.f32 %v9532_v30, %v9531_v3 }
 0x654   : > { %5429 = vmatmul.msk.bf16.gmra.mxu0 %vm464_vm0, %v4730_v45 }
 0x659   : > { %v4870_v25 = vpop.f32.mrf.mxu0 }
 0x65a   : > { %v4871_v12 = vadd.f32 %v4870_v25, %v1434_v31  ;;  %v9533_v31 = vld [vmem:[#allocation67_spill] sm:$0xff]  ;;  %v9534_v25 = vld [vmem:[#allocation90_spill] sm:$0xff] }
 0x65c   : > { %v4920_v6 = vpack.c.bf16 %v4871_v12, %v4871_v12  ;;  %v1461_v12 = vadd.f32 %v9534_v25, %v9533_v31 }
 0x65e   : > { %4953 = vst.msk [vmem:[%s8880_s23 + $0x50] sm:$0xf] %vm4932_vm11, %v4920_v6 }
 0x661   : > { %v4872_v1 = vpop.f32.mrf.mxu0 }
 0x662   : > { %v4873_v47 = vadd.f32 %v4872_v1, %v1436_v58 }
 0x664   : > { %v4921_v39 = vpack.c.bf16 %v4873_v47, %v4873_v47 }
 0x666   : > { %4954 = vst.msk [vmem:[%s8880_s23 + $0x54] sm:$0xf] %vm4932_vm11, %v4921_v39 }
 0x669   : > { %v4875_v32 = vpop.f32.mrf.mxu0 }
 0x66a   : > { %v4876_v28 = vadd.f32 %v4875_v32, %v1439_v8 }
 0x66c   : > { %v4922_v9 = vpack.c.bf16 %v4876_v28, %v4876_v28 }
 0x66e   : > { %4955 = vst.msk [vmem:[%s8880_s23 + $0x58] sm:$0xf] %vm4932_vm11, %v4922_v9 }
 0x671   : > { %v4877_v36 = vpop.f32.mrf.mxu0 }
 0x672   : > { %v4878_v37 = vadd.f32 %v4877_v36, %v1441_v19 }
 0x674   : > { %v4923_v52 = vpack.c.bf16 %v4878_v37, %v4878_v37 }
 0x676   : > { %4956 = vst.msk [vmem:[%s8880_s23 + $0x5c] sm:$0xf] %vm4932_vm11, %v4923_v52 }
 0x697   : > { %v4880_v54 = vpop.f32.mrf.mxu0 }
 0x698   : > { %v4881_v34 = vadd.f32 %v4880_v54, %v1444_v2 }
 0x69a   : > { %v4924_v7 = vpack.c.bf16 %v4881_v34, %v4881_v34 }
 0x69c   : > { %4957 = vst.msk [vmem:[%s8880_s23 + $0x60] sm:$0xf] %vm4932_vm11, %v4924_v7 }
 0x69f   : > { %v4882_v4 = vpop.f32.mrf.mxu0 }
 0x6a0   : > { %v4883_v26 = vadd.f32 %v4882_v4, %v1446_v43 }
 0x6a2   : > { %v4925_v44 = vpack.c.bf16 %v4883_v26, %v4883_v26 }
 0x6a4   : > { %4958 = vst.msk [vmem:[%s8880_s23 + $0x64] sm:$0xf] %vm4932_vm11, %v4925_v44 }
 0x6a7   : > { %v4885_v35 = vpop.f32.mrf.mxu0 }
 0x6a8   : > { %v4886_v24 = vadd.f32 %v4885_v35, %v1449_v22 }
 0x6aa   : > { %v4926_v41 = vpack.c.bf16 %v4886_v24, %v4886_v24 }
 0x6ac   : > { %4959 = vst.msk [vmem:[%s8880_s23 + $0x68] sm:$0xf] %vm4932_vm11, %v4926_v41 }
 0x6af   : > { %v4887_v48 = vpop.f32.mrf.mxu0 }
 0x6b0   : > { %v4888_v16 = vadd.f32 %v4887_v48, %v1451_v11 }
 0x6b2   : > { %v4927_v20 = vpack.c.bf16 %v4888_v16, %v4888_v16 }
 0x6b4   : > { %4960 = vst.msk [vmem:[%s8880_s23 + $0x6c] sm:$0xf] %vm4932_vm11, %v4927_v20 }
 0x6b7   : > { %v4890_v33 = vpop.f32.mrf.mxu0 }
 0x6b8   : > { %v4891_v57 = vadd.f32 %v4890_v33, %v1454_v18 }
 0x6ba   : > { %v4928_v51 = vpack.c.bf16 %v4891_v57, %v4891_v57 }
 0x6bc   : > { %4961 = vst.msk [vmem:[%s8880_s23 + $0x70] sm:$0xf] %vm4932_vm11, %v4928_v51 }
 0x6bf   : > { %v4892_v15 = vpop.f32.mrf.mxu0 }
 0x6c0   : > { %v4893_v29 = vadd.f32 %v4892_v15, %v1456_v50 }
 0x6c2   : > { %v4929_v59 = vpack.c.bf16 %v4893_v29, %v4893_v29 }
 0x6c4   : > { %4962 = vst.msk [vmem:[%s8880_s23 + $0x74] sm:$0xf] %vm4932_vm11, %v4929_v59 }
 0x6d1   : > { %v4895_v45 = vpop.f32.mrf.mxu0 }
 0x6d2   : > { %v4896_v10 = vadd.f32 %v4895_v45, %v1459_v42 }
 0x6d4   : > { %v4930_v56 = vpack.c.bf16 %v4896_v10, %v4896_v10 }
 0x6d6   : > { %4963 = vst.msk [vmem:[%s8880_s23 + $0x78] sm:$0xf] %vm4932_vm11, %v4930_v56 }
 0x6d9   : > { %v4897_v6 = vpop.f32.mrf.mxu0 }
 0x6da   : > { %v4898_v23 = vadd.f32 %v4897_v6, %v1461_v12 }
 0x6dc   : > { %v4931_v17 = vpack.c.bf16 %v4898_v23, %v4898_v23 }
 0x6de   : > { %4964 = vst.msk [vmem:[%s8880_s23 + $0x7c] sm:$0xf] %vm4932_vm11, %v4931_v17 }
 0x6df PF: > { %s16_s21 = sadd.s32 1, %s5902_s21  }
 0x6e0   : > { %p13_p4 = scmp.ge.s32.totalorder %s16_s21, 4  }
 0x6e2   :  { %15 = sbr.rel (!%p13_p4) target bundleno = 1 (0x1), region = 74 }

</bundles_post_ra>
